<compile_context>
chip_gen: v7x
topology: tpu7x:2x2x1
jax: 0.10.0
libtpu: 0.0.40
codegen_flags: <defaults>
</compile_context>

<pallas_src>
import functools

import jax
import jax.numpy as jnp
from jax.experimental import pallas as pl
from jax.experimental.pallas import tpu as pltpu

EPS = 1e-5


def _pick_cout_tile(cout):
    if cout % 256 == 0:
        return 256
    if cout % 128 == 0:
        return 128
    return cout


@functools.lru_cache(maxsize=None)
def _vmem_limit():
    # ~96 MiB on v5e/v6e (128 MiB physical), ~48 MiB on v7x (64 MiB physical).
    try:
        cap = int(getattr(pltpu.get_tpu_info(), "vmem_capacity_bytes", 0))
    except Exception:
        cap = 0
    if cap <= 0:
        cap = 64 * 1024 * 1024          # conservative fallback (v7x physical)
    return (cap * 3) // 4


# ----------------------------------------------------------------------------
# Kernel 1: fused [optional BN+ReLU prologue] -> 3x3 conv (padding=1) + bias
#           -> per-channel (sum, sumsq) stats epilogue (per batch element).
# Grid: (N "parallel", Cout_tiles "arbitrary"); input block resident across the
# inner Cout-tile loop; stats written per (n, co) block (no residency needed).
# ----------------------------------------------------------------------------
def _conv3x3_stats_kernel(x_ref, w_ref, b_ref, sc_ref, sh_ref,
                          y_ref, stats_ref, xpad_ref,
                          *, H, W, Cin, TCo, fuse_prologue):
    # x_ref    : (1, H, W, Cin)      input tile (pre-BN activation if fused)
    # w_ref    : (9, Cin, TCo)       bf16 weights, tap-major (t = 3*dy + dx)
    # b_ref    : (1, TCo)            f32 bias
    # sc_ref   : (1, Cin)            previous layer's BN scale (prologue)
    # sh_ref   : (1, Cin)            previous layer's BN shift (prologue)
    # y_ref    : (1, H, W, TCo)      conv output (pre-BN), bf16
    # stats_ref: (1, 2, TCo)         [sum, sum of squares] for this (n, co)
    # xpad_ref : (H+2, W+2, Cin) f32 zero-bordered post-prologue activation
    co = pl.program_id(1)

    # Fill the padded scratch once per batch element; it persists across the
    # inner Cout-tile loop (scratch outlives grid steps, per-core on megacore).
    @pl.when(co == 0)
    def _fill_padded():
        xq = x_ref[0].astype(jnp.float32)                      # (H, W, Cin)
        if fuse_prologue:
            # BatchNorm affine + ReLU of the previous conv, applied on the fly.
            xq = jnp.maximum(xq * sc_ref[0, :] + sh_ref[0, :], 0.0)
        # Only the 1-pixel border strictly needs zeroing; a full zero store is
        # one cheap extra pass and keeps the code simple.
        xpad_ref[...] = jnp.zeros((H + 2, W + 2, Cin), jnp.float32)
        xpad_ref[pl.ds(1, H), pl.ds(1, W), :] = xq

    # 3x3 conv as 9 MXU matmuls with K = Cin; operands are pure window loads
    # from the padded scratch (vld slots), no concats / shifted copies.
    acc = jnp.zeros((H * W, TCo), jnp.float32)
    for dy in range(3):
        for dx in range(3):
            opnd = xpad_ref[pl.ds(dy, H), pl.ds(dx, W), :]      # (H, W, Cin)
            opnd = opnd.reshape(H * W, Cin).astype(jnp.bfloat16)
            acc += jnp.dot(opnd, w_ref[3 * dy + dx],
                           preferred_element_type=jnp.float32)
    acc = acc + b_ref[0, :]

    # Fused per-channel stats of the conv output (what BatchNorm will see).
    s = jnp.sum(acc, axis=0, keepdims=True)                     # (1, TCo)
    sq = jnp.sum(acc * acc, axis=0, keepdims=True)              # (1, TCo)
    stats_ref[...] = jnp.concatenate([s, sq], axis=0).reshape(1, 2, TCo)

    y_ref[...] = acc.reshape(1, H, W, TCo).astype(y_ref.dtype)


def conv3x3_stats(x_nhwc, w9, b, scale_in, shift_in, *, fuse_prologue):
    N, H, W, Cin = x_nhwc.shape
    Cout = w9.shape[-1]
    TCo = _pick_cout_tile(Cout)
    CO = Cout // TCo

    kernel = functools.partial(_conv3x3_stats_kernel, H=H, W=W, Cin=Cin,
                               TCo=TCo, fuse_prologue=fuse_prologue)
    y, stats = pl.pallas_call(
        kernel,
        out_shape=(jax.ShapeDtypeStruct((N, H, W, Cout), jnp.bfloat16),
                   jax.ShapeDtypeStruct((N, 2, Cout), jnp.float32)),
        grid_spec=pltpu.PrefetchScalarGridSpec(
            num_scalar_prefetch=0,
            grid=(N, CO),
            in_specs=[
                pl.BlockSpec((1, H, W, Cin), lambda n, co: (n, 0, 0, 0)),
                pl.BlockSpec((9, Cin, TCo), lambda n, co: (0, 0, co)),
                pl.BlockSpec((1, TCo), lambda n, co: (0, co)),
                pl.BlockSpec((1, Cin), lambda n, co: (0, 0)),
                pl.BlockSpec((1, Cin), lambda n, co: (0, 0)),
            ],
            out_specs=[
                pl.BlockSpec((1, H, W, TCo), lambda n, co: (n, 0, 0, co)),
                pl.BlockSpec((1, 2, TCo), lambda n, co: (n, 0, co)),
            ],
            scratch_shapes=[pltpu.VMEM((H + 2, W + 2, Cin), jnp.float32)],
        ),
        compiler_params=pltpu.CompilerParams(
            dimension_semantics=("parallel", "arbitrary"),
            vmem_limit_bytes=_vmem_limit()),
    )(x_nhwc, w9, b.reshape(1, Cout),
      scale_in.reshape(1, Cin), shift_in.reshape(1, Cin))
    return y, stats


# ----------------------------------------------------------------------------
# Kernel 2: final fused BatchNorm affine + ReLU (only needed once per block;
# the first BN+ReLU is fused into the second conv's prologue).
# ----------------------------------------------------------------------------
def _bn_relu_kernel(y_ref, scale_ref, shift_ref, o_ref):
    y = y_ref[...].astype(jnp.float32)                          # (1, H, W, C)
    out = y * scale_ref[0, :] + shift_ref[0, :]
    o_ref[...] = jnp.maximum(out, 0.0).astype(o_ref.dtype)


def bn_relu(y_nhwc, scale, shift):
    N, H, W, C = y_nhwc.shape
    return pl.pallas_call(
        _bn_relu_kernel,
        out_shape=jax.ShapeDtypeStruct((N, H, W, C), jnp.float32),
        grid_spec=pltpu.PrefetchScalarGridSpec(
            num_scalar_prefetch=0,
            grid=(N,),
            in_specs=[
                pl.BlockSpec((1, H, W, C), lambda n: (n, 0, 0, 0)),
                pl.BlockSpec((1, C), lambda n: (0, 0)),
                pl.BlockSpec((1, C), lambda n: (0, 0)),
            ],
            out_specs=pl.BlockSpec((1, H, W, C), lambda n: (n, 0, 0, 0)),
        ),
        compiler_params=pltpu.CompilerParams(
            dimension_semantics=("parallel",),
            vmem_limit_bytes=_vmem_limit()),
    )(y_nhwc, scale.reshape(1, C), shift.reshape(1, C))


# ----------------------------------------------------------------------------
# DoubleConv forward
# ----------------------------------------------------------------------------
def _bn_affine(stats, gamma, beta, count):
    mean = stats[0] / count
    # clamp: E[x^2] - mean^2 can go slightly negative from cancellation
    var = jnp.maximum(stats[1] / count - mean * mean, 0.0)
    scale = gamma * jax.lax.rsqrt(var + EPS)
    shift = beta - mean * scale
    return scale, shift


@jax.jit
def double_conv(x_nchw, params):
    x = jnp.transpose(x_nchw, (0, 2, 3, 1)).astype(jnp.float32)  # NCHW -> NHWC
    N, H, W, Cin = x.shape
    cnt = N * H * W

    Cmid = params["w1"].shape[-1]
    Cout = params["w2"].shape[-1]
    w1 = params["w1"].reshape(9, Cin, Cmid).astype(jnp.bfloat16)
    w2 = params["w2"].reshape(9, Cmid, Cout).astype(jnp.bfloat16)

    ones = jnp.ones((Cin,), jnp.float32)
    zeros = jnp.zeros((Cin,), jnp.float32)

    # conv1 (no prologue) + fused per-batch stats
    y1, st1 = conv3x3_stats(x, w1, params["b1"], ones, zeros,
                            fuse_prologue=False)
    sc1, sh1 = _bn_affine(jnp.sum(st1, axis=0), params["g1"], params["be1"], cnt)

    # conv2 with BN1+ReLU fused as input prologue, + fused stats
    y2, st2 = conv3x3_stats(y1, w2, params["b2"], sc1, sh1,
                            fuse_prologue=True)
    sc2, sh2 = _bn_affine(jnp.sum(st2, axis=0), params["g2"], params["be2"], cnt)

    out = bn_relu(y2, sc2, sh2)                                  # final BN2+ReLU
    return jnp.transpose(out, (0, 3, 1, 2))                      # NHWC -> NCHW


def init_params(key, in_ch, mid_ch, out_ch):
    # PyTorch Conv2d default init: U(-1/sqrt(fan_in), 1/sqrt(fan_in)) for
    # weight (kaiming_uniform with a=sqrt(5)) and bias; BN: gamma=1, beta=0.
    k1, k2, k3, k4 = jax.random.split(key, 4)

    def conv_init(kw, kb, cin, cout):
        fan_in = cin * 9
        bound = 1.0 / jnp.sqrt(fan_in)
        # weight stored tap-major (3, 3, Cin, Cout); PyTorch is (Cout, Cin, 3, 3)
        w = jax.random.uniform(kw, (3, 3, cin, cout), jnp.float32,
                               minval=-bound, maxval=bound)
        b = jax.random.uniform(kb, (cout,), jnp.float32,
                               minval=-bound, maxval=bound)
        return w, b

    w1, b1 = conv_init(k1, k2, in_ch, mid_ch)
    w2, b2 = conv_init(k3, k4, mid_ch, out_ch)
    return dict(
        w1=w1, b1=b1, g1=jnp.ones((mid_ch,), jnp.float32),
        be1=jnp.zeros((mid_ch,), jnp.float32),
        w2=w2, b2=b2, g2=jnp.ones((out_ch,), jnp.float32),
        be2=jnp.zeros((out_ch,), jnp.float32),
    )


# ----------------------------------------------------------------------------
# Pure-JAX reference (f32 everywhere; sanity check)
# ----------------------------------------------------------------------------
def _ref_double_conv(x_nchw, params):
    def block(x, w, b, g, be):
        # w is (3, 3, Cin, Cout) -> lax HWIO; x is NCHW
        y = jax.lax.conv_general_dilated(
            x, w, window_strides=(1, 1), padding="SAME",
            dimension_numbers=("NCHW", "HWIO", "NCHW"))
        y = y + b[None, :, None, None]
        mean = jnp.mean(y, axis=(0, 2, 3), keepdims=True)
        var = jnp.var(y, axis=(0, 2, 3), keepdims=True)
        y = (y - mean) * jax.lax.rsqrt(var + EPS)
        y = y * g[None, :, None, None] + be[None, :, None, None]
        return jnp.maximum(y, 0.0)

    y = block(x_nchw, params["w1"], params["b1"], params["g1"], params["be1"])
    y = block(y, params["w2"], params["b2"], params["g2"], params["be2"])
    return y


if __name__ == "__main__":
    key = jax.random.PRNGKey(0)
    kx, kp = jax.random.split(key)

    N, Cin, Cmid, Cout, H, W = 2, 4, 8, 8, 16, 16
    x = jax.random.normal(kx, (N, Cin, H, W), jnp.float32)
    params = init_params(kp, Cin, Cmid, Cout)

    out = jax.block_until_ready(double_conv(x, params))
    assert out.shape == (N, Cout, H, W), out.shape

    ref = jax.block_until_ready(_ref_double_conv(x, params))
    # bf16 MXU operands + bf16 intermediate storage vs f32 reference -> loose
    # absolute tolerance on the O(1) normalized outputs; a tap/shift bug would
    # give O(1) errors and still trip this.
    err = float(jnp.max(jnp.abs(out - ref)))
    assert err < 1e-1, err

    print("KERNEL_OK")
</pallas_src>

<mosaic_0001>
module attributes {stable_mosaic.version = 11 : i64} {
  func.func @_conv3x3_stats_kernel(%arg0: i32, %arg1: i32, %arg2: memref<1x16x16x4xf32, #tpu.memory_space<vmem>>, %arg3: memref<9x4x8xbf16, #tpu.memory_space<vmem>>, %arg4: memref<1x8xf32, #tpu.memory_space<vmem>>, %arg5: memref<1x4xf32, #tpu.memory_space<vmem>>, %arg6: memref<1x4xf32, #tpu.memory_space<vmem>>, %arg7: memref<1x16x16x8xbf16, #tpu.memory_space<vmem>>, %arg8: memref<1x2x8xf32, #tpu.memory_space<vmem>>, %arg9: memref<18x18x4xf32, #tpu.memory_space<vmem>>) attributes {dimension_semantics = [#tpu.dimension_semantics<parallel>, #tpu.dimension_semantics<arbitrary>], iteration_bounds = array<i64: 2, 1>, scalar_prefetch = 0 : i64, scratch_operands = 1 : i64, tpu.core_type = #tpu.core_type<tc>, window_params = [{transform_indices = @transform_0, window_bounds = array<i64: 1, 16, 16, 4>}, {transform_indices = @transform_1, window_bounds = array<i64: 9, 4, 8>}, {transform_indices = @transform_2, window_bounds = array<i64: 1, 8>}, {pipeline_mode = #tpu.pipeline_mode<synchronous>, transform_indices = @transform_3, window_bounds = array<i64: 1, 4>}, {pipeline_mode = #tpu.pipeline_mode<synchronous>, transform_indices = @transform_4, window_bounds = array<i64: 1, 4>}, {transform_indices = @transform_5, window_bounds = array<i64: 1, 16, 16, 8>}, {transform_indices = @transform_6, window_bounds = array<i64: 1, 2, 8>}]} {
    %c0_i32 = arith.constant 0 : i32
    %0 = arith.cmpi eq, %arg1, %c0_i32 : i32
    %1 = arith.extui %0 : i1 to i32
    %c0_i32_0 = arith.constant 0 : i32
    %2 = arith.cmpi ne, %1, %c0_i32_0 : i32
    scf.if %2 {
      %c0_66 = arith.constant 0 : index
      %c0_67 = arith.constant 0 : index
      %c0_68 = arith.constant 0 : index
      %c0_69 = arith.constant 0 : index
      %83 = vector.load %arg2[%c0_66, %c0_67, %c0_68, %c0_69] : memref<1x16x16x4xf32, #tpu.memory_space<vmem>>, vector<1x16x16x4xf32>
      %84 = vector.shape_cast %83 : vector<1x16x16x4xf32> to vector<16x16x4xf32>
      %cst_70 = arith.constant 0.000000e+00 : f32
      %85 = vector.broadcast %cst_70 : f32 to vector<18x18x4xf32>
      %c0_71 = arith.constant 0 : index
      %c0_72 = arith.constant 0 : index
      %c0_73 = arith.constant 0 : index
      %86 = vector.load %arg9[%c0_71, %c0_72, %c0_73] : memref<18x18x4xf32, #tpu.memory_space<vmem>>, vector<18x18x4xf32>
      tpu.vector_store %arg9[%c0_71, %c0_72, %c0_73], %85 {strides = array<i32>} : memref<18x18x4xf32, #tpu.memory_space<vmem>>, vector<18x18x4xf32>,
      %c1_74 = arith.constant 1 : index
      %c1_75 = arith.constant 1 : index
      %c0_76 = arith.constant 0 : index
      %87 = vector.load %arg9[%c1_74, %c1_75, %c0_76] : memref<18x18x4xf32, #tpu.memory_space<vmem>>, vector<16x16x4xf32>
      tpu.vector_store %arg9[%c1_74, %c1_75, %c0_76], %84 {strides = array<i32>} : memref<18x18x4xf32, #tpu.memory_space<vmem>>, vector<16x16x4xf32>,
    } else {
    }
    %cst = arith.constant 0.000000e+00 : f32
    %3 = vector.broadcast %cst : f32 to vector<256x8xf32>
    %c0 = arith.constant 0 : index
    %c0_1 = arith.constant 0 : index
    %c0_2 = arith.constant 0 : index
    %4 = vector.load %arg9[%c0, %c0_1, %c0_2] : memref<18x18x4xf32, #tpu.memory_space<vmem>>, vector<16x16x4xf32>
    %5 = vector.shape_cast %4 : vector<16x16x4xf32> to vector<256x4xf32>
    %6 = arith.truncf %5 : vector<256x4xf32> to vector<256x4xbf16>
    %c0_3 = arith.constant 0 : index
    %c0_4 = arith.constant 0 : index
    %c0_5 = arith.constant 0 : index
    %7 = vector.load %arg3[%c0_3, %c0_4, %c0_5] : memref<9x4x8xbf16, #tpu.memory_space<vmem>>, vector<1x4x8xbf16>
    %8 = vector.shape_cast %7 : vector<1x4x8xbf16> to vector<4x8xbf16>
    %cst_6 = arith.constant dense<0.000000e+00> : vector<256x8xf32>
    %9 = tpu.matmul %6, %8, %cst_6 {dimension_numbers = #tpu.dot_dimension_numbers<[1], [0], [0], [1], [0, 0, 1, 1], [], []>} : vector<256x4xbf16>, vector<4x8xbf16>, vector<256x8xf32> -> vector<256x8xf32>
    %10 = arith.addf %3, %9 : vector<256x8xf32>
    %c0_7 = arith.constant 0 : index
    %c1 = arith.constant 1 : index
    %c0_8 = arith.constant 0 : index
    %11 = vector.load %arg9[%c0_7, %c1, %c0_8] : memref<18x18x4xf32, #tpu.memory_space<vmem>>, vector<16x16x4xf32>
    %12 = vector.shape_cast %11 : vector<16x16x4xf32> to vector<256x4xf32>
    %13 = arith.truncf %12 : vector<256x4xf32> to vector<256x4xbf16>
    %c1_9 = arith.constant 1 : index
    %c0_10 = arith.constant 0 : index
    %c0_11 = arith.constant 0 : index
    %14 = vector.load %arg3[%c1_9, %c0_10, %c0_11] : memref<9x4x8xbf16, #tpu.memory_space<vmem>>, vector<1x4x8xbf16>
    %15 = vector.shape_cast %14 : vector<1x4x8xbf16> to vector<4x8xbf16>
    %cst_12 = arith.constant dense<0.000000e+00> : vector<256x8xf32>
    %16 = tpu.matmul %13, %15, %cst_12 {dimension_numbers = #tpu.dot_dimension_numbers<[1], [0], [0], [1], [0, 0, 1, 1], [], []>} : vector<256x4xbf16>, vector<4x8xbf16>, vector<256x8xf32> -> vector<256x8xf32>
    %17 = arith.addf %10, %16 : vector<256x8xf32>
    %c0_13 = arith.constant 0 : index
    %c2 = arith.constant 2 : index
    %c0_14 = arith.constant 0 : index
    %18 = vector.load %arg9[%c0_13, %c2, %c0_14] : memref<18x18x4xf32, #tpu.memory_space<vmem>>, vector<16x16x4xf32>
    %19 = vector.shape_cast %18 : vector<16x16x4xf32> to vector<256x4xf32>
    %20 = arith.truncf %19 : vector<256x4xf32> to vector<256x4xbf16>
    %c2_15 = arith.constant 2 : index
    %c0_16 = arith.constant 0 : index
    %c0_17 = arith.constant 0 : index
    %21 = vector.load %arg3[%c2_15, %c0_16, %c0_17] : memref<9x4x8xbf16, #tpu.memory_space<vmem>>, vector<1x4x8xbf16>
    %22 = vector.shape_cast %21 : vector<1x4x8xbf16> to vector<4x8xbf16>
    %cst_18 = arith.constant dense<0.000000e+00> : vector<256x8xf32>
    %23 = tpu.matmul %20, %22, %cst_18 {dimension_numbers = #tpu.dot_dimension_numbers<[1], [0], [0], [1], [0, 0, 1, 1], [], []>} : vector<256x4xbf16>, vector<4x8xbf16>, vector<256x8xf32> -> vector<256x8xf32>
    %24 = arith.addf %17, %23 : vector<256x8xf32>
    %c1_19 = arith.constant 1 : index
    %c0_20 = arith.constant 0 : index
    %c0_21 = arith.constant 0 : index
    %25 = vector.load %arg9[%c1_19, %c0_20, %c0_21] : memref<18x18x4xf32, #tpu.memory_space<vmem>>, vector<16x16x4xf32>
    %26 = vector.shape_cast %25 : vector<16x16x4xf32> to vector<256x4xf32>
    %27 = arith.truncf %26 : vector<256x4xf32> to vector<256x4xbf16>
    %c3 = arith.constant 3 : index
    %c0_22 = arith.constant 0 : index
    %c0_23 = arith.constant 0 : index
    %28 = vector.load %arg3[%c3, %c0_22, %c0_23] : memref<9x4x8xbf16, #tpu.memory_space<vmem>>, vector<1x4x8xbf16>
    %29 = vector.shape_cast %28 : vector<1x4x8xbf16> to vector<4x8xbf16>
    %cst_24 = arith.constant dense<0.000000e+00> : vector<256x8xf32>
    %30 = tpu.matmul %27, %29, %cst_24 {dimension_numbers = #tpu.dot_dimension_numbers<[1], [0], [0], [1], [0, 0, 1, 1], [], []>} : vector<256x4xbf16>, vector<4x8xbf16>, vector<256x8xf32> -> vector<256x8xf32>
    %31 = arith.addf %24, %30 : vector<256x8xf32>
    %c1_25 = arith.constant 1 : index
    %c1_26 = arith.constant 1 : index
    %c0_27 = arith.constant 0 : index
    %32 = vector.load %arg9[%c1_25, %c1_26, %c0_27] : memref<18x18x4xf32, #tpu.memory_space<vmem>>, vector<16x16x4xf32>
    %33 = vector.shape_cast %32 : vector<16x16x4xf32> to vector<256x4xf32>
    %34 = arith.truncf %33 : vector<256x4xf32> to vector<256x4xbf16>
    %c4 = arith.constant 4 : index
    %c0_28 = arith.constant 0 : index
    %c0_29 = arith.constant 0 : index
    %35 = vector.load %arg3[%c4, %c0_28, %c0_29] : memref<9x4x8xbf16, #tpu.memory_space<vmem>>, vector<1x4x8xbf16>
    %36 = vector.shape_cast %35 : vector<1x4x8xbf16> to vector<4x8xbf16>
    %cst_30 = arith.constant dense<0.000000e+00> : vector<256x8xf32>
    %37 = tpu.matmul %34, %36, %cst_30 {dimension_numbers = #tpu.dot_dimension_numbers<[1], [0], [0], [1], [0, 0, 1, 1], [], []>} : vector<256x4xbf16>, vector<4x8xbf16>, vector<256x8xf32> -> vector<256x8xf32>
    %38 = arith.addf %31, %37 : vector<256x8xf32>
    %c1_31 = arith.constant 1 : index
    %c2_32 = arith.constant 2 : index
    %c0_33 = arith.constant 0 : index
    %39 = vector.load %arg9[%c1_31, %c2_32, %c0_33] : memref<18x18x4xf32, #tpu.memory_space<vmem>>, vector<16x16x4xf32>
    %40 = vector.shape_cast %39 : vector<16x16x4xf32> to vector<256x4xf32>
    %41 = arith.truncf %40 : vector<256x4xf32> to vector<256x4xbf16>
    %c5 = arith.constant 5 : index
    %c0_34 = arith.constant 0 : index
    %c0_35 = arith.constant 0 : index
    %42 = vector.load %arg3[%c5, %c0_34, %c0_35] : memref<9x4x8xbf16, #tpu.memory_space<vmem>>, vector<1x4x8xbf16>
    %43 = vector.shape_cast %42 : vector<1x4x8xbf16> to vector<4x8xbf16>
    %cst_36 = arith.constant dense<0.000000e+00> : vector<256x8xf32>
    %44 = tpu.matmul %41, %43, %cst_36 {dimension_numbers = #tpu.dot_dimension_numbers<[1], [0], [0], [1], [0, 0, 1, 1], [], []>} : vector<256x4xbf16>, vector<4x8xbf16>, vector<256x8xf32> -> vector<256x8xf32>
    %45 = arith.addf %38, %44 : vector<256x8xf32>
    %c2_37 = arith.constant 2 : index
    %c0_38 = arith.constant 0 : index
    %c0_39 = arith.constant 0 : index
    %46 = vector.load %arg9[%c2_37, %c0_38, %c0_39] : memref<18x18x4xf32, #tpu.memory_space<vmem>>, vector<16x16x4xf32>
    %47 = vector.shape_cast %46 : vector<16x16x4xf32> to vector<256x4xf32>
    %48 = arith.truncf %47 : vector<256x4xf32> to vector<256x4xbf16>
    %c6 = arith.constant 6 : index
    %c0_40 = arith.constant 0 : index
    %c0_41 = arith.constant 0 : index
    %49 = vector.load %arg3[%c6, %c0_40, %c0_41] : memref<9x4x8xbf16, #tpu.memory_space<vmem>>, vector<1x4x8xbf16>
    %50 = vector.shape_cast %49 : vector<1x4x8xbf16> to vector<4x8xbf16>
    %cst_42 = arith.constant dense<0.000000e+00> : vector<256x8xf32>
    %51 = tpu.matmul %48, %50, %cst_42 {dimension_numbers = #tpu.dot_dimension_numbers<[1], [0], [0], [1], [0, 0, 1, 1], [], []>} : vector<256x4xbf16>, vector<4x8xbf16>, vector<256x8xf32> -> vector<256x8xf32>
    %52 = arith.addf %45, %51 : vector<256x8xf32>
    %c2_43 = arith.constant 2 : index
    %c1_44 = arith.constant 1 : index
    %c0_45 = arith.constant 0 : index
    %53 = vector.load %arg9[%c2_43, %c1_44, %c0_45] : memref<18x18x4xf32, #tpu.memory_space<vmem>>, vector<16x16x4xf32>
    %54 = vector.shape_cast %53 : vector<16x16x4xf32> to vector<256x4xf32>
    %55 = arith.truncf %54 : vector<256x4xf32> to vector<256x4xbf16>
    %c7 = arith.constant 7 : index
    %c0_46 = arith.constant 0 : index
    %c0_47 = arith.constant 0 : index
    %56 = vector.load %arg3[%c7, %c0_46, %c0_47] : memref<9x4x8xbf16, #tpu.memory_space<vmem>>, vector<1x4x8xbf16>
    %57 = vector.shape_cast %56 : vector<1x4x8xbf16> to vector<4x8xbf16>
    %cst_48 = arith.constant dense<0.000000e+00> : vector<256x8xf32>
    %58 = tpu.matmul %55, %57, %cst_48 {dimension_numbers = #tpu.dot_dimension_numbers<[1], [0], [0], [1], [0, 0, 1, 1], [], []>} : vector<256x4xbf16>, vector<4x8xbf16>, vector<256x8xf32> -> vector<256x8xf32>
    %59 = arith.addf %52, %58 : vector<256x8xf32>
    %c2_49 = arith.constant 2 : index
    %c2_50 = arith.constant 2 : index
    %c0_51 = arith.constant 0 : index
    %60 = vector.load %arg9[%c2_49, %c2_50, %c0_51] : memref<18x18x4xf32, #tpu.memory_space<vmem>>, vector<16x16x4xf32>
    %61 = vector.shape_cast %60 : vector<16x16x4xf32> to vector<256x4xf32>
    %62 = arith.truncf %61 : vector<256x4xf32> to vector<256x4xbf16>
    %c8 = arith.constant 8 : index
    %c0_52 = arith.constant 0 : index
    %c0_53 = arith.constant 0 : index
    %63 = vector.load %arg3[%c8, %c0_52, %c0_53] : memref<9x4x8xbf16, #tpu.memory_space<vmem>>, vector<1x4x8xbf16>
    %64 = vector.shape_cast %63 : vector<1x4x8xbf16> to vector<4x8xbf16>
    %cst_54 = arith.constant dense<0.000000e+00> : vector<256x8xf32>
    %65 = tpu.matmul %62, %64, %cst_54 {dimension_numbers = #tpu.dot_dimension_numbers<[1], [0], [0], [1], [0, 0, 1, 1], [], []>} : vector<256x4xbf16>, vector<4x8xbf16>, vector<256x8xf32> -> vector<256x8xf32>
    %66 = arith.addf %59, %65 : vector<256x8xf32>
    %c0_55 = arith.constant 0 : index
    %c0_56 = arith.constant 0 : index
    %67 = vector.load %arg4[%c0_55, %c0_56] : memref<1x8xf32, #tpu.memory_space<vmem>>, vector<1x8xf32>
    %68 = vector.shape_cast %67 : vector<1x8xf32> to vector<8xf32>
    %69 = vector.shape_cast %68 : vector<8xf32> to vector<1x8xf32>
    %70 = vector.broadcast %69 : vector<1x8xf32> to vector<256x8xf32>
    %71 = arith.addf %66, %70 : vector<256x8xf32>
    %cst_57 = arith.constant dense<0.000000e+00> : vector<8xf32>
    %72 = vector.multi_reduction <add>, %71, %cst_57 [0] : vector<256x8xf32> to vector<8xf32>
    %73 = vector.shape_cast %72 : vector<8xf32> to vector<1x8xf32>
    %74 = arith.mulf %71, %71 : vector<256x8xf32>
    %cst_58 = arith.constant dense<0.000000e+00> : vector<8xf32>
    %75 = vector.multi_reduction <add>, %74, %cst_58 [0] : vector<256x8xf32> to vector<8xf32>
    %76 = vector.shape_cast %75 : vector<8xf32> to vector<1x8xf32>
    %77 = tpu.concatenate %73, %76 in 0 : vector<1x8xf32>, vector<1x8xf32> -> vector<2x8xf32>
    %78 = vector.shape_cast %77 : vector<2x8xf32> to vector<1x2x8xf32>
    %c0_59 = arith.constant 0 : index
    %c0_60 = arith.constant 0 : index
    %c0_61 = arith.constant 0 : index
    %79 = vector.load %arg8[%c0_59, %c0_60, %c0_61] : memref<1x2x8xf32, #tpu.memory_space<vmem>>, vector<1x2x8xf32>
    tpu.vector_store %arg8[%c0_59, %c0_60, %c0_61], %78 {strides = array<i32>} : memref<1x2x8xf32, #tpu.memory_space<vmem>>, vector<1x2x8xf32>,
    %80 = vector.shape_cast %71 : vector<256x8xf32> to vector<1x16x16x8xf32>
    %81 = arith.truncf %80 : vector<1x16x16x8xf32> to vector<1x16x16x8xbf16>
    %c0_62 = arith.constant 0 : index
    %c0_63 = arith.constant 0 : index
    %c0_64 = arith.constant 0 : index
    %c0_65 = arith.constant 0 : index
    %82 = vector.load %arg7[%c0_62, %c0_63, %c0_64, %c0_65] : memref<1x16x16x8xbf16, #tpu.memory_space<vmem>>, vector<1x16x16x8xbf16>
    tpu.vector_store %arg7[%c0_62, %c0_63, %c0_64, %c0_65], %81 {strides = array<i32>} : memref<1x16x16x8xbf16, #tpu.memory_space<vmem>>, vector<1x16x16x8xbf16>,
    return
  }
  func.func @transform_0(%arg0: i32, %arg1: i32) -> (i32, i32, i32, i32) {
    %c0_i32 = arith.constant 0 : i32
    %c0_i32_0 = arith.constant 0 : i32
    %c0_i32_1 = arith.constant 0 : i32
    %c0_i32_2 = arith.constant 0 : i32
    return %arg0, %c0_i32, %c0_i32_0, %c0_i32_1 : i32, i32, i32, i32
  }
  func.func @transform_1(%arg0: i32, %arg1: i32) -> (i32, i32, i32) {
    %c0_i32 = arith.constant 0 : i32
    %c0_i32_0 = arith.constant 0 : i32
    %c0_i32_1 = arith.constant 0 : i32
    return %c0_i32, %c0_i32_0, %arg1 : i32, i32, i32
  }
  func.func @transform_2(%arg0: i32, %arg1: i32) -> (i32, i32) {
    %c0_i32 = arith.constant 0 : i32
    %c0_i32_0 = arith.constant 0 : i32
    return %c0_i32, %arg1 : i32, i32
  }
  func.func @transform_3(%arg0: i32, %arg1: i32) -> (i32, i32) {
    %c0_i32 = arith.constant 0 : i32
    %c0_i32_0 = arith.constant 0 : i32
    %c0_i32_1 = arith.constant 0 : i32
    return %c0_i32, %c0_i32_0 : i32, i32
  }
  func.func @transform_4(%arg0: i32, %arg1: i32) -> (i32, i32) {
    %c0_i32 = arith.constant 0 : i32
    %c0_i32_0 = arith.constant 0 : i32
    %c0_i32_1 = arith.constant 0 : i32
    return %c0_i32, %c0_i32_0 : i32, i32
  }
  func.func @transform_5(%arg0: i32, %arg1: i32) -> (i32, i32, i32, i32) {
    %c0_i32 = arith.constant 0 : i32
    %c0_i32_0 = arith.constant 0 : i32
    %c0_i32_1 = arith.constant 0 : i32
    return %arg0, %c0_i32, %c0_i32_0, %arg1 : i32, i32, i32, i32
  }
  func.func @transform_6(%arg0: i32, %arg1: i32) -> (i32, i32, i32) {
    %c0_i32 = arith.constant 0 : i32
    %c0_i32_0 = arith.constant 0 : i32
    return %arg0, %c0_i32, %arg1 : i32, i32, i32
  }
}

module attributes {stable_mosaic.version = 11 : i64} {
  func.func @_conv3x3_stats_kernel(%arg0: i32, %arg1: i32, %arg2: memref<1x16x16x8xbf16, #tpu.memory_space<vmem>>, %arg3: memref<9x8x8xbf16, #tpu.memory_space<vmem>>, %arg4: memref<1x8xf32, #tpu.memory_space<vmem>>, %arg5: memref<1x8xf32, #tpu.memory_space<vmem>>, %arg6: memref<1x8xf32, #tpu.memory_space<vmem>>, %arg7: memref<1x16x16x8xbf16, #tpu.memory_space<vmem>>, %arg8: memref<1x2x8xf32, #tpu.memory_space<vmem>>, %arg9: memref<18x18x8xf32, #tpu.memory_space<vmem>>) attributes {dimension_semantics = [#tpu.dimension_semantics<parallel>, #tpu.dimension_semantics<arbitrary>], iteration_bounds = array<i64: 2, 1>, scalar_prefetch = 0 : i64, scratch_operands = 1 : i64, tpu.core_type = #tpu.core_type<tc>, window_params = [{transform_indices = @transform_0, window_bounds = array<i64: 1, 16, 16, 8>}, {transform_indices = @transform_1, window_bounds = array<i64: 9, 8, 8>}, {transform_indices = @transform_2, window_bounds = array<i64: 1, 8>}, {pipeline_mode = #tpu.pipeline_mode<synchronous>, transform_indices = @transform_3, window_bounds = array<i64: 1, 8>}, {pipeline_mode = #tpu.pipeline_mode<synchronous>, transform_indices = @transform_4, window_bounds = array<i64: 1, 8>}, {transform_indices = @transform_5, window_bounds = array<i64: 1, 16, 16, 8>}, {transform_indices = @transform_6, window_bounds = array<i64: 1, 2, 8>}]} {
    %c0_i32 = arith.constant 0 : i32
    %0 = arith.cmpi eq, %arg1, %c0_i32 : i32
    %1 = arith.extui %0 : i1 to i32
    %c0_i32_0 = arith.constant 0 : i32
    %2 = arith.cmpi ne, %1, %c0_i32_0 : i32
    scf.if %2 {
      %c0_66 = arith.constant 0 : index
      %c0_67 = arith.constant 0 : index
      %c0_68 = arith.constant 0 : index
      %c0_69 = arith.constant 0 : index
      %83 = vector.load %arg2[%c0_66, %c0_67, %c0_68, %c0_69] : memref<1x16x16x8xbf16, #tpu.memory_space<vmem>>, vector<1x16x16x8xbf16>
      %84 = vector.shape_cast %83 : vector<1x16x16x8xbf16> to vector<16x16x8xbf16>
      %85 = arith.extf %84 : vector<16x16x8xbf16> to vector<16x16x8xf32>
      %c0_70 = arith.constant 0 : index
      %c0_71 = arith.constant 0 : index
      %86 = vector.load %arg5[%c0_70, %c0_71] : memref<1x8xf32, #tpu.memory_space<vmem>>, vector<1x8xf32>
      %87 = vector.shape_cast %86 : vector<1x8xf32> to vector<8xf32>
      %88 = vector.shape_cast %87 : vector<8xf32> to vector<1x1x8xf32>
      %89 = vector.broadcast %88 : vector<1x1x8xf32> to vector<16x16x8xf32>
      %90 = arith.mulf %85, %89 : vector<16x16x8xf32>
      %c0_72 = arith.constant 0 : index
      %c0_73 = arith.constant 0 : index
      %91 = vector.load %arg6[%c0_72, %c0_73] : memref<1x8xf32, #tpu.memory_space<vmem>>, vector<1x8xf32>
      %92 = vector.shape_cast %91 : vector<1x8xf32> to vector<8xf32>
      %93 = vector.shape_cast %92 : vector<8xf32> to vector<1x1x8xf32>
      %94 = vector.broadcast %93 : vector<1x1x8xf32> to vector<16x16x8xf32>
      %95 = arith.addf %90, %94 : vector<16x16x8xf32>
      %cst_74 = arith.constant 0.000000e+00 : f32
      %96 = vector.broadcast %cst_74 : f32 to vector<16x16x8xf32>
      %97 = arith.maximumf %95, %96 : vector<16x16x8xf32>
      %cst_75 = arith.constant 0.000000e+00 : f32
      %98 = vector.broadcast %cst_75 : f32 to vector<18x18x8xf32>
      %c0_76 = arith.constant 0 : index
      %c0_77 = arith.constant 0 : index
      %c0_78 = arith.constant 0 : index
      %99 = vector.load %arg9[%c0_76, %c0_77, %c0_78] : memref<18x18x8xf32, #tpu.memory_space<vmem>>, vector<18x18x8xf32>
      tpu.vector_store %arg9[%c0_76, %c0_77, %c0_78], %98 {strides = array<i32>} : memref<18x18x8xf32, #tpu.memory_space<vmem>>, vector<18x18x8xf32>,
      %c1_79 = arith.constant 1 : index
      %c1_80 = arith.constant 1 : index
      %c0_81 = arith.constant 0 : index
      %100 = vector.load %arg9[%c1_79, %c1_80, %c0_81] : memref<18x18x8xf32, #tpu.memory_space<vmem>>, vector<16x16x8xf32>
      tpu.vector_store %arg9[%c1_79, %c1_80, %c0_81], %97 {strides = array<i32>} : memref<18x18x8xf32, #tpu.memory_space<vmem>>, vector<16x16x8xf32>,
    } else {
    }
    %cst = arith.constant 0.000000e+00 : f32
    %3 = vector.broadcast %cst : f32 to vector<256x8xf32>
    %c0 = arith.constant 0 : index
    %c0_1 = arith.constant 0 : index
    %c0_2 = arith.constant 0 : index
    %4 = vector.load %arg9[%c0, %c0_1, %c0_2] : memref<18x18x8xf32, #tpu.memory_space<vmem>>, vector<16x16x8xf32>
    %5 = vector.shape_cast %4 : vector<16x16x8xf32> to vector<256x8xf32>
    %6 = arith.truncf %5 : vector<256x8xf32> to vector<256x8xbf16>
    %c0_3 = arith.constant 0 : index
    %c0_4 = arith.constant 0 : index
    %c0_5 = arith.constant 0 : index
    %7 = vector.load %arg3[%c0_3, %c0_4, %c0_5] : memref<9x8x8xbf16, #tpu.memory_space<vmem>>, vector<1x8x8xbf16>
    %8 = vector.shape_cast %7 : vector<1x8x8xbf16> to vector<8x8xbf16>
    %cst_6 = arith.constant dense<0.000000e+00> : vector<256x8xf32>
    %9 = tpu.matmul %6, %8, %cst_6 {dimension_numbers = #tpu.dot_dimension_numbers<[1], [0], [0], [1], [0, 0, 1, 1], [], []>} : vector<256x8xbf16>, vector<8x8xbf16>, vector<256x8xf32> -> vector<256x8xf32>
    %10 = arith.addf %3, %9 : vector<256x8xf32>
    %c0_7 = arith.constant 0 : index
    %c1 = arith.constant 1 : index
    %c0_8 = arith.constant 0 : index
    %11 = vector.load %arg9[%c0_7, %c1, %c0_8] : memref<18x18x8xf32, #tpu.memory_space<vmem>>, vector<16x16x8xf32>
    %12 = vector.shape_cast %11 : vector<16x16x8xf32> to vector<256x8xf32>
    %13 = arith.truncf %12 : vector<256x8xf32> to vector<256x8xbf16>
    %c1_9 = arith.constant 1 : index
    %c0_10 = arith.constant 0 : index
    %c0_11 = arith.constant 0 : index
    %14 = vector.load %arg3[%c1_9, %c0_10, %c0_11] : memref<9x8x8xbf16, #tpu.memory_space<vmem>>, vector<1x8x8xbf16>
    %15 = vector.shape_cast %14 : vector<1x8x8xbf16> to vector<8x8xbf16>
    %cst_12 = arith.constant dense<0.000000e+00> : vector<256x8xf32>
    %16 = tpu.matmul %13, %15, %cst_12 {dimension_numbers = #tpu.dot_dimension_numbers<[1], [0], [0], [1], [0, 0, 1, 1], [], []>} : vector<256x8xbf16>, vector<8x8xbf16>, vector<256x8xf32> -> vector<256x8xf32>
    %17 = arith.addf %10, %16 : vector<256x8xf32>
    %c0_13 = arith.constant 0 : index
    %c2 = arith.constant 2 : index
    %c0_14 = arith.constant 0 : index
    %18 = vector.load %arg9[%c0_13, %c2, %c0_14] : memref<18x18x8xf32, #tpu.memory_space<vmem>>, vector<16x16x8xf32>
    %19 = vector.shape_cast %18 : vector<16x16x8xf32> to vector<256x8xf32>
    %20 = arith.truncf %19 : vector<256x8xf32> to vector<256x8xbf16>
    %c2_15 = arith.constant 2 : index
    %c0_16 = arith.constant 0 : index
    %c0_17 = arith.constant 0 : index
    %21 = vector.load %arg3[%c2_15, %c0_16, %c0_17] : memref<9x8x8xbf16, #tpu.memory_space<vmem>>, vector<1x8x8xbf16>
    %22 = vector.shape_cast %21 : vector<1x8x8xbf16> to vector<8x8xbf16>
    %cst_18 = arith.constant dense<0.000000e+00> : vector<256x8xf32>
    %23 = tpu.matmul %20, %22, %cst_18 {dimension_numbers = #tpu.dot_dimension_numbers<[1], [0], [0], [1], [0, 0, 1, 1], [], []>} : vector<256x8xbf16>, vector<8x8xbf16>, vector<256x8xf32> -> vector<256x8xf32>
    %24 = arith.addf %17, %23 : vector<256x8xf32>
    %c1_19 = arith.constant 1 : index
    %c0_20 = arith.constant 0 : index
    %c0_21 = arith.constant 0 : index
    %25 = vector.load %arg9[%c1_19, %c0_20, %c0_21] : memref<18x18x8xf32, #tpu.memory_space<vmem>>, vector<16x16x8xf32>
    %26 = vector.shape_cast %25 : vector<16x16x8xf32> to vector<256x8xf32>
    %27 = arith.truncf %26 : vector<256x8xf32> to vector<256x8xbf16>
    %c3 = arith.constant 3 : index
    %c0_22 = arith.constant 0 : index
    %c0_23 = arith.constant 0 : index
    %28 = vector.load %arg3[%c3, %c0_22, %c0_23] : memref<9x8x8xbf16, #tpu.memory_space<vmem>>, vector<1x8x8xbf16>
    %29 = vector.shape_cast %28 : vector<1x8x8xbf16> to vector<8x8xbf16>
    %cst_24 = arith.constant dense<0.000000e+00> : vector<256x8xf32>
    %30 = tpu.matmul %27, %29, %cst_24 {dimension_numbers = #tpu.dot_dimension_numbers<[1], [0], [0], [1], [0, 0, 1, 1], [], []>} : vector<256x8xbf16>, vector<8x8xbf16>, vector<256x8xf32> -> vector<256x8xf32>
    %31 = arith.addf %24, %30 : vector<256x8xf32>
    %c1_25 = arith.constant 1 : index
    %c1_26 = arith.constant 1 : index
    %c0_27 = arith.constant 0 : index
    %32 = vector.load %arg9[%c1_25, %c1_26, %c0_27] : memref<18x18x8xf32, #tpu.memory_space<vmem>>, vector<16x16x8xf32>
    %33 = vector.shape_cast %32 : vector<16x16x8xf32> to vector<256x8xf32>
    %34 = arith.truncf %33 : vector<256x8xf32> to vector<256x8xbf16>
    %c4 = arith.constant 4 : index
    %c0_28 = arith.constant 0 : index
    %c0_29 = arith.constant 0 : index
    %35 = vector.load %arg3[%c4, %c0_28, %c0_29] : memref<9x8x8xbf16, #tpu.memory_space<vmem>>, vector<1x8x8xbf16>
    %36 = vector.shape_cast %35 : vector<1x8x8xbf16> to vector<8x8xbf16>
    %cst_30 = arith.constant dense<0.000000e+00> : vector<256x8xf32>
    %37 = tpu.matmul %34, %36, %cst_30 {dimension_numbers = #tpu.dot_dimension_numbers<[1], [0], [0], [1], [0, 0, 1, 1], [], []>} : vector<256x8xbf16>, vector<8x8xbf16>, vector<256x8xf32> -> vector<256x8xf32>
    %38 = arith.addf %31, %37 : vector<256x8xf32>
    %c1_31 = arith.constant 1 : index
    %c2_32 = arith.constant 2 : index
    %c0_33 = arith.constant 0 : index
    %39 = vector.load %arg9[%c1_31, %c2_32, %c0_33] : memref<18x18x8xf32, #tpu.memory_space<vmem>>, vector<16x16x8xf32>
    %40 = vector.shape_cast %39 : vector<16x16x8xf32> to vector<256x8xf32>
    %41 = arith.truncf %40 : vector<256x8xf32> to vector<256x8xbf16>
    %c5 = arith.constant 5 : index
    %c0_34 = arith.constant 0 : index
    %c0_35 = arith.constant 0 : index
    %42 = vector.load %arg3[%c5, %c0_34, %c0_35] : memref<9x8x8xbf16, #tpu.memory_space<vmem>>, vector<1x8x8xbf16>
    %43 = vector.shape_cast %42 : vector<1x8x8xbf16> to vector<8x8xbf16>
    %cst_36 = arith.constant dense<0.000000e+00> : vector<256x8xf32>
    %44 = tpu.matmul %41, %43, %cst_36 {dimension_numbers = #tpu.dot_dimension_numbers<[1], [0], [0], [1], [0, 0, 1, 1], [], []>} : vector<256x8xbf16>, vector<8x8xbf16>, vector<256x8xf32> -> vector<256x8xf32>
    %45 = arith.addf %38, %44 : vector<256x8xf32>
    %c2_37 = arith.constant 2 : index
    %c0_38 = arith.constant 0 : index
    %c0_39 = arith.constant 0 : index
    %46 = vector.load %arg9[%c2_37, %c0_38, %c0_39] : memref<18x18x8xf32, #tpu.memory_space<vmem>>, vector<16x16x8xf32>
    %47 = vector.shape_cast %46 : vector<16x16x8xf32> to vector<256x8xf32>
    %48 = arith.truncf %47 : vector<256x8xf32> to vector<256x8xbf16>
    %c6 = arith.constant 6 : index
    %c0_40 = arith.constant 0 : index
    %c0_41 = arith.constant 0 : index
    %49 = vector.load %arg3[%c6, %c0_40, %c0_41] : memref<9x8x8xbf16, #tpu.memory_space<vmem>>, vector<1x8x8xbf16>
    %50 = vector.shape_cast %49 : vector<1x8x8xbf16> to vector<8x8xbf16>
    %cst_42 = arith.constant dense<0.000000e+00> : vector<256x8xf32>
    %51 = tpu.matmul %48, %50, %cst_42 {dimension_numbers = #tpu.dot_dimension_numbers<[1], [0], [0], [1], [0, 0, 1, 1], [], []>} : vector<256x8xbf16>, vector<8x8xbf16>, vector<256x8xf32> -> vector<256x8xf32>
    %52 = arith.addf %45, %51 : vector<256x8xf32>
    %c2_43 = arith.constant 2 : index
    %c1_44 = arith.constant 1 : index
    %c0_45 = arith.constant 0 : index
    %53 = vector.load %arg9[%c2_43, %c1_44, %c0_45] : memref<18x18x8xf32, #tpu.memory_space<vmem>>, vector<16x16x8xf32>
    %54 = vector.shape_cast %53 : vector<16x16x8xf32> to vector<256x8xf32>
    %55 = arith.truncf %54 : vector<256x8xf32> to vector<256x8xbf16>
    %c7 = arith.constant 7 : index
    %c0_46 = arith.constant 0 : index
    %c0_47 = arith.constant 0 : index
    %56 = vector.load %arg3[%c7, %c0_46, %c0_47] : memref<9x8x8xbf16, #tpu.memory_space<vmem>>, vector<1x8x8xbf16>
    %57 = vector.shape_cast %56 : vector<1x8x8xbf16> to vector<8x8xbf16>
    %cst_48 = arith.constant dense<0.000000e+00> : vector<256x8xf32>
    %58 = tpu.matmul %55, %57, %cst_48 {dimension_numbers = #tpu.dot_dimension_numbers<[1], [0], [0], [1], [0, 0, 1, 1], [], []>} : vector<256x8xbf16>, vector<8x8xbf16>, vector<256x8xf32> -> vector<256x8xf32>
    %59 = arith.addf %52, %58 : vector<256x8xf32>
    %c2_49 = arith.constant 2 : index
    %c2_50 = arith.constant 2 : index
    %c0_51 = arith.constant 0 : index
    %60 = vector.load %arg9[%c2_49, %c2_50, %c0_51] : memref<18x18x8xf32, #tpu.memory_space<vmem>>, vector<16x16x8xf32>
    %61 = vector.shape_cast %60 : vector<16x16x8xf32> to vector<256x8xf32>
    %62 = arith.truncf %61 : vector<256x8xf32> to vector<256x8xbf16>
    %c8 = arith.constant 8 : index
    %c0_52 = arith.constant 0 : index
    %c0_53 = arith.constant 0 : index
    %63 = vector.load %arg3[%c8, %c0_52, %c0_53] : memref<9x8x8xbf16, #tpu.memory_space<vmem>>, vector<1x8x8xbf16>
    %64 = vector.shape_cast %63 : vector<1x8x8xbf16> to vector<8x8xbf16>
    %cst_54 = arith.constant dense<0.000000e+00> : vector<256x8xf32>
    %65 = tpu.matmul %62, %64, %cst_54 {dimension_numbers = #tpu.dot_dimension_numbers<[1], [0], [0], [1], [0, 0, 1, 1], [], []>} : vector<256x8xbf16>, vector<8x8xbf16>, vector<256x8xf32> -> vector<256x8xf32>
    %66 = arith.addf %59, %65 : vector<256x8xf32>
    %c0_55 = arith.constant 0 : index
    %c0_56 = arith.constant 0 : index
    %67 = vector.load %arg4[%c0_55, %c0_56] : memref<1x8xf32, #tpu.memory_space<vmem>>, vector<1x8xf32>
    %68 = vector.shape_cast %67 : vector<1x8xf32> to vector<8xf32>
    %69 = vector.shape_cast %68 : vector<8xf32> to vector<1x8xf32>
    %70 = vector.broadcast %69 : vector<1x8xf32> to vector<256x8xf32>
    %71 = arith.addf %66, %70 : vector<256x8xf32>
    %cst_57 = arith.constant dense<0.000000e+00> : vector<8xf32>
    %72 = vector.multi_reduction <add>, %71, %cst_57 [0] : vector<256x8xf32> to vector<8xf32>
    %73 = vector.shape_cast %72 : vector<8xf32> to vector<1x8xf32>
    %74 = arith.mulf %71, %71 : vector<256x8xf32>
    %cst_58 = arith.constant dense<0.000000e+00> : vector<8xf32>
    %75 = vector.multi_reduction <add>, %74, %cst_58 [0] : vector<256x8xf32> to vector<8xf32>
    %76 = vector.shape_cast %75 : vector<8xf32> to vector<1x8xf32>
    %77 = tpu.concatenate %73, %76 in 0 : vector<1x8xf32>, vector<1x8xf32> -> vector<2x8xf32>
    %78 = vector.shape_cast %77 : vector<2x8xf32> to vector<1x2x8xf32>
    %c0_59 = arith.constant 0 : index
    %c0_60 = arith.constant 0 : index
    %c0_61 = arith.constant 0 : index
    %79 = vector.load %arg8[%c0_59, %c0_60, %c0_61] : memref<1x2x8xf32, #tpu.memory_space<vmem>>, vector<1x2x8xf32>
    tpu.vector_store %arg8[%c0_59, %c0_60, %c0_61], %78 {strides = array<i32>} : memref<1x2x8xf32, #tpu.memory_space<vmem>>, vector<1x2x8xf32>,
    %80 = vector.shape_cast %71 : vector<256x8xf32> to vector<1x16x16x8xf32>
    %81 = arith.truncf %80 : vector<1x16x16x8xf32> to vector<1x16x16x8xbf16>
    %c0_62 = arith.constant 0 : index
    %c0_63 = arith.constant 0 : index
    %c0_64 = arith.constant 0 : index
    %c0_65 = arith.constant 0 : index
    %82 = vector.load %arg7[%c0_62, %c0_63, %c0_64, %c0_65] : memref<1x16x16x8xbf16, #tpu.memory_space<vmem>>, vector<1x16x16x8xbf16>
    tpu.vector_store %arg7[%c0_62, %c0_63, %c0_64, %c0_65], %81 {strides = array<i32>} : memref<1x16x16x8xbf16, #tpu.memory_space<vmem>>, vector<1x16x16x8xbf16>,
    return
  }
  func.func @transform_0(%arg0: i32, %arg1: i32) -> (i32, i32, i32, i32) {
    %c0_i32 = arith.constant 0 : i32
    %c0_i32_0 = arith.constant 0 : i32
    %c0_i32_1 = arith.constant 0 : i32
    %c0_i32_2 = arith.constant 0 : i32
    return %arg0, %c0_i32, %c0_i32_0, %c0_i32_1 : i32, i32, i32, i32
  }
  func.func @transform_1(%arg0: i32, %arg1: i32) -> (i32, i32, i32) {
    %c0_i32 = arith.constant 0 : i32
    %c0_i32_0 = arith.constant 0 : i32
    %c0_i32_1 = arith.constant 0 : i32
    return %c0_i32, %c0_i32_0, %arg1 : i32, i32, i32
  }
  func.func @transform_2(%arg0: i32, %arg1: i32) -> (i32, i32) {
    %c0_i32 = arith.constant 0 : i32
    %c0_i32_0 = arith.constant 0 : i32
    return %c0_i32, %arg1 : i32, i32
  }
  func.func @transform_3(%arg0: i32, %arg1: i32) -> (i32, i32) {
    %c0_i32 = arith.constant 0 : i32
    %c0_i32_0 = arith.constant 0 : i32
    %c0_i32_1 = arith.constant 0 : i32
    return %c0_i32, %c0_i32_0 : i32, i32
  }
  func.func @transform_4(%arg0: i32, %arg1: i32) -> (i32, i32) {
    %c0_i32 = arith.constant 0 : i32
    %c0_i32_0 = arith.constant 0 : i32
    %c0_i32_1 = arith.constant 0 : i32
    return %c0_i32, %c0_i32_0 : i32, i32
  }
  func.func @transform_5(%arg0: i32, %arg1: i32) -> (i32, i32, i32, i32) {
    %c0_i32 = arith.constant 0 : i32
    %c0_i32_0 = arith.constant 0 : i32
    %c0_i32_1 = arith.constant 0 : i32
    return %arg0, %c0_i32, %c0_i32_0, %arg1 : i32, i32, i32, i32
  }
  func.func @transform_6(%arg0: i32, %arg1: i32) -> (i32, i32, i32) {
    %c0_i32 = arith.constant 0 : i32
    %c0_i32_0 = arith.constant 0 : i32
    return %arg0, %c0_i32, %arg1 : i32, i32, i32
  }
}

module attributes {stable_mosaic.version = 11 : i64} {
  func.func @_bn_relu_kernel(%arg0: i32, %arg1: memref<1x16x16x8xbf16, #tpu.memory_space<vmem>>, %arg2: memref<1x8xf32, #tpu.memory_space<vmem>>, %arg3: memref<1x8xf32, #tpu.memory_space<vmem>>, %arg4: memref<1x16x16x8xf32, #tpu.memory_space<vmem>>) attributes {dimension_semantics = [#tpu.dimension_semantics<parallel>], iteration_bounds = array<i64: 2>, scalar_prefetch = 0 : i64, scratch_operands = 0 : i64, tpu.core_type = #tpu.core_type<tc>, window_params = [{transform_indices = @transform_0, window_bounds = array<i64: 1, 16, 16, 8>}, {pipeline_mode = #tpu.pipeline_mode<synchronous>, transform_indices = @transform_1, window_bounds = array<i64: 1, 8>}, {pipeline_mode = #tpu.pipeline_mode<synchronous>, transform_indices = @transform_2, window_bounds = array<i64: 1, 8>}, {transform_indices = @transform_3, window_bounds = array<i64: 1, 16, 16, 8>}]} {
    %c0 = arith.constant 0 : index
    %c0_0 = arith.constant 0 : index
    %c0_1 = arith.constant 0 : index
    %c0_2 = arith.constant 0 : index
    %0 = vector.load %arg1[%c0, %c0_0, %c0_1, %c0_2] : memref<1x16x16x8xbf16, #tpu.memory_space<vmem>>, vector<1x16x16x8xbf16>
    %1 = arith.extf %0 : vector<1x16x16x8xbf16> to vector<1x16x16x8xf32>
    %c0_3 = arith.constant 0 : index
    %c0_4 = arith.constant 0 : index
    %2 = vector.load %arg2[%c0_3, %c0_4] : memref<1x8xf32, #tpu.memory_space<vmem>>, vector<1x8xf32>
    %3 = vector.shape_cast %2 : vector<1x8xf32> to vector<8xf32>
    %4 = vector.shape_cast %3 : vector<8xf32> to vector<1x1x1x8xf32>
    %5 = vector.broadcast %4 : vector<1x1x1x8xf32> to vector<1x16x16x8xf32>
    %6 = arith.mulf %1, %5 : vector<1x16x16x8xf32>
    %c0_5 = arith.constant 0 : index
    %c0_6 = arith.constant 0 : index
    %7 = vector.load %arg3[%c0_5, %c0_6] : memref<1x8xf32, #tpu.memory_space<vmem>>, vector<1x8xf32>
    %8 = vector.shape_cast %7 : vector<1x8xf32> to vector<8xf32>
    %9 = vector.shape_cast %8 : vector<8xf32> to vector<1x1x1x8xf32>
    %10 = vector.broadcast %9 : vector<1x1x1x8xf32> to vector<1x16x16x8xf32>
    %11 = arith.addf %6, %10 : vector<1x16x16x8xf32>
    %cst = arith.constant 0.000000e+00 : f32
    %12 = vector.broadcast %cst : f32 to vector<1x16x16x8xf32>
    %13 = arith.maximumf %11, %12 : vector<1x16x16x8xf32>
    %c0_7 = arith.constant 0 : index
    %c0_8 = arith.constant 0 : index
    %c0_9 = arith.constant 0 : index
    %c0_10 = arith.constant 0 : index
    %14 = vector.load %arg4[%c0_7, %c0_8, %c0_9, %c0_10] : memref<1x16x16x8xf32, #tpu.memory_space<vmem>>, vector<1x16x16x8xf32>
    tpu.vector_store %arg4[%c0_7, %c0_8, %c0_9, %c0_10], %13 {strides = array<i32>} : memref<1x16x16x8xf32, #tpu.memory_space<vmem>>, vector<1x16x16x8xf32>,
    return
  }
  func.func @transform_0(%arg0: i32) -> (i32, i32, i32, i32) {
    %c0_i32 = arith.constant 0 : i32
    %c0_i32_0 = arith.constant 0 : i32
    %c0_i32_1 = arith.constant 0 : i32
    %c0_i32_2 = arith.constant 0 : i32
    return %arg0, %c0_i32, %c0_i32_0, %c0_i32_1 : i32, i32, i32, i32
  }
  func.func @transform_1(%arg0: i32) -> (i32, i32) {
    %c0_i32 = arith.constant 0 : i32
    %c0_i32_0 = arith.constant 0 : i32
    %c0_i32_1 = arith.constant 0 : i32
    return %c0_i32, %c0_i32_0 : i32, i32
  }
  func.func @transform_2(%arg0: i32) -> (i32, i32) {
    %c0_i32 = arith.constant 0 : i32
    %c0_i32_0 = arith.constant 0 : i32
    %c0_i32_1 = arith.constant 0 : i32
    return %c0_i32, %c0_i32_0 : i32, i32
  }
  func.func @transform_3(%arg0: i32) -> (i32, i32, i32, i32) {
    %c0_i32 = arith.constant 0 : i32
    %c0_i32_0 = arith.constant 0 : i32
    %c0_i32_1 = arith.constant 0 : i32
    %c0_i32_2 = arith.constant 0 : i32
    return %arg0, %c0_i32, %c0_i32_0, %c0_i32_1 : i32, i32, i32, i32
  }
}

</mosaic_0001>

<bundles_post_ra>
// kernel: double_conv.5
= control target key start
LH: loop header
LB: loop body
LE: loop exit
PB: predicated region body
PF: predicated region fallthrough
CT: control target
= control target key end

     0   :  { %s563_s12 = smov 0   ;;  %s742_s0 = inlined_call_operand.vmem [shape: bf16[2,16,16,8], index: 0, kind: input, shape index: {}]   ;;  %s743_s1 = inlined_call_operand.vmem [shape: f32[1,8], index: 1, kind: input, shape index: {}]   ;;  %s744_s2 = inlined_call_operand.vmem [shape: f32[1,8], index: 2, kind: input, shape index: {}]   ;;  %s745_s3 = inlined_call_operand.vmem [shape: f32[2,16,16,8], index: 3, kind: output, shape index: {}]  }
   0x1 LB: > { %s433_s13 = sadd.s32 4294967295, %s541_s12   ;;  %p437_p0 = scmp.ge.s32.totalorder %s541_s12, 1  ;;  %s541_s12 = sphi %s563_s12, %s13_s12  }
   0x2   : > { %p137_p1 = scmp.lt.s32.totalorder %s541_s12, 3 }
   0x4   : > { %p138_p2 = pnand %p437_p0, %p137_p1 }
   0x5   : > { %p161_p3 = scmp.lt.s32.totalorder (!%p138_p2), %s433_s13, 1  ;;  %v582_v0 = vld [vmem:[%s743_s1] ss:$0 sm:$0xff] (!%p138_p2)  ;;  %vm345_vm0 = vcmask (!%p138_p2), 64512  }
   0x6   : > { %141 = sbr.rel (%p138_p2) target bundleno = 53 (0x35), region = 32  ;;  %v591_v9 = vld [vmem:[%s744_s2] ss:$0 sm:$0xff] (!%p138_p2) }
   0xd   : > { %s747_s13 = smov (!%p161_p3, %s433_s13), 1 }
   0xe   : > { %s446_s14 = sshll.u32 %s747_s13, 7  ;;  %s447_s22 = sshll.u32 %s747_s13, 8 }
   0xf   : > { %s577_s17 = scalar_lea.vmem %s742_s0, %s446_s14  ;;  %s609_s25 = scalar_lea.vmem %s745_s3, %s447_s22 }
  0x10   : > { %v449_v1 = vld [vmem:[%s577_s17] sm:$0xff]   ;;  %v512_v2 = vld [vmem:[%s577_s17 + $0x8] sm:$0xff]   ;;  %v513_v3 = vld [vmem:[%s577_s17 + $0x10] sm:$0xff]  }
  0x11   : > { %v450_v4 = vunpack.c.l.bf16 %v449_v1  ;;  %v451_v5 = vunpack.c.h.bf16 %v449_v1  ;;  %v454_v6 = vunpack.c.l.bf16 %v512_v2  ;;  %v455_v7 = vunpack.c.h.bf16 %v512_v2  ;;  %v514_v8 = vld [vmem:[%s577_s17 + $0x18] sm:$0xff]   ;;  %v515_v30 = vld [vmem:[%s577_s17 + $0x20] sm:$0xff]   ;;  %v516_v31 = vld [vmem:[%s577_s17 + $0x28] sm:$0xff]  }
  0x12   : > { %v458_v10 = vunpack.c.l.bf16 %v513_v3  ;;  %v459_v11 = vunpack.c.h.bf16 %v513_v3  ;;  %v462_v12 = vunpack.c.l.bf16 %v514_v8  ;;  %v463_v13 = vunpack.c.h.bf16 %v514_v8  ;;  %v517_v36 = vld [vmem:[%s577_s17 + $0x30] sm:$0xff]   ;;  %v518_v37 = vld [vmem:[%s577_s17 + $0x38] sm:$0xff]   ;;  %v519_v3 = vld [vmem:[%s577_s17 + $0x40] sm:$0xff]  }
  0x13   : > { %v242_v14 = vmul.f32 %v450_v4, %v582_v0  ;;  %v243_v15 = vmul.f32 %v451_v5, %v582_v0  ;;  %v244_v16 = vmul.f32 %v454_v6, %v582_v0  ;;  %v245_v17 = vmul.f32 %v455_v7, %v582_v0  ;;  %v520_v4 = vld [vmem:[%s577_s17 + $0x48] sm:$0xff]  }
  0x14   : > { %v246_v18 = vmul.f32 %v458_v10, %v582_v0  ;;  %v247_v19 = vmul.f32 %v459_v11, %v582_v0  ;;  %v248_v20 = vmul.f32 %v462_v12, %v582_v0  ;;  %v249_v21 = vmul.f32 %v463_v13, %v582_v0  ;;  %v521_v10 = vld [vmem:[%s577_s17 + $0x50] sm:$0xff]   ;;  %v522_v11 = vld [vmem:[%s577_s17 + $0x58] sm:$0xff]  }
  0x15   : > { %v281_v22 = vadd.f32 %v591_v9, %v242_v14  ;;  %v282_v23 = vadd.f32 %v591_v9, %v243_v15  ;;  %v283_v24 = vadd.f32 %v591_v9, %v244_v16  ;;  %v284_v25 = vadd.f32 %v591_v9, %v245_v17 }
  0x16   : > { %v285_v26 = vadd.f32 %v591_v9, %v246_v18  ;;  %v286_v27 = vadd.f32 %v591_v9, %v247_v19  ;;  %v287_v28 = vadd.f32 %v591_v9, %v248_v20  ;;  %v288_v29 = vadd.f32 %v591_v9, %v249_v21 }
  0x17   : > { %v313_v32 = vmax.f32 %v281_v22, 0.0  ;;  %v314_v33 = vmax.f32 %v282_v23, 0.0  ;;  %v315_v34 = vmax.f32 %v283_v24, 0.0  ;;  %v316_v35 = vmax.f32 %v284_v25, 0.0 }
  0x18   : > { %v317_v38 = vmax.f32 %v285_v26, 0.0  ;;  %v318_v39 = vmax.f32 %v286_v27, 0.0  ;;  %v319_v40 = vmax.f32 %v287_v28, 0.0  ;;  %v320_v41 = vmax.f32 %v288_v29, 0.0 }
  0x19   : > { %346 = vst.msk [vmem:[%s609_s25] sm:$0xff] %vm345_vm0, %v313_v32  ;;  %347 = vst.msk [vmem:[%s609_s25 + $0x8] sm:$0xff] %vm345_vm0, %v314_v33  ;;  %v466_v42 = vunpack.c.l.bf16 %v515_v30  ;;  %v467_v43 = vunpack.c.h.bf16 %v515_v30  ;;  %v470_v44 = vunpack.c.l.bf16 %v516_v31  ;;  %v471_v45 = vunpack.c.h.bf16 %v516_v31 }
  0x1a   : > { %348 = vst.msk [vmem:[%s609_s25 + $0x10] sm:$0xff] %vm345_vm0, %v315_v34  ;;  %349 = vst.msk [vmem:[%s609_s25 + $0x18] sm:$0xff] %vm345_vm0, %v316_v35  ;;  %v474_v46 = vunpack.c.l.bf16 %v517_v36  ;;  %v475_v47 = vunpack.c.h.bf16 %v517_v36  ;;  %v478_v48 = vunpack.c.l.bf16 %v518_v37  ;;  %v479_v49 = vunpack.c.h.bf16 %v518_v37 }
  0x1b   : > { %350 = vst.msk [vmem:[%s609_s25 + $0x20] sm:$0xff] %vm345_vm0, %v317_v38  ;;  %351 = vst.msk [vmem:[%s609_s25 + $0x28] sm:$0xff] %vm345_vm0, %v318_v39  ;;  %v250_v50 = vmul.f32 %v466_v42, %v582_v0  ;;  %v251_v51 = vmul.f32 %v467_v43, %v582_v0  ;;  %v252_v52 = vmul.f32 %v470_v44, %v582_v0  ;;  %v482_v16 = vunpack.c.l.bf16 %v519_v3 }
  0x1c   : > { %352 = vst.msk [vmem:[%s609_s25 + $0x30] sm:$0xff] %vm345_vm0, %v319_v40  ;;  %353 = vst.msk [vmem:[%s609_s25 + $0x38] sm:$0xff] %vm345_vm0, %v320_v41  ;;  %v253_v53 = vmul.f32 %v471_v45, %v582_v0  ;;  %v254_v54 = vmul.f32 %v474_v46, %v582_v0  ;;  %v255_v55 = vmul.f32 %v475_v47, %v582_v0  ;;  %v483_v17 = vunpack.c.h.bf16 %v519_v3  ;;  %v523_v40 = vld [vmem:[%s577_s17 + $0x60] sm:$0xff]   ;;  %v524_v41 = vld [vmem:[%s577_s17 + $0x68] sm:$0xff]  }
  0x1d   : > { %v256_v56 = vmul.f32 %v478_v48, %v582_v0  ;;  %v257_v57 = vmul.f32 %v479_v49, %v582_v0  ;;  %v289_v58 = vadd.f32 %v591_v9, %v250_v50  ;;  %v290_v59 = vadd.f32 %v591_v9, %v251_v51  ;;  %v525_v46 = vld [vmem:[%s577_s17 + $0x70] sm:$0xff]   ;;  %v526_v47 = vld [vmem:[%s577_s17 + $0x78] sm:$0xff]  }
  0x1e   : > { %v291_v60 = vadd.f32 %v591_v9, %v252_v52  ;;  %v292_v61 = vadd.f32 %v591_v9, %v253_v53  ;;  %v293_v62 = vadd.f32 %v591_v9, %v254_v54  ;;  %v294_v63 = vadd.f32 %v591_v9, %v255_v55 }
  0x1f   : > { %v295_v1 = vadd.f32 %v591_v9, %v256_v56  ;;  %v296_v2 = vadd.f32 %v591_v9, %v257_v57  ;;  %v321_v5 = vmax.f32 %v289_v58, 0.0  ;;  %v322_v6 = vmax.f32 %v290_v59, 0.0 }
  0x20   : > { %v323_v7 = vmax.f32 %v291_v60, 0.0  ;;  %v324_v8 = vmax.f32 %v292_v61, 0.0  ;;  %v325_v12 = vmax.f32 %v293_v62, 0.0  ;;  %v326_v13 = vmax.f32 %v294_v63, 0.0 }
  0x21   : > { %v327_v14 = vmax.f32 %v295_v1, 0.0  ;;  %v328_v15 = vmax.f32 %v296_v2, 0.0  ;;  %354 = vst.msk [vmem:[%s609_s25 + $0x40] sm:$0xff] %vm345_vm0, %v321_v5  ;;  %355 = vst.msk [vmem:[%s609_s25 + $0x48] sm:$0xff] %vm345_vm0, %v322_v6  ;;  %v486_v18 = vunpack.c.l.bf16 %v520_v4  ;;  %v487_v19 = vunpack.c.h.bf16 %v520_v4 }
  0x22   : > { %356 = vst.msk [vmem:[%s609_s25 + $0x50] sm:$0xff] %vm345_vm0, %v323_v7  ;;  %357 = vst.msk [vmem:[%s609_s25 + $0x58] sm:$0xff] %vm345_vm0, %v324_v8  ;;  %v490_v20 = vunpack.c.l.bf16 %v521_v10  ;;  %v491_v21 = vunpack.c.h.bf16 %v521_v10  ;;  %v494_v22 = vunpack.c.l.bf16 %v522_v11  ;;  %v495_v23 = vunpack.c.h.bf16 %v522_v11 }
  0x23   : > { %358 = vst.msk [vmem:[%s609_s25 + $0x60] sm:$0xff] %vm345_vm0, %v325_v12  ;;  %359 = vst.msk [vmem:[%s609_s25 + $0x68] sm:$0xff] %vm345_vm0, %v326_v13  ;;  %v258_v24 = vmul.f32 %v482_v16, %v582_v0  ;;  %v259_v25 = vmul.f32 %v483_v17, %v582_v0  ;;  %v260_v26 = vmul.f32 %v486_v18, %v582_v0  ;;  %v498_v52 = vunpack.c.l.bf16 %v523_v40 }
  0x24   : > { %360 = vst.msk [vmem:[%s609_s25 + $0x70] sm:$0xff] %vm345_vm0, %v327_v14  ;;  %361 = vst.msk [vmem:[%s609_s25 + $0x78] sm:$0xff] %vm345_vm0, %v328_v15  ;;  %v261_v27 = vmul.f32 %v487_v19, %v582_v0  ;;  %v262_v28 = vmul.f32 %v490_v20, %v582_v0  ;;  %v263_v29 = vmul.f32 %v491_v21, %v582_v0  ;;  %v499_v53 = vunpack.c.h.bf16 %v523_v40 }
  0x25   : > { %v264_v30 = vmul.f32 %v494_v22, %v582_v0  ;;  %v265_v31 = vmul.f32 %v495_v23, %v582_v0  ;;  %v297_v32 = vadd.f32 %v591_v9, %v258_v24  ;;  %v298_v33 = vadd.f32 %v591_v9, %v259_v25 }
  0x26   : > { %v299_v34 = vadd.f32 %v591_v9, %v260_v26  ;;  %v300_v35 = vadd.f32 %v591_v9, %v261_v27  ;;  %v301_v36 = vadd.f32 %v591_v9, %v262_v28  ;;  %v302_v37 = vadd.f32 %v591_v9, %v263_v29 }
  0x27   : > { %v303_v38 = vadd.f32 %v591_v9, %v264_v30  ;;  %v304_v39 = vadd.f32 %v591_v9, %v265_v31  ;;  %v329_v42 = vmax.f32 %v297_v32, 0.0  ;;  %v330_v43 = vmax.f32 %v298_v33, 0.0 }
  0x28   : > { %v331_v44 = vmax.f32 %v299_v34, 0.0  ;;  %v332_v45 = vmax.f32 %v300_v35, 0.0  ;;  %v333_v48 = vmax.f32 %v301_v36, 0.0  ;;  %v334_v49 = vmax.f32 %v302_v37, 0.0 }
  0x29   : > { %v335_v50 = vmax.f32 %v303_v38, 0.0  ;;  %v336_v51 = vmax.f32 %v304_v39, 0.0  ;;  %362 = vst.msk [vmem:[%s609_s25 + $0x80] sm:$0xff] %vm345_vm0, %v329_v42  ;;  %363 = vst.msk [vmem:[%s609_s25 + $0x88] sm:$0xff] %vm345_vm0, %v330_v43  ;;  %v502_v54 = vunpack.c.l.bf16 %v524_v41  ;;  %v503_v55 = vunpack.c.h.bf16 %v524_v41 }
  0x2a   : > { %364 = vst.msk [vmem:[%s609_s25 + $0x90] sm:$0xff] %vm345_vm0, %v331_v44  ;;  %365 = vst.msk [vmem:[%s609_s25 + $0x98] sm:$0xff] %vm345_vm0, %v332_v45  ;;  %v506_v56 = vunpack.c.l.bf16 %v525_v46  ;;  %v507_v57 = vunpack.c.h.bf16 %v525_v46  ;;  %v510_v58 = vunpack.c.l.bf16 %v526_v47  ;;  %v511_v59 = vunpack.c.h.bf16 %v526_v47 }
  0x2b   : > { %366 = vst.msk [vmem:[%s609_s25 + $0xa0] sm:$0xff] %vm345_vm0, %v333_v48  ;;  %367 = vst.msk [vmem:[%s609_s25 + $0xa8] sm:$0xff] %vm345_vm0, %v334_v49  ;;  %v266_v60 = vmul.f32 %v498_v52, %v582_v0  ;;  %v267_v61 = vmul.f32 %v499_v53, %v582_v0  ;;  %v268_v62 = vmul.f32 %v502_v54, %v582_v0 }
  0x2c   : > { %368 = vst.msk [vmem:[%s609_s25 + $0xb0] sm:$0xff] %vm345_vm0, %v335_v50  ;;  %369 = vst.msk [vmem:[%s609_s25 + $0xb8] sm:$0xff] %vm345_vm0, %v336_v51  ;;  %v269_v63 = vmul.f32 %v503_v55, %v582_v0  ;;  %v270_v1 = vmul.f32 %v506_v56, %v582_v0  ;;  %v271_v2 = vmul.f32 %v507_v57, %v582_v0 }
  0x2d   : > { %v272_v3 = vmul.f32 %v510_v58, %v582_v0  ;;  %v273_v4 = vmul.f32 %v511_v59, %v582_v0  ;;  %v305_v5 = vadd.f32 %v591_v9, %v266_v60  ;;  %v306_v6 = vadd.f32 %v591_v9, %v267_v61 }
  0x2e   : > { %v307_v7 = vadd.f32 %v591_v9, %v268_v62  ;;  %v308_v8 = vadd.f32 %v591_v9, %v269_v63  ;;  %v309_v10 = vadd.f32 %v591_v9, %v270_v1  ;;  %v310_v11 = vadd.f32 %v591_v9, %v271_v2 }
  0x2f   : > { %v311_v0 = vadd.f32 %v591_v9, %v272_v3  ;;  %v312_v12 = vadd.f32 %v591_v9, %v273_v4  ;;  %v337_v13 = vmax.f32 %v305_v5, 0.0  ;;  %v338_v14 = vmax.f32 %v306_v6, 0.0 }
  0x30   : > { %v339_v15 = vmax.f32 %v307_v7, 0.0  ;;  %v340_v16 = vmax.f32 %v308_v8, 0.0  ;;  %v341_v17 = vmax.f32 %v309_v10, 0.0  ;;  %v342_v18 = vmax.f32 %v310_v11, 0.0 }
  0x31   : > { %v343_v19 = vmax.f32 %v311_v0, 0.0  ;;  %v344_v20 = vmax.f32 %v312_v12, 0.0  ;;  %370 = vst.msk [vmem:[%s609_s25 + $0xc0] sm:$0xff] %vm345_vm0, %v337_v13  ;;  %371 = vst.msk [vmem:[%s609_s25 + $0xc8] sm:$0xff] %vm345_vm0, %v338_v14 }
  0x32   : > { %372 = vst.msk [vmem:[%s609_s25 + $0xd0] sm:$0xff] %vm345_vm0, %v339_v15  ;;  %373 = vst.msk [vmem:[%s609_s25 + $0xd8] sm:$0xff] %vm345_vm0, %v340_v16 }
  0x33   : > { %374 = vst.msk [vmem:[%s609_s25 + $0xe0] sm:$0xff] %vm345_vm0, %v341_v17  ;;  %375 = vst.msk [vmem:[%s609_s25 + $0xe8] sm:$0xff] %vm345_vm0, %v342_v18 }
  0x34   : > { %376 = vst.msk [vmem:[%s609_s25 + $0xf0] sm:$0xff] %vm345_vm0, %v343_v19  ;;  %377 = vst.msk [vmem:[%s609_s25 + $0xf8] sm:$0xff] %vm345_vm0, %v344_v20 }
  0x35 PF: > { %s13_s12 = sadd.s32 1, %s541_s12  }
  0x36   : > { %p10_p4 = scmp.ge.s32.totalorder %s13_s12, 4  }
  0x38   :  { %12 = sbr.rel (!%p10_p4) target bundleno = 1 (0x1), region = 62 }

// kernel: double_conv.3
= control target key start
LH: loop header
LB: loop body
LE: loop exit
PB: predicated region body
PF: predicated region fallthrough
CT: control target
= control target key end

     0   :  { %s4599_s21 = smov 0   ;;  %s4601_s22 = smov 0   ;;  %s5402_s0 = inlined_call_operand.vmem [shape: f32[2,16,16,4], index: 0, kind: input, shape index: {}]   ;;  %s5403_s1 = inlined_call_operand.vmem [shape: bf16[9,4,8], index: 1, kind: input, shape index: {}]   ;;  %s5404_s2 = inlined_call_operand.vmem [shape: f32[1,8], index: 2, kind: input, shape index: {}]   ;;  %s5405_s3 = inlined_call_operand.vmem [shape: f32[1,4], index: 3, kind: input, shape index: {}]   ;;  %s5406_s4 = inlined_call_operand.vmem [shape: f32[1,4], index: 4, kind: input, shape index: {}]   ;;  %s5407_s5 = inlined_call_operand.vmem [shape: bf16[2,16,16,8], index: 5, kind: output, shape index: {0}]   ;;  %s5408_s6 = inlined_call_operand.vmem [shape: f32[2,2,8], index: 6, kind: output, shape index: {1}]  }
   0x1   :  { %s4603_s23 = smov 0  }
   0x2 LB: > { %s29_s3 = sadd.s32 1, %s4557_s22  ;;  %p3560_p0 = scmp.ge.s32.totalorder %s4561_s23, 1  ;;  %s4561_s23 = sphi %s4603_s23, %s17_s23   ;;  %s4557_s22 = sphi %s4601_s22, %s5410_s22   ;;  %s4553_s21 = sphi %s4599_s21, %s5409_s21  }
   0x3   : > { %p31_p1 = scmp.ge.s32.totalorder %s29_s3, 2  ;;  %p248_p2 = scmp.lt.s32.totalorder %s4561_s23, 3 }
   0x5   : > { %s5412_s3 = smov (%p31_p1, %s29_s3), 0  ;;  %p249_p3 = pnand %p3560_p0, %p248_p2 }
   0x6   : > { %v3566_v0 = vld [vmem:[%s5403_s1 + $0x2] sm:$0x3] (!%p249_p3)  ;;  %vm596_vm0 = vcmask (!%p249_p3), 1041408   ;;  %v4625_v1 = vld [vmem:[%s5403_s1 + $0x8] sm:$0x3] (!%p249_p3)  ;;  %vm359_vm1 = vcmask (!%p249_p3), 31744  }
   0x7   : > { %252 = sbr.rel (%p249_p3) target bundleno = 570 (0x23a), region = 40  ;;  %4504 = vmatprep.subr.msk.bf16.mxu1 (!%p249_p3), %vm596_vm0, %v3566_v0  ;;  %4508 = vmatprep.subr.msk.bf16.mxu0 (!%p249_p3), %vm596_vm0, %v4625_v1  ;;  %v598_v2 = vsel (!%p249_p3), %vm596_vm0, %v3566_v0, 0  ;;  %v4633_v3 = vsel (!%p249_p3), %vm596_vm0, %v4625_v1, 0  ;;  %vm362_vm2 = vcmask (!%p249_p3), 25600   ;;  %p295_p4 = scmp.lt.s32.totalorder (!%p249_p3), %s4553_s21, 1  ;;  %v4563_v4 = vmov (!%p249_p3), 0.0  }
   0x8   : > { %3941 = vmatpush3.bf16.msra.mxu1 (!%p249_p3), %v598_v2  ;;  %4077 = vmatpush3.bf16.msra.mxu0 (!%p249_p3), %v4633_v3  ;;  %360 = vst.msk [vmem:[#allocation2] sm:$0xff] (!%p249_p3), %vm359_vm1, %v4563_v4  ;;  %361 = vst.msk [vmem:[#allocation2 + $0x8] sm:$0xff] (!%p249_p3), %vm359_vm1, %v4563_v4  ;;  %v496_v5 = vld [vmem:[%s5403_s1] sm:$0x3] (!%p249_p3)  ;;  %v4697_v6 = vld [vmem:[%s5403_s1 + $0xa] sm:$0x3] (!%p249_p3) }
   0x9   : > { %363 = vst.msk [vmem:[#allocation2 + $0x10] sm:$0x3] (!%p249_p3), %vm362_vm2, %v4563_v4  ;;  %366 = vst.msk [vmem:[#allocation2 + $0x28] sm:$0x3] (!%p249_p3), %vm362_vm2, %v4563_v4  ;;  %4505 = vmatprep.subr.msk.bf16.mxu1 (!%p249_p3), %vm596_vm0, %v496_v5  ;;  %4510 = vmatprep.subr.msk.bf16.mxu0 (!%p249_p3), %vm596_vm0, %v4697_v6  ;;  %v810_v36 = vsel (!%p249_p3), %vm596_vm0, %v496_v5, 0  ;;  %v1955_v41 = vsel (!%p249_p3), %vm596_vm0, %v4697_v6, 0 }
   0xa   : > { %364 = vst.msk [vmem:[#allocation2 + $0x18] sm:$0xff] (!%p249_p3), %vm359_vm1, %v4563_v4  ;;  %365 = vst.msk [vmem:[#allocation2 + $0x20] sm:$0xff] (!%p249_p3), %vm359_vm1, %v4563_v4  ;;  %v4770_v43 = vld [vmem:[%s5403_s1 + $0xc] sm:$0x3] (!%p249_p3)  ;;  %v4777_v44 = vld [vmem:[%s5403_s1 + $0x4] sm:$0x3] (!%p249_p3) }
   0xb   : > { %367 = vst.msk [vmem:[#allocation2 + $0x30] sm:$0xff] (!%p249_p3), %vm359_vm1, %v4563_v4  ;;  %368 = vst.msk [vmem:[#allocation2 + $0x38] sm:$0xff] (!%p249_p3), %vm359_vm1, %v4563_v4  ;;  %vm3375_vm3 = vcmask (!%p249_p3), 60416   ;;  %vm3072_vm4 = vcmask (!%p249_p3), 64512   ;;  %vm3243_vm5 = vcmask (!%p249_p3), 1040384   ;;  %vm3245_vm6 = vcmask (!%p249_p3), 58368  }
   0xc   : > { %369 = vst.msk [vmem:[#allocation2 + $0x40] sm:$0x3] (!%p249_p3), %vm362_vm2, %v4563_v4  ;;  %372 = vst.msk [vmem:[#allocation2 + $0x58] sm:$0x3] (!%p249_p3), %vm362_vm2, %v4563_v4 }
   0xd   : > { %370 = vst.msk [vmem:[#allocation2 + $0x48] sm:$0xff] (!%p249_p3), %vm359_vm1, %v4563_v4  ;;  %371 = vst.msk [vmem:[#allocation2 + $0x50] sm:$0xff] (!%p249_p3), %vm359_vm1, %v4563_v4 }
   0xe   : > { %373 = vst.msk [vmem:[#allocation2 + $0x60] sm:$0xff] %vm359_vm1, %v4563_v4  ;;  %374 = vst.msk [vmem:[#allocation2 + $0x68] sm:$0xff] %vm359_vm1, %v4563_v4  ;;  %s5414_s21 = smov (!%p295_p4, %s4553_s21), 1 }
   0xf   : > { %375 = vst.msk [vmem:[#allocation2 + $0x70] sm:$0x3] %vm362_vm2, %v4563_v4  ;;  %378 = vst.msk [vmem:[#allocation2 + $0x88] sm:$0x3] %vm362_vm2, %v4563_v4  ;;  %s3753_s7 = sshll.u32 %s5414_s21, 8  ;;  %v497_v13 = vld [vmem:[#allocation2 + $0x1] sm:$0xff] }
  0x10   : > { %376 = vst.msk [vmem:[#allocation2 + $0x78] sm:$0xff] %vm359_vm1, %v4563_v4  ;;  %377 = vst.msk [vmem:[#allocation2 + $0x80] sm:$0xff] %vm359_vm1, %v4563_v4  ;;  %s4711_s10 = scalar_lea.vmem %s5402_s0, %s3753_s7  ;;  %v498_v14 = vld [vmem:[#allocation2 + $0x9] sm:$0xff]  ;;  %s3754_s25 = sshll.u32 %s5414_s21, 7 }
  0x11   : > { %379 = vst.msk [vmem:[#allocation2 + $0x90] sm:$0xff] %vm359_vm1, %v4563_v4  ;;  %380 = vst.msk [vmem:[#allocation2 + $0x98] sm:$0xff] %vm359_vm1, %v4563_v4  ;;  %v327_v7 = vld [vmem:[%s4711_s10] sm:$0xff]  ;;  %v328_v8 = vld [vmem:[%s4711_s10 + $0x8] sm:$0xff]  ;;  %v529_v16 = vpack.c.bf16 %v498_v14, %v497_v13  ;;  %s5220_s28 = scalar_lea.vmem %s5407_s5, %s3754_s25  ;;  %s3565_s29 = sshll.u32 %s5414_s21, 1 }
  0x12   : > { %381 = vst.msk [vmem:[#allocation2 + $0xa0] sm:$0x3] %vm362_vm2, %v4563_v4  ;;  %384 = vst.msk [vmem:[#allocation2 + $0xb8] sm:$0x3] %vm362_vm2, %v4563_v4  ;;  %v329_v9 = vld [vmem:[%s4711_s10 + $0x10] sm:$0xff]  ;;  %v330_v10 = vld [vmem:[%s4711_s10 + $0x18] sm:$0xff]  ;;  %s321_s8 = scalar_lea.vmem %s5408_s6, %s3565_s29 }
  0x13   : > { %382 = vst.msk [vmem:[#allocation2 + $0xa8] sm:$0xff] %vm359_vm1, %v4563_v4  ;;  %383 = vst.msk [vmem:[#allocation2 + $0xb0] sm:$0xff] %vm359_vm1, %v4563_v4  ;;  %v331_v11 = vld [vmem:[%s4711_s10 + $0x20] sm:$0xff]  ;;  %v332_v12 = vld [vmem:[%s4711_s10 + $0x28] sm:$0xff]  ;;  %3942 = vmatprep.mubr.msk.bf16.mxu1 %vm359_vm1, %v529_v16 }
  0x14   : > { %385 = vst.msk [vmem:[#allocation2 + $0xc0] sm:$0xff] %vm359_vm1, %v4563_v4  ;;  %386 = vst.msk [vmem:[#allocation2 + $0xc8] sm:$0xff] %vm359_vm1, %v4563_v4  ;;  %v333_v15 = vld [vmem:[%s4711_s10 + $0x30] sm:$0xff]  ;;  %v334_v17 = vld [vmem:[%s4711_s10 + $0x38] sm:$0xff] }
  0x15   : > { %387 = vst.msk [vmem:[#allocation2 + $0xd0] sm:$0x3] %vm362_vm2, %v4563_v4  ;;  %390 = vst.msk [vmem:[#allocation2 + $0xe8] sm:$0x3] %vm362_vm2, %v4563_v4  ;;  %v335_v18 = vld [vmem:[%s4711_s10 + $0x40] sm:$0xff]  ;;  %v336_v19 = vld [vmem:[%s4711_s10 + $0x48] sm:$0xff] }
  0x16   : > { %388 = vst.msk [vmem:[#allocation2 + $0xd8] sm:$0xff] %vm359_vm1, %v4563_v4  ;;  %389 = vst.msk [vmem:[#allocation2 + $0xe0] sm:$0xff] %vm359_vm1, %v4563_v4  ;;  %v337_v20 = vld [vmem:[%s4711_s10 + $0x50] sm:$0xff]  ;;  %v338_v21 = vld [vmem:[%s4711_s10 + $0x58] sm:$0xff] }
  0x17   : > { %391 = vst.msk [vmem:[#allocation2 + $0xf0] sm:$0xff] %vm359_vm1, %v4563_v4  ;;  %392 = vst.msk [vmem:[#allocation2 + $0xf8] sm:$0xff] %vm359_vm1, %v4563_v4  ;;  %v339_v22 = vld [vmem:[%s4711_s10 + $0x60] sm:$0xff]  ;;  %v340_v23 = vld [vmem:[%s4711_s10 + $0x68] sm:$0xff] }
  0x18   : > { %393 = vst.msk [vmem:[#allocation2 + $0x100] sm:$0x3] %vm362_vm2, %v4563_v4  ;;  %396 = vst.msk [vmem:[#allocation2 + $0x118] sm:$0x3] %vm362_vm2, %v4563_v4  ;;  %v341_v24 = vld [vmem:[%s4711_s10 + $0x70] sm:$0xff]  ;;  %v342_v25 = vld [vmem:[%s4711_s10 + $0x78] sm:$0xff] }
  0x19   : > { %394 = vst.msk [vmem:[#allocation2 + $0x108] sm:$0xff] %vm359_vm1, %v4563_v4  ;;  %395 = vst.msk [vmem:[#allocation2 + $0x110] sm:$0xff] %vm359_vm1, %v4563_v4  ;;  %v343_v26 = vld [vmem:[%s4711_s10 + $0x80] sm:$0xff]  ;;  %v344_v27 = vld [vmem:[%s4711_s10 + $0x88] sm:$0xff] }
  0x1a   : > { %397 = vst.msk [vmem:[#allocation2 + $0x120] sm:$0xff] %vm359_vm1, %v4563_v4  ;;  %398 = vst.msk [vmem:[#allocation2 + $0x128] sm:$0xff] %vm359_vm1, %v4563_v4  ;;  %v345_v28 = vld [vmem:[%s4711_s10 + $0x90] sm:$0xff]  ;;  %v346_v29 = vld [vmem:[%s4711_s10 + $0x98] sm:$0xff] }
  0x1b   : > { %399 = vst.msk [vmem:[#allocation2 + $0x130] sm:$0x3] %vm362_vm2, %v4563_v4  ;;  %402 = vst.msk [vmem:[#allocation2 + $0x148] sm:$0x3] %vm362_vm2, %v4563_v4  ;;  %v347_v30 = vld [vmem:[%s4711_s10 + $0xa0] sm:$0xff]  ;;  %v348_v31 = vld [vmem:[%s4711_s10 + $0xa8] sm:$0xff] }
  0x1c   : > { %400 = vst.msk [vmem:[#allocation2 + $0x138] sm:$0xff] %vm359_vm1, %v4563_v4  ;;  %401 = vst.msk [vmem:[#allocation2 + $0x140] sm:$0xff] %vm359_vm1, %v4563_v4  ;;  %v349_v51 = vld [vmem:[%s4711_s10 + $0xb0] sm:$0xff]  ;;  %v350_v52 = vld [vmem:[%s4711_s10 + $0xb8] sm:$0xff] }
  0x1d   : > { %403 = vst.msk [vmem:[#allocation2 + $0x150] sm:$0xff] %vm359_vm1, %v4563_v4  ;;  %404 = vst.msk [vmem:[#allocation2 + $0x158] sm:$0xff] %vm359_vm1, %v4563_v4  ;;  %v351_v53 = vld [vmem:[%s4711_s10 + $0xc0] sm:$0xff]  ;;  %v352_v54 = vld [vmem:[%s4711_s10 + $0xc8] sm:$0xff] }
  0x1e   : > { %405 = vst.msk [vmem:[#allocation2 + $0x160] sm:$0x3] %vm362_vm2, %v4563_v4  ;;  %408 = vst.msk [vmem:[#allocation2 + $0x178] sm:$0x3] %vm362_vm2, %v4563_v4  ;;  %v353_v57 = vld [vmem:[%s4711_s10 + $0xd0] sm:$0xff]  ;;  %v354_v58 = vld [vmem:[%s4711_s10 + $0xd8] sm:$0xff] }
  0x1f   : > { %406 = vst.msk [vmem:[#allocation2 + $0x168] sm:$0xff] %vm359_vm1, %v4563_v4  ;;  %407 = vst.msk [vmem:[#allocation2 + $0x170] sm:$0xff] %vm359_vm1, %v4563_v4  ;;  %v355_v59 = vld [vmem:[%s4711_s10 + $0xe0] sm:$0xff]  ;;  %v356_v60 = vld [vmem:[%s4711_s10 + $0xe8] sm:$0xff] }
  0x20   : > { %409 = vst.msk [vmem:[#allocation2 + $0x180] sm:$0xff] %vm359_vm1, %v4563_v4  ;;  %410 = vst.msk [vmem:[#allocation2 + $0x188] sm:$0xff] %vm359_vm1, %v4563_v4  ;;  %v358_v13 = vld [vmem:[%s4711_s10 + $0xf8] sm:$0xff] }
  0x21   : > { %411 = vst.msk [vmem:[#allocation2 + $0x190] sm:$0x3] %vm362_vm2, %v4563_v4  ;;  %414 = vst.msk [vmem:[#allocation2 + $0x1a8] sm:$0x3] %vm362_vm2, %v4563_v4 }
  0x22   : > { %412 = vst.msk [vmem:[#allocation2 + $0x198] sm:$0xff] %vm359_vm1, %v4563_v4  ;;  %413 = vst.msk [vmem:[#allocation2 + $0x1a0] sm:$0xff] %vm359_vm1, %v4563_v4 }
  0x23   : > { %416 = vst.msk [vmem:[#allocation2 + $0x19] sm:$0xff] %vm359_vm1, %v327_v7  ;;  %417 = vst.msk [vmem:[#allocation2 + $0x21] sm:$0xff] %vm359_vm1, %v328_v8 }
  0x24   : > { %418 = vst.msk [vmem:[#allocation2 + $0x31] sm:$0xff] %vm359_vm1, %v329_v9  ;;  %419 = vst.msk [vmem:[#allocation2 + $0x39] sm:$0xff] %vm359_vm1, %v330_v10 }
  0x25   : > { %420 = vst.msk [vmem:[#allocation2 + $0x49] sm:$0xff] %vm359_vm1, %v331_v11  ;;  %421 = vst.msk [vmem:[#allocation2 + $0x51] sm:$0xff] %vm359_vm1, %v332_v12  ;;  %v357_v12 = vld [vmem:[%s4711_s10 + $0xf0] sm:$0xff] }
  0x26   : > { %422 = vst.msk [vmem:[#allocation2 + $0x61] sm:$0xff] %vm359_vm1, %v333_v15  ;;  %423 = vst.msk [vmem:[#allocation2 + $0x69] sm:$0xff] %vm359_vm1, %v334_v17 }
  0x27   : > { %424 = vst.msk [vmem:[#allocation2 + $0x79] sm:$0xff] %vm359_vm1, %v335_v18  ;;  %425 = vst.msk [vmem:[#allocation2 + $0x81] sm:$0xff] %vm359_vm1, %v336_v19 }
  0x28   : > { %426 = vst.msk [vmem:[#allocation2 + $0x91] sm:$0xff] %vm359_vm1, %v337_v20  ;;  %427 = vst.msk [vmem:[#allocation2 + $0x99] sm:$0xff] %vm359_vm1, %v338_v21 }
  0x29   : > { %428 = vst.msk [vmem:[#allocation2 + $0xa9] sm:$0xff] %vm359_vm1, %v339_v22  ;;  %429 = vst.msk [vmem:[#allocation2 + $0xb1] sm:$0xff] %vm359_vm1, %v340_v23  ;;  %v2250_v23 = vsel %vm596_vm0, %v4770_v43, 0 }
  0x2a   : > { %430 = vst.msk [vmem:[#allocation2 + $0xc1] sm:$0xff] %vm359_vm1, %v341_v24  ;;  %431 = vst.msk [vmem:[#allocation2 + $0xc9] sm:$0xff] %vm359_vm1, %v342_v25  ;;  %v499_v32 = vld [vmem:[#allocation2 + $0x19] sm:$0xff]  ;;  %v500_v33 = vld [vmem:[#allocation2 + $0x21] sm:$0xff] }
  0x2b   : > { %432 = vst.msk [vmem:[#allocation2 + $0xd9] sm:$0xff] %vm359_vm1, %v343_v26  ;;  %433 = vst.msk [vmem:[#allocation2 + $0xe1] sm:$0xff] %vm359_vm1, %v344_v27  ;;  %v1564_v34 = vld [vmem:[#allocation2 + $0x31] sm:$0xff]  ;;  %v530_v35 = vpack.c.bf16 %v500_v33, %v499_v32  ;;  %v1565_v37 = vld [vmem:[#allocation2 + $0x39] sm:$0xff] }
  0x2c   : > { %434 = vst.msk [vmem:[#allocation2 + $0xf1] sm:$0xff] %vm359_vm1, %v345_v28  ;;  %435 = vst.msk [vmem:[#allocation2 + $0xf9] sm:$0xff] %vm359_vm1, %v346_v29  ;;  %v503_v38 = vld [vmem:[#allocation2 + $0x49] sm:$0xff]  ;;  %v504_v39 = vld [vmem:[#allocation2 + $0x51] sm:$0xff]  ;;  %v4759_v40 = vpack.c.bf16 %v1565_v37, %v1564_v34 }
  0x2d   : > { %436 = vst.msk [vmem:[#allocation2 + $0x109] sm:$0xff] %vm359_vm1, %v347_v30  ;;  %437 = vst.msk [vmem:[#allocation2 + $0x111] sm:$0xff] %vm359_vm1, %v348_v31  ;;  %v4763_v42 = vpack.c.bf16 %v504_v39, %v503_v38  ;;  %3943 = vmatmul.mubr.msk.bf16.vlgmr.msra.gmra.mrb[0].mxu1 %vm359_vm1, %v530_v35  ;;  %4078 = vmatprep.mubr.msk.bf16.mxu0 %vm359_vm1, %v530_v35  ;;  %v1568_v45 = vld [vmem:[#allocation2 + $0x61] sm:$0xff]  ;;  %v1569_v46 = vld [vmem:[#allocation2 + $0x69] sm:$0xff] }
  0x2e   : > { %3975 = vmatpush3.bf16.msra.mxu1 %v810_v36  ;;  %4079 = vmatmul.mubr.msk.bf16.vlgmr.msra.gmra.mrb[0].mxu0 %vm359_vm1, %v4759_v40  ;;  %v507_v47 = vld [vmem:[#allocation2 + $0x79] sm:$0xff]  ;;  %v508_v48 = vld [vmem:[#allocation2 + $0x81] sm:$0xff]  ;;  %v4787_v49 = vpack.c.bf16 %v1569_v46, %v1568_v45  ;;  %438 = vst.msk [vmem:[#allocation2 + $0x121] sm:$0xff] %vm359_vm1, %v349_v51  ;;  %439 = vst.msk [vmem:[#allocation2 + $0x129] sm:$0xff] %vm359_vm1, %v350_v52 }
  0x2f   : > { %4111 = vmatpush3.bf16.msra.mxu0 %v1955_v41  ;;  %3946 = vmatprep.mubr.msk.bf16.mxu1 %vm359_vm1, %v4759_v40  ;;  %v4789_v50 = vpack.c.bf16 %v508_v48, %v507_v47  ;;  %440 = vst.msk [vmem:[#allocation2 + $0x139] sm:$0xff] %vm359_vm1, %v351_v53  ;;  %v1572_v55 = vld [vmem:[#allocation2 + $0x91] sm:$0xff]  ;;  %v1573_v56 = vld [vmem:[#allocation2 + $0x99] sm:$0xff]  ;;  %441 = vst.msk [vmem:[#allocation2 + $0x141] sm:$0xff] %vm359_vm1, %v352_v54 }
  0x30   : > { %4082 = vmatprep.mubr.msk.bf16.mxu0 %vm359_vm1, %v4763_v42  ;;  %4511 = vmatprep.subr.msk.bf16.mxu0 %vm596_vm0, %v4770_v43  ;;  %442 = vst.msk [vmem:[#allocation2 + $0x151] sm:$0xff] %vm359_vm1, %v353_v57  ;;  %v511_v61 = vld [vmem:[#allocation2 + $0xa9] sm:$0xff]  ;;  %v512_v62 = vld [vmem:[#allocation2 + $0xb1] sm:$0xff]  ;;  %443 = vst.msk [vmem:[#allocation2 + $0x159] sm:$0xff] %vm359_vm1, %v354_v58  ;;  %v4815_v63 = vpack.c.bf16 %v1573_v56, %v1572_v55 }
  0x31   : > { %4506 = vmatprep.subr.msk.bf16.mxu1 %vm596_vm0, %v4777_v44  ;;  %444 = vst.msk [vmem:[#allocation2 + $0x169] sm:$0xff] %vm359_vm1, %v355_v59  ;;  %445 = vst.msk [vmem:[#allocation2 + $0x171] sm:$0xff] %vm359_vm1, %v356_v60  ;;  %v4817_v0 = vpack.c.bf16 %v512_v62, %v511_v61  ;;  %v1576_v2 = vld [vmem:[#allocation2 + $0xc1] sm:$0xff]  ;;  %v1577_v4 = vld [vmem:[#allocation2 + $0xc9] sm:$0xff] }
  0x32   : > { %v1856_v5 = vld [vmem:[#allocation2 + $0x1a] sm:$0xff]  ;;  %v1857_v6 = vld [vmem:[#allocation2 + $0x22] sm:$0xff]  ;;  %v4827_v7 = vpack.c.bf16 %v1577_v4, %v1576_v2  ;;  %v1858_v11 = vld [vmem:[#allocation2 + $0x32] sm:$0xff]  ;;  %446 = vst.msk [vmem:[#allocation2 + $0x181] sm:$0xff] %vm359_vm1, %v357_v12 }
  0x33   : > { %v4829_v8 = vpack.c.bf16 %v1857_v6, %v1856_v5  ;;  %v515_v9 = vld [vmem:[#allocation2 + $0xd9] sm:$0xff]  ;;  %v516_v10 = vld [vmem:[#allocation2 + $0xe1] sm:$0xff]  ;;  %v517_v15 = vld [vmem:[#allocation2 + $0xf1] sm:$0xff]  ;;  %447 = vst.msk [vmem:[#allocation2 + $0x189] sm:$0xff] %vm359_vm1, %v358_v13 }
  0x34   : > { %v1859_v14 = vld [vmem:[#allocation2 + $0x3a] sm:$0xff]  ;;  %v1860_v17 = vld [vmem:[#allocation2 + $0x4a] sm:$0xff]  ;;  %v1861_v18 = vld [vmem:[#allocation2 + $0x52] sm:$0xff]  ;;  %v4843_v19 = vpack.c.bf16 %v516_v10, %v515_v9 }
  0x35   : > { %3947 = vmatmul.mubr.msk.bf16.gmra.mrb[4].mxu1 %vm359_vm1, %v4763_v42  ;;  %v518_v16 = vld [vmem:[#allocation2 + $0xf9] sm:$0xff]  ;;  %v4845_v20 = vpack.c.bf16 %v1859_v14, %v1858_v11  ;;  %v4849_v22 = vpack.c.bf16 %v1861_v18, %v1860_v17  ;;  %v4858_v24 = vld [vmem:[%s5403_s1 + $0xe] sm:$0x3]  ;;  %v520_v26 = vld [vmem:[#allocation2 + $0x111] sm:$0xff]  ;;  %v1072_v18 = vsel %vm596_vm0, %v4777_v44, 0 }
  0x36   : > { %4083 = vmatmul.mubr.msk.bf16.gmra.mrb[4].mxu0 %vm359_vm1, %v4787_v49  ;;  %3950 = vmatprep.mubr.msk.bf16.mxu1 %vm359_vm1, %v4787_v49  ;;  %v4847_v21 = vpack.c.bf16 %v518_v16, %v517_v15  ;;  %v519_v25 = vld [vmem:[#allocation2 + $0x109] sm:$0xff]  ;;  %v521_v29 = vld [vmem:[#allocation2 + $0x121] sm:$0xff]  ;;  %v523_v37 = vld [vmem:[#allocation2 + $0x139] sm:$0xff] }
  0x37   : > { %4086 = vmatprep.mubr.msk.bf16.mxu0 %vm359_vm1, %v4789_v50  ;;  %v1862_v27 = vld [vmem:[#allocation2 + $0x62] sm:$0xff]  ;;  %v1863_v28 = vld [vmem:[#allocation2 + $0x6a] sm:$0xff]  ;;  %v1864_v31 = vld [vmem:[#allocation2 + $0x7a] sm:$0xff]  ;;  %v4868_v33 = vpack.c.bf16 %v520_v26, %v519_v25 }
  0x38   : > { %v522_v30 = vld [vmem:[#allocation2 + $0x129] sm:$0xff]  ;;  %v4870_v34 = vpack.c.bf16 %v1863_v28, %v1862_v27  ;;  %v524_v38 = vld [vmem:[#allocation2 + $0x141] sm:$0xff]  ;;  %v1866_v39 = vld [vmem:[#allocation2 + $0x92] sm:$0xff] }
  0x39   : > { %v1865_v32 = vld [vmem:[#allocation2 + $0x82] sm:$0xff]  ;;  %v4872_v35 = vpack.c.bf16 %v522_v30, %v521_v29  ;;  %v1867_v41 = vld [vmem:[#allocation2 + $0x9a] sm:$0xff]  ;;  %v525_v43 = vld [vmem:[#allocation2 + $0x151] sm:$0xff]  ;;  %v4884_v48 = vpack.c.bf16 %v524_v38, %v523_v37 }
  0x3a   : > { %v4874_v36 = vpack.c.bf16 %v1865_v32, %v1864_v31  ;;  %v526_v45 = vld [vmem:[#allocation2 + $0x159] sm:$0xff]  ;;  %v1868_v46 = vld [vmem:[#allocation2 + $0xaa] sm:$0xff]  ;;  %v4886_v51 = vpack.c.bf16 %v1867_v41, %v1866_v39  ;;  %v1870_v56 = vld [vmem:[#allocation2 + $0xc2] sm:$0xff] }
  0x3b   : > { %v1869_v47 = vld [vmem:[#allocation2 + $0xb2] sm:$0xff]  ;;  %v4888_v52 = vpack.c.bf16 %v526_v45, %v525_v43  ;;  %v527_v54 = vld [vmem:[#allocation2 + $0x169] sm:$0xff]  ;;  %v448_v58 = vld [vmem:[#allocation2] sm:$0xff] }
  0x3c   : > { %v4890_v53 = vpack.c.bf16 %v1869_v47, %v1868_v46  ;;  %v528_v55 = vld [vmem:[#allocation2 + $0x171] sm:$0xff]  ;;  %v449_v59 = vld [vmem:[#allocation2 + $0x8] sm:$0xff]  ;;  %v1872_v60 = vld [vmem:[#allocation2 + $0xda] sm:$0xff] }
  0x3d   : > { %3951 = vmatmul.mubr.msk.bf16.gmra.mrb[8].mxu1 %vm359_vm1, %v4789_v50  ;;  %v1871_v57 = vld [vmem:[#allocation2 + $0xca] sm:$0xff]  ;;  %v1873_v61 = vld [vmem:[#allocation2 + $0xe2] sm:$0xff]  ;;  %v4900_v62 = vpack.c.bf16 %v528_v55, %v527_v54  ;;  %v480_v4 = vpack.c.bf16 %v449_v59, %v448_v58  ;;  %v450_v6 = vld [vmem:[#allocation2 + $0x18] sm:$0xff] }
  0x3e   : > { %4087 = vmatmul.mubr.msk.bf16.gmra.mrb[8].mxu0 %vm359_vm1, %v4815_v63  ;;  %3954 = vmatprep.mubr.msk.bf16.mxu1 %vm359_vm1, %v4815_v63  ;;  %v4902_v2 = vpack.c.bf16 %v1871_v57, %v1870_v56  ;;  %v4904_v5 = vpack.c.bf16 %v1873_v61, %v1872_v60  ;;  %v451_v9 = vld [vmem:[#allocation2 + $0x20] sm:$0xff]  ;;  %v1874_v10 = vld [vmem:[#allocation2 + $0xf2] sm:$0xff]  ;;  %v1876_v14 = vld [vmem:[#allocation2 + $0x10a] sm:$0xff] }
  0x3f   : > { %4090 = vmatprep.mubr.msk.bf16.mxu0 %vm359_vm1, %v4817_v0  ;;  %v1875_v11 = vld [vmem:[#allocation2 + $0xfa] sm:$0xff]  ;;  %v452_v12 = vld [vmem:[#allocation2 + $0x30] sm:$0xff]  ;;  %v4913_v16 = vpack.c.bf16 %v451_v9, %v450_v6  ;;  %v4928_v26 = vld [vmem:[%s5403_s1 + $0x6] sm:$0x3] }
  0x40   : > { %v453_v13 = vld [vmem:[#allocation2 + $0x38] sm:$0xff]  ;;  %v4915_v17 = vpack.c.bf16 %v1875_v11, %v1874_v10  ;;  %v454_v27 = vld [vmem:[#allocation2 + $0x48] sm:$0xff]  ;;  %v455_v28 = vld [vmem:[#allocation2 + $0x50] sm:$0xff] }
  0x41   : > { %v1877_v15 = vld [vmem:[#allocation2 + $0x112] sm:$0xff]  ;;  %v1878_v29 = vld [vmem:[#allocation2 + $0x122] sm:$0xff]  ;;  %v1879_v44 = vld [vmem:[#allocation2 + $0x12a] sm:$0xff]  ;;  %v4938_v38 = vpack.c.bf16 %v455_v28, %v454_v27 }
  0x42   : > { %v4921_v25 = vpack.c.bf16 %v1877_v15, %v1876_v14  ;;  %v456_v30 = vld [vmem:[#allocation2 + $0x60] sm:$0xff]  ;;  %v457_v31 = vld [vmem:[#allocation2 + $0x68] sm:$0xff]  ;;  %v4940_v39 = vpack.c.bf16 %v1879_v44, %v1878_v29  ;;  %v458_v45 = vld [vmem:[#allocation2 + $0x78] sm:$0xff] }
  0x43   : > { %v1880_v32 = vld [vmem:[#allocation2 + $0x13a] sm:$0xff]  ;;  %v1881_v37 = vld [vmem:[#allocation2 + $0x142] sm:$0xff]  ;;  %v4942_v41 = vpack.c.bf16 %v457_v31, %v456_v30  ;;  %v1882_v47 = vld [vmem:[#allocation2 + $0x152] sm:$0xff] }
  0x44   : > { %v4944_v43 = vpack.c.bf16 %v1881_v37, %v1880_v32  ;;  %v459_v46 = vld [vmem:[#allocation2 + $0x80] sm:$0xff]  ;;  %v460_v55 = vld [vmem:[#allocation2 + $0x90] sm:$0xff]  ;;  %v461_v56 = vld [vmem:[#allocation2 + $0x98] sm:$0xff]  ;;  %v2544_v32 = vsel %vm596_vm0, %v4858_v24, 0 }
  0x45   : > { %3955 = vmatmul.mubr.msk.bf16.gmra.mrb[12].mxu1 %vm359_vm1, %v4817_v0  ;;  %v1883_v54 = vld [vmem:[#allocation2 + $0x15a] sm:$0xff]  ;;  %v1884_v57 = vld [vmem:[#allocation2 + $0x16a] sm:$0xff]  ;;  %v1885_v58 = vld [vmem:[#allocation2 + $0x172] sm:$0xff]  ;;  %v4954_v59 = vpack.c.bf16 %v459_v46, %v458_v45  ;;  %v4958_v61 = vpack.c.bf16 %v461_v56, %v460_v55 }
  0x46   : > { %4091 = vmatmul.mubr.msk.bf16.gmra.mrb[12].mxu0 %vm359_vm1, %v4827_v7  ;;  %3958 = vmatprep.mubr.msk.bf16.mxu1 %vm359_vm1, %v4827_v7  ;;  %v4956_v60 = vpack.c.bf16 %v1883_v54, %v1882_v47  ;;  %v462_v6 = vld [vmem:[#allocation2 + $0xa8] sm:$0xff]  ;;  %v463_v9 = vld [vmem:[#allocation2 + $0xb0] sm:$0xff]  ;;  %v464_v10 = vld [vmem:[#allocation2 + $0xc0] sm:$0xff] }
  0x47   : > { %4112 = vmatprep.mubr.msk.bf16.mxu0 %vm359_vm1, %v4829_v8  ;;  %v1886_v11 = vld [vmem:[#allocation2 + $0x182] sm:$0xff]  ;;  %v4970_v14 = vpack.c.bf16 %v463_v9, %v462_v6  ;;  %v466_v27 = vld [vmem:[#allocation2 + $0xd8] sm:$0xff]  ;;  %v468_v29 = vld [vmem:[#allocation2 + $0xf0] sm:$0xff] }
  0x48   : > { %v467_v28 = vld [vmem:[#allocation2 + $0xe0] sm:$0xff]  ;;  %v469_v44 = vld [vmem:[#allocation2 + $0xf8] sm:$0xff]  ;;  %v3701_v37 = vld [vmem:[%s5403_s1 + $0x10] sm:$0x3] }
  0x49   : > { %v4984_v30 = vpack.c.bf16 %v467_v28, %v466_v27  ;;  %v4986_v31 = vpack.c.bf16 %v469_v44, %v468_v29  ;;  %v470_v45 = vld [vmem:[#allocation2 + $0x108] sm:$0xff]  ;;  %v471_v46 = vld [vmem:[#allocation2 + $0x110] sm:$0xff]  ;;  %v474_v56 = vld [vmem:[#allocation2 + $0x138] sm:$0xff]  ;;  %v1367_v44 = vsel %vm596_vm0, %v4928_v26, 0 }
  0x4a   : > { %v473_v47 = vld [vmem:[#allocation2 + $0x128] sm:$0xff]  ;;  %v5002_v54 = vpack.c.bf16 %v471_v46, %v470_v45  ;;  %v477_v6 = vld [vmem:[#allocation2 + $0x158] sm:$0xff]  ;;  %v2182_v45 = vld [vmem:[#allocation2 + $0x1a0] sm:$0xff] }
  0x4b   : > { %v974_v27 = vld [vmem:[#allocation2 + $0xa] sm:$0xff] }
  0x4d   : > { %3959 = vmatmul.mubr.msk.bf16.gmra.mrb[16].mxu1 %vm359_vm1, %v4843_v19 }
  0x4e   : > { %4113 = vmatmul.mubr.msk.bf16.vlgmr.msra.gmra.mrb[0].mxu0 %vm359_vm1, %v4845_v20  ;;  %3962 = vmatprep.mubr.msk.bf16.mxu1 %vm359_vm1, %v4847_v21 }
  0x4f   : > { %4145 = vmatpush3.bf16.msra.mxu0 %v2250_v23  ;;  %4116 = vmatprep.mubr.msk.bf16.mxu0 %vm359_vm1, %v4849_v22  ;;  %v4919_v23 = vpack.c.bf16 %v453_v13, %v452_v12  ;;  %v1887_v12 = vld [vmem:[#allocation2 + $0x18a] sm:$0xff] }
  0x50   : > { %4512 = vmatprep.subr.msk.bf16.mxu0 %vm596_vm0, %v4858_v24  ;;  %v465_v13 = vld [vmem:[#allocation2 + $0xc8] sm:$0xff]  ;;  %v4972_v15 = vpack.c.bf16 %v1887_v12, %v1886_v11  ;;  %v472_v24 = vld [vmem:[#allocation2 + $0x120] sm:$0xff]  ;;  %v479_v12 = vld [vmem:[#allocation2 + $0x170] sm:$0xff] }
  0x51   : > { %v5004_v55 = vpack.c.bf16 %v473_v47, %v472_v24  ;;  %v478_v11 = vld [vmem:[#allocation2 + $0x168] sm:$0xff]  ;;  %v2838_v24 = vsel %vm596_vm0, %v3701_v37, 0 }
  0x52   : > { %v5026_v28 = vpack.c.bf16 %v479_v12, %v478_v11 }
  0x55   : > { %3963 = vmatmul.mubr.msk.bf16.gmra.mrb[20].mxu1 %vm359_vm1, %v4868_v33 }
  0x56   : > { %4117 = vmatmul.mubr.msk.bf16.gmra.mrb[4].mxu0 %vm359_vm1, %v4870_v34  ;;  %3966 = vmatprep.mubr.msk.bf16.mxu1 %vm359_vm1, %v4872_v35 }
  0x57   : > { %4120 = vmatprep.mubr.msk.bf16.mxu0 %vm359_vm1, %v4874_v36 }
  0x5d   : > { %3967 = vmatmul.mubr.msk.bf16.gmra.mrb[24].mxu1 %vm359_vm1, %v4884_v48 }
  0x5e   : > { %4121 = vmatmul.mubr.msk.bf16.gmra.mrb[8].mxu0 %vm359_vm1, %v4886_v51  ;;  %3970 = vmatprep.mubr.msk.bf16.mxu1 %vm359_vm1, %v4888_v52 }
  0x5f   : > { %4124 = vmatprep.mubr.msk.bf16.mxu0 %vm359_vm1, %v4890_v53 }
  0x65   : > { %3971 = vmatmul.mubr.msk.bf16.gmra.mrb[28].mxu1 %vm359_vm1, %v4900_v62 }
  0x66   : > { %4125 = vmatmul.mubr.msk.bf16.gmra.mrb[12].mxu0 %vm359_vm1, %v4902_v2  ;;  %3976 = vmatprep.mubr.msk.bf16.mxu1 %vm359_vm1, %v480_v4  ;;  %v4960_v4 = vpack.c.bf16 %v1885_v58, %v1884_v57  ;;  %v475_v57 = vld [vmem:[#allocation2 + $0x140] sm:$0xff]  ;;  %v476_v58 = vld [vmem:[#allocation2 + $0x150] sm:$0xff] }
  0x67   : > { %4128 = vmatprep.mubr.msk.bf16.mxu0 %vm359_vm1, %v4904_v5  ;;  %v5014_v9 = vpack.c.bf16 %v475_v57, %v474_v56 }
  0x6d   : > { %3977 = vmatmul.mubr.msk.bf16.vlgmr.msra.gmra.mrb[0].mxu1 %vm359_vm1, %v4913_v16 }
  0x6e   : > { %4009 = vmatpush3.bf16.msra.mxu1 %v1072_v18  ;;  %4129 = vmatmul.mubr.msk.bf16.gmra.mrb[16].mxu0 %vm359_vm1, %v4915_v17  ;;  %v4974_v18 = vpack.c.bf16 %v465_v13, %v464_v10  ;;  %v5016_v10 = vpack.c.bf16 %v477_v6, %v476_v58  ;;  %v973_v13 = vld [vmem:[#allocation2 + $0x2] sm:$0xff] }
  0x6f   : > { %3980 = vmatprep.mubr.msk.bf16.mxu1 %vm359_vm1, %v4919_v23  ;;  %4132 = vmatprep.mubr.msk.bf16.mxu0 %vm359_vm1, %v4921_v25  ;;  %v1005_v29 = vpack.c.bf16 %v974_v27, %v973_v13 }
  0x70   : > { %4507 = vmatprep.subr.msk.bf16.mxu1 %vm596_vm0, %v4928_v26  ;;  %v2180_v26 = vld [vmem:[#allocation2 + $0x188] sm:$0xff] }
  0x75   : > { %3981 = vmatmul.mubr.msk.bf16.gmra.mrb[4].mxu1 %vm359_vm1, %v4938_v38 }
  0x76   : > { %4133 = vmatmul.mubr.msk.bf16.gmra.mrb[20].mxu0 %vm359_vm1, %v4940_v39  ;;  %3984 = vmatprep.mubr.msk.bf16.mxu1 %vm359_vm1, %v4942_v41 }
  0x77   : > { %4136 = vmatprep.mubr.msk.bf16.mxu0 %vm359_vm1, %v4944_v43 }
  0x7d   : > { %3985 = vmatmul.mubr.msk.bf16.gmra.mrb[8].mxu1 %vm359_vm1, %v4954_v59 }
  0x7e   : > { %4137 = vmatmul.mubr.msk.bf16.gmra.mrb[24].mxu0 %vm359_vm1, %v4956_v60  ;;  %3988 = vmatprep.mubr.msk.bf16.mxu1 %vm359_vm1, %v4958_v61 }
  0x7f   : > { %4140 = vmatprep.mubr.msk.bf16.mxu0 %vm359_vm1, %v4960_v4 }
  0x85   : > { %3989 = vmatmul.mubr.msk.bf16.gmra.mrb[12].mxu1 %vm359_vm1, %v4970_v14 }
  0x86   : > { %4141 = vmatmul.mubr.msk.bf16.gmra.mrb[28].mxu0 %vm359_vm1, %v4972_v15  ;;  %3992 = vmatprep.mubr.msk.bf16.mxu1 %vm359_vm1, %v4974_v18 }
  0x87   : > { %4146 = vmatprep.mubr.msk.bf16.mxu0 %vm359_vm1, %v4919_v23 }
  0x8d   : > { %3993 = vmatmul.mubr.msk.bf16.gmra.mrb[16].mxu1 %vm359_vm1, %v4984_v30 }
  0x8e   : > { %4147 = vmatmul.mubr.msk.bf16.vlgmr.msra.gmra.mrb[0].mxu0 %vm359_vm1, %v4938_v38  ;;  %3996 = vmatprep.mubr.msk.bf16.mxu1 %vm359_vm1, %v4986_v31 }
  0x8f   : > { %4179 = vmatpush3.bf16.msra.mxu0 %v2544_v32  ;;  %4150 = vmatprep.mubr.msk.bf16.mxu0 %vm359_vm1, %v4942_v41 }
  0x90   : > { %4513 = vmatprep.subr.msk.bf16.mxu0 %vm596_vm0, %v3701_v37 }
  0x95   : > { %3997 = vmatmul.mubr.msk.bf16.gmra.mrb[20].mxu1 %vm359_vm1, %v5002_v54 }
  0x96   : > { %4151 = vmatmul.mubr.msk.bf16.gmra.mrb[4].mxu0 %vm359_vm1, %v4954_v59  ;;  %4000 = vmatprep.mubr.msk.bf16.mxu1 %vm359_vm1, %v5004_v55 }
  0x97   : > { %4154 = vmatprep.mubr.msk.bf16.mxu0 %vm359_vm1, %v4958_v61 }
  0x9d   : > { %4001 = vmatmul.mubr.msk.bf16.gmra.mrb[24].mxu1 %vm359_vm1, %v5014_v9 }
  0x9e   : > { %4155 = vmatmul.mubr.msk.bf16.gmra.mrb[8].mxu0 %vm359_vm1, %v4970_v14  ;;  %4004 = vmatprep.mubr.msk.bf16.mxu1 %vm359_vm1, %v5016_v10 }
  0x9f   : > { %4158 = vmatprep.mubr.msk.bf16.mxu0 %vm359_vm1, %v4974_v18 }
  0xa5   : > { %4005 = vmatmul.mubr.msk.bf16.gmra.mrb[28].mxu1 %vm359_vm1, %v5026_v28 }
  0xa6   : > { %4159 = vmatmul.mubr.msk.bf16.gmra.mrb[12].mxu0 %vm359_vm1, %v4984_v30  ;;  %4010 = vmatprep.mubr.msk.bf16.mxu1 %vm359_vm1, %v1005_v29 }
  0xa7   : > { %4162 = vmatprep.mubr.msk.bf16.mxu0 %vm359_vm1, %v4986_v31 }
  0xad   : > { %4011 = vmatmul.mubr.msk.bf16.vlgmr.msra.gmra.mrb[0].mxu1 %vm359_vm1, %v4829_v8  ;;  %v2179_v8 = vld [vmem:[#allocation2 + $0x180] sm:$0xff] }
  0xae   : > { %4043 = vmatpush3.bf16.msra.mxu1 %v1367_v44  ;;  %4163 = vmatmul.mubr.msk.bf16.gmra.mrb[16].mxu0 %vm359_vm1, %v5002_v54  ;;  %v5055_v32 = vpack.c.bf16 %v2180_v26, %v2179_v8 }
  0xaf   : > { %4014 = vmatprep.mubr.msk.bf16.mxu1 %vm359_vm1, %v4845_v20  ;;  %4166 = vmatprep.mubr.msk.bf16.mxu0 %vm359_vm1, %v5004_v55 }
  0xb0   : > { %4509 = vmatprep.subr.msk.bf16.mxu1 %vm596_vm0, %v4625_v1  ;;  %v2181_v1 = vld [vmem:[#allocation2 + $0x198] sm:$0xff] }
  0xb1   : > { %v2198_v46 = vpack.c.bf16 %v2182_v45, %v2181_v1 }
  0xb5   : > { %4015 = vmatmul.mubr.msk.bf16.gmra.mrb[4].mxu1 %vm359_vm1, %v4849_v22 }
  0xb6   : > { %4167 = vmatmul.mubr.msk.bf16.gmra.mrb[20].mxu0 %vm359_vm1, %v5014_v9  ;;  %4018 = vmatprep.mubr.msk.bf16.mxu1 %vm359_vm1, %v4870_v34 }
  0xb7   : > { %4170 = vmatprep.mubr.msk.bf16.mxu0 %vm359_vm1, %v5016_v10 }
  0xbd   : > { %4019 = vmatmul.mubr.msk.bf16.gmra.mrb[8].mxu1 %vm359_vm1, %v4874_v36 }
  0xbe   : > { %4171 = vmatmul.mubr.msk.bf16.gmra.mrb[24].mxu0 %vm359_vm1, %v5026_v28  ;;  %4022 = vmatprep.mubr.msk.bf16.mxu1 %vm359_vm1, %v4886_v51 }
  0xbf   : > { %4174 = vmatprep.mubr.msk.bf16.mxu0 %vm359_vm1, %v5055_v32 }
  0xc5   : > { %4023 = vmatmul.mubr.msk.bf16.gmra.mrb[12].mxu1 %vm359_vm1, %v4890_v53 }
  0xc6   : > { %4175 = vmatmul.mubr.msk.bf16.gmra.mrb[28].mxu0 %vm359_vm1, %v2198_v46  ;;  %4026 = vmatprep.mubr.msk.bf16.mxu1 %vm359_vm1, %v4902_v2 }
  0xc7   : > { %4180 = vmatprep.mubr.msk.bf16.mxu0 %vm359_vm1, %v4759_v40  ;;  %v2474_v40 = vld [vmem:[#allocation2 + $0x189] sm:$0xff] }
  0xcd   : > { %4027 = vmatmul.mubr.msk.bf16.gmra.mrb[16].mxu1 %vm359_vm1, %v4904_v5 }
  0xce   : > { %4181 = vmatmul.mubr.msk.bf16.vlgmr.msra.gmra.mrb[0].mxu0 %vm359_vm1, %v4763_v42  ;;  %4030 = vmatprep.mubr.msk.bf16.mxu1 %vm359_vm1, %v4915_v17 }
  0xcf   : > { %4213 = vmatpush3.bf16.msra.mxu0 %v2838_v24  ;;  %4184 = vmatprep.mubr.msk.bf16.mxu0 %vm359_vm1, %v4787_v49  ;;  %v2475_v49 = vld [vmem:[#allocation2 + $0x199] sm:$0xff] }
  0xd5   : > { %4031 = vmatmul.mubr.msk.bf16.gmra.mrb[20].mxu1 %vm359_vm1, %v4921_v25 }
  0xd6   : > { %4185 = vmatmul.mubr.msk.bf16.gmra.mrb[4].mxu0 %vm359_vm1, %v4789_v50  ;;  %4034 = vmatprep.mubr.msk.bf16.mxu1 %vm359_vm1, %v4940_v39  ;;  %v2476_v50 = vld [vmem:[#allocation2 + $0x1a1] sm:$0xff] }
  0xd7   : > { %4188 = vmatprep.mubr.msk.bf16.mxu0 %vm359_vm1, %v4815_v63  ;;  %v2492_v63 = vpack.c.bf16 %v2476_v50, %v2475_v49 }
  0xdd   : > { %4035 = vmatmul.mubr.msk.bf16.gmra.mrb[24].mxu1 %vm359_vm1, %v4944_v43 }
  0xde   : > { %4189 = vmatmul.mubr.msk.bf16.gmra.mrb[8].mxu0 %vm359_vm1, %v4817_v0  ;;  %4038 = vmatprep.mubr.msk.bf16.mxu1 %vm359_vm1, %v4956_v60  ;;  %v2769_v0 = vld [vmem:[#allocation2 + $0x19a] sm:$0xff] }
  0xdf   : > { %4192 = vmatprep.mubr.msk.bf16.mxu0 %vm359_vm1, %v4827_v7  ;;  %v2770_v7 = vld [vmem:[#allocation2 + $0x1a2] sm:$0xff] }
  0xe5   : > { %4039 = vmatmul.mubr.msk.bf16.gmra.mrb[28].mxu1 %vm359_vm1, %v4960_v4 }
  0xe6   : > { %4193 = vmatmul.mubr.msk.bf16.gmra.mrb[12].mxu0 %vm359_vm1, %v4843_v19  ;;  %4044 = vmatprep.mubr.msk.bf16.mxu1 %vm359_vm1, %v4913_v16 }
  0xe7   : > { %4196 = vmatprep.mubr.msk.bf16.mxu0 %vm359_vm1, %v4847_v21 }
  0xed   : > { %4045 = vmatmul.mubr.msk.bf16.vlgmr.msra.gmra.mrb[0].mxu1 %vm359_vm1, %v4919_v23 }
  0xee   : > { %4247 = vmatpush3.bf16.msra.mxu1 %v4633_v3  ;;  %4197 = vmatmul.mubr.msk.bf16.gmra.mrb[16].mxu0 %vm359_vm1, %v4868_v33  ;;  %v2473_v3 = vld [vmem:[#allocation2 + $0x181] sm:$0xff] }
  0xef   : > { %4048 = vmatprep.mubr.msk.bf16.mxu1 %vm359_vm1, %v4938_v38  ;;  %4200 = vmatprep.mubr.msk.bf16.mxu0 %vm359_vm1, %v4872_v35  ;;  %v2491_v42 = vpack.c.bf16 %v2474_v40, %v2473_v3 }
  0xf5   : > { %4049 = vmatmul.mubr.msk.bf16.gmra.mrb[4].mxu1 %vm359_vm1, %v4942_v41 }
  0xf6   : > { %4201 = vmatmul.mubr.msk.bf16.gmra.mrb[20].mxu0 %vm359_vm1, %v4884_v48  ;;  %4052 = vmatprep.mubr.msk.bf16.mxu1 %vm359_vm1, %v4954_v59 }
  0xf7   : > { %4204 = vmatprep.mubr.msk.bf16.mxu0 %vm359_vm1, %v4888_v52 }
  0xfd   : > { %4053 = vmatmul.mubr.msk.bf16.gmra.mrb[8].mxu1 %vm359_vm1, %v4958_v61 }
  0xfe   : > { %4205 = vmatmul.mubr.msk.bf16.gmra.mrb[24].mxu0 %vm359_vm1, %v4900_v62  ;;  %4056 = vmatprep.mubr.msk.bf16.mxu1 %vm359_vm1, %v4970_v14 }
  0xff   : > { %4208 = vmatprep.mubr.msk.bf16.mxu0 %vm359_vm1, %v2491_v42 }
 0x105   : > { %4057 = vmatmul.mubr.msk.bf16.gmra.mrb[12].mxu1 %vm359_vm1, %v4974_v18 }
 0x106   : > { %4209 = vmatmul.mubr.msk.bf16.gmra.mrb[28].mxu0 %vm359_vm1, %v2492_v63  ;;  %4060 = vmatprep.mubr.msk.bf16.mxu1 %vm359_vm1, %v4984_v30 }
 0x107   : > { %4214 = vmatprep.mubr.msk.bf16.mxu0 %vm359_vm1, %v4845_v20 }
 0x10d   : > { %4061 = vmatmul.mubr.msk.bf16.gmra.mrb[16].mxu1 %vm359_vm1, %v4986_v31 }
 0x10e   : > { %4215 = vmatmul.mubr.msk.bf16.vlgmr.msra.gmra.mrb[0].mxu0 %vm359_vm1, %v4849_v22  ;;  %4064 = vmatprep.mubr.msk.bf16.mxu1 %vm359_vm1, %v5002_v54 }
 0x10f   : > { %4218 = vmatprep.mubr.msk.bf16.mxu0 %vm359_vm1, %v4870_v34 }
 0x115   : > { %4065 = vmatmul.mubr.msk.bf16.gmra.mrb[20].mxu1 %vm359_vm1, %v5004_v55 }
 0x116   : > { %4219 = vmatmul.mubr.msk.bf16.gmra.mrb[4].mxu0 %vm359_vm1, %v4874_v36  ;;  %4068 = vmatprep.mubr.msk.bf16.mxu1 %vm359_vm1, %v5014_v9 }
 0x117   : > { %4222 = vmatprep.mubr.msk.bf16.mxu0 %vm359_vm1, %v4886_v51 }
 0x11d   : > { %4069 = vmatmul.mubr.msk.bf16.gmra.mrb[24].mxu1 %vm359_vm1, %v5016_v10 }
 0x11e   : > { %4223 = vmatmul.mubr.msk.bf16.gmra.mrb[8].mxu0 %vm359_vm1, %v4890_v53  ;;  %4072 = vmatprep.mubr.msk.bf16.mxu1 %vm359_vm1, %v5026_v28 }
 0x11f   : > { %4226 = vmatprep.mubr.msk.bf16.mxu0 %vm359_vm1, %v4902_v2 }
 0x125   : > { %4073 = vmatmul.mubr.msk.bf16.gmra.mrb[28].mxu1 %vm359_vm1, %v5055_v32 }
 0x126   : > { %4227 = vmatmul.mubr.msk.bf16.gmra.mrb[12].mxu0 %vm359_vm1, %v4904_v5  ;;  %4094 = vmatprep.mubr.msk.bf16.mxu1 %vm359_vm1, %v4843_v19  ;;  %v2786_v19 = vpack.c.bf16 %v2770_v7, %v2769_v0 }
 0x127   : > { %4230 = vmatprep.mubr.msk.bf16.mxu0 %vm359_vm1, %v4915_v17 }
 0x12d   : > { %4095 = vmatmul.mubr.msk.bf16.vlgmr.msra.gmra.mrb[16].mxu1 %vm359_vm1, %v4847_v21 }
 0x12e   : > { %4231 = vmatmul.mubr.msk.bf16.gmra.mrb[16].mxu0 %vm359_vm1, %v4921_v25  ;;  %4098 = vmatprep.mubr.msk.bf16.mxu1 %vm359_vm1, %v4868_v33  ;;  %v5213_v25 = vld [vmem:[%s5404_s2] ss:$0 sm:$0xff] }
 0x12f   : > { %4234 = vmatprep.mubr.msk.bf16.mxu0 %vm359_vm1, %v4940_v39 }
 0x135   : > { %4099 = vmatmul.mubr.msk.bf16.gmra.mrb[20].mxu1 %vm359_vm1, %v4872_v35 }
 0x136   : > { %4235 = vmatmul.mubr.msk.bf16.gmra.mrb[20].mxu0 %vm359_vm1, %v4944_v43  ;;  %4102 = vmatprep.mubr.msk.bf16.mxu1 %vm359_vm1, %v4884_v48 }
 0x137   : > { %4238 = vmatprep.mubr.msk.bf16.mxu0 %vm359_vm1, %v4956_v60 }
 0x13d   : > { %4103 = vmatmul.mubr.msk.bf16.gmra.mrb[24].mxu1 %vm359_vm1, %v4888_v52 }
 0x13e   : > { %4239 = vmatmul.mubr.msk.bf16.gmra.mrb[24].mxu0 %vm359_vm1, %v4960_v4  ;;  %4106 = vmatprep.mubr.msk.bf16.mxu1 %vm359_vm1, %v4900_v62 }
 0x13f   : > { %4242 = vmatprep.mubr.msk.bf16.mxu0 %vm359_vm1, %v4972_v15 }
 0x145   : > { %4107 = vmatmul.mubr.msk.bf16.gmra.mrb[28].mxu1 %vm359_vm1, %v2491_v42 }
 0x146   : > { %4243 = vmatmul.mubr.msk.bf16.gmra.mrb[28].mxu0 %vm359_vm1, %v2786_v19 }
 0x1c0   : > { %v4046_v20 = vpop.f32.mrb[0].mxu1 }
 0x1c1   : > { %v1403_v21 = vpop.f32.mrb[1].mxu1 }
 0x1c2   : > { %v4047_v22 = vpop.f32.mrb[2].mxu1 }
 0x1c3   : > { %v1406_v33 = vpop.f32.mrb[3].mxu1 }
 0x1c8   : > { %v4050_v34 = vpop.f32.mrb[4].mxu1 }
 0x1c9   : > { %v1419_v35 = vpop.f32.mrb[5].mxu1 }
 0x1ca   : > { %v4051_v36 = vpop.f32.mrb[6].mxu1 }
 0x1cb   : > { %v1422_v48 = vpop.f32.mrb[7].mxu1 }
 0x1d0   : > { %v5194_v51 = vpop.f32.mrb[8].mxu1 }
 0x1d1   : > { %v5196_v52 = vpop.f32.mrb[9].mxu1 }
 0x1d2   : > { %v5198_v53 = vpop.f32.mrb[10].mxu1 }
 0x1d3   : > { %v5200_v62 = vpop.f32.mrb[11].mxu1 }
 0x1d8   : > { %v5202_v2 = vpop.f32.mrb[12].mxu1 }
 0x1d9   : > { %v5204_v5 = vpop.f32.mrb[13].mxu1 }
 0x1da   : > { %v5206_v16 = vpop.f32.mrb[14].mxu1 }
 0x1db   : > { %v5208_v17 = vpop.f32.mrb[15].mxu1 }
 0x1e1   : > { %v4216_v23 = vpop.f32.mrb[0].mxu0 }
 0x1e2   : > { %v4248_v38 = vadd.f32 %v4216_v23, %v4046_v20  ;;  %v2874_v39 = vpop.f32.mrb[1].mxu0 }
 0x1e3   : > { %v4249_v41 = vadd.f32 %v2874_v39, %v1403_v21  ;;  %v4217_v43 = vpop.f32.mrb[2].mxu0 }
 0x1e4   : > { %v3042_v59 = vadd.f32 %v4248_v38, %v5213_v25  ;;  %v4250_v60 = vadd.f32 %v4217_v43, %v4047_v22  ;;  %v2877_v61 = vpop.f32.mrb[3].mxu0 }
 0x1e5   : > { %v3040_v4 = vadd.f32 %v4249_v41, %v5213_v25  ;;  %v4251_v14 = vadd.f32 %v2877_v61, %v1406_v33 }
 0x1e6   : > { %v3757_v15 = vpack.c.bf16 %v3042_v59, %v3042_v59  ;;  %v3043_v18 = vadd.f32 %v4250_v60, %v5213_v25  ;;  %v3144_v47 = vmul.f32 %v3042_v59, %v3042_v59  ;;  %v3076_v13 = vsel %vm3072_vm4, %v3042_v59, 0.0 }
 0x1e7   : > { %v3142_v30 = vmul.f32 %v3040_v4, %v3040_v4  ;;  %v3755_v31 = vpack.c.bf16 %v3040_v4, %v3040_v4  ;;  %v3041_v37 = vadd.f32 %v4251_v14, %v5213_v25  ;;  %v3073_v55 = vsel %vm3072_vm4, %v3040_v4, 0.0 }
 0x1e8   : > { %3378 = vst.msk [vmem:[%s5220_s28 + $0x8] sm:$0xf] %vm3375_vm3, %v3757_v15  ;;  %v3758_v54 = vpack.c.bf16 %v3043_v18, %v3043_v18  ;;  %v3145_v9 = vmul.f32 %v3043_v18, %v3043_v18  ;;  %v3177_v46 = vsel %vm3072_vm4, %v3144_v47, 0.0  ;;  %v3078_v40 = vsel %vm3072_vm4, %v3043_v18, 0.0 }
 0x1e9   : > { %3376 = vst.msk [vmem:[%s5220_s28] sm:$0xf] %vm3375_vm3, %v3755_v31  ;;  %v3074_v56 = vsel %vm3072_vm4, %v3041_v37, 0.0  ;;  %v3143_v57 = vmul.f32 %v3041_v37, %v3041_v37  ;;  %v3756_v58 = vpack.c.bf16 %v3041_v37, %v3041_v37  ;;  %v4220_v6 = vpop.f32.mrb[4].mxu0  ;;  %v3174_v27 = vsel %vm3072_vm4, %v3142_v30, 0.0 }
 0x1ea   : > { %3379 = vst.msk [vmem:[%s5220_s28 + $0xc] sm:$0xf] %vm3375_vm3, %v3758_v54  ;;  %v3075_v10 = vadd.f32 %v3074_v56, %v3073_v55  ;;  %v4252_v11 = vadd.f32 %v4220_v6, %v4050_v34  ;;  %v2890_v12 = vpop.f32.mrb[5].mxu0  ;;  %v3179_v42 = vsel %vm3072_vm4, %v3145_v9, 0.0 }
 0x1eb   : > { %v3175_v28 = vsel %vm3072_vm4, %v3143_v57, 0.0  ;;  %3377 = vst.msk [vmem:[%s5220_s28 + $0x4] sm:$0xf] %vm3375_vm3, %v3756_v58  ;;  %v4253_v29 = vadd.f32 %v2890_v12, %v1419_v35  ;;  %v4221_v44 = vpop.f32.mrb[6].mxu0 }
 0x1ec   : > { %v3077_v8 = vadd.f32 %v3076_v13, %v3075_v10  ;;  %v3176_v26 = vadd.f32 %v3175_v28, %v3174_v27  ;;  %v3046_v32 = vadd.f32 %v4252_v11, %v5213_v25  ;;  %v4254_v1 = vadd.f32 %v4221_v44, %v4051_v36  ;;  %v2893_v45 = vpop.f32.mrb[7].mxu0 }
 0x1ed   : > { %v3044_v24 = vadd.f32 %v4253_v29, %v5213_v25  ;;  %v4255_v3 = vadd.f32 %v2893_v45, %v1422_v48 }
 0x1ee   : > { %v3178_v49 = vadd.f32 %v3177_v46, %v3176_v26  ;;  %v3761_v50 = vpack.c.bf16 %v3046_v32, %v3046_v32  ;;  %v3079_v63 = vadd.f32 %v3078_v40, %v3077_v8  ;;  %v3047_v21 = vadd.f32 %v4254_v1, %v5213_v25 }
 0x1ef   : > { %v3080_v0 = vsel %vm3072_vm4, %v3044_v24, 0.0  ;;  %v3146_v7 = vmul.f32 %v3044_v24, %v3044_v24  ;;  %v3759_v19 = vpack.c.bf16 %v3044_v24, %v3044_v24  ;;  %v3045_v22 = vadd.f32 %v4255_v3, %v5213_v25 }
 0x1f0   : > { %3382 = vst.msk [vmem:[%s5220_s28 + $0x18] sm:$0xf] %vm3375_vm3, %v3761_v50  ;;  %v3180_v20 = vadd.f32 %v3179_v42, %v3178_v49  ;;  %v3081_v33 = vadd.f32 %v3080_v0, %v3079_v63  ;;  %v3148_v36 = vmul.f32 %v3046_v32, %v3046_v32  ;;  %v3762_v23 = vpack.c.bf16 %v3047_v21, %v3047_v21 }
 0x1f1   : > { %v3181_v34 = vsel %vm3072_vm4, %v3146_v7, 0.0  ;;  %3380 = vst.msk [vmem:[%s5220_s28 + $0x10] sm:$0xf] %vm3375_vm3, %v3759_v19  ;;  %v4224_v35 = vpop.f32.mrb[8].mxu0  ;;  %v3082_v39 = vsel %vm3072_vm4, %v3045_v22, 0.0  ;;  %v3147_v41 = vmul.f32 %v3045_v22, %v3045_v22  ;;  %v3760_v43 = vpack.c.bf16 %v3045_v22, %v3045_v22 }
 0x1f2   : > { %v3182_v48 = vadd.f32 %v3181_v34, %v3180_v20  ;;  %v2906_v38 = vpop.f32.mrb[9].mxu0  ;;  %v4256_v59 = vadd.f32 %v4224_v35, %v5194_v51  ;;  %v3084_v61 = vsel %vm3072_vm4, %v3046_v32, 0.0  ;;  %3383 = vst.msk [vmem:[%s5220_s28 + $0x1c] sm:$0xf] %vm3375_vm3, %v3762_v23  ;;  %v3083_v4 = vadd.f32 %v3082_v39, %v3081_v33 }
 0x1f3   : > { %v4225_v60 = vpop.f32.mrb[10].mxu0  ;;  %v4257_v14 = vadd.f32 %v2906_v38, %v5196_v52  ;;  %v3149_v30 = vmul.f32 %v3047_v21, %v3047_v21  ;;  %v3183_v31 = vsel %vm3072_vm4, %v3147_v41, 0.0  ;;  %3381 = vst.msk [vmem:[%s5220_s28 + $0x14] sm:$0xf] %vm3375_vm3, %v3760_v43  ;;  %v3185_v52 = vsel %vm3072_vm4, %v3148_v36, 0.0 }
 0x1f4   : > { %v4258_v15 = vadd.f32 %v4225_v60, %v5198_v53  ;;  %v2909_v18 = vpop.f32.mrb[11].mxu0  ;;  %v3050_v37 = vadd.f32 %v4256_v59, %v5213_v25  ;;  %v3085_v47 = vadd.f32 %v3084_v61, %v3083_v4  ;;  %v3184_v54 = vadd.f32 %v3183_v31, %v3182_v48 }
 0x1f5   : > { %v4259_v51 = vadd.f32 %v2909_v18, %v5200_v62  ;;  %v3048_v55 = vadd.f32 %v4257_v14, %v5213_v25  ;;  %v3086_v53 = vsel %vm3072_vm4, %v3047_v21, 0.0  ;;  %v3187_v62 = vsel %vm3072_vm4, %v3149_v30, 0.0 }
 0x1f6   : > { %v3051_v56 = vadd.f32 %v4258_v15, %v5213_v25  ;;  %v3765_v57 = vpack.c.bf16 %v3050_v37, %v3050_v37  ;;  %v3186_v6 = vadd.f32 %v3185_v52, %v3184_v54  ;;  %v3087_v9 = vadd.f32 %v3086_v53, %v3085_v47 }
 0x1f7   : > { %v3049_v58 = vadd.f32 %v4259_v51, %v5213_v25  ;;  %v3088_v10 = vsel %vm3072_vm4, %v3048_v55, 0.0  ;;  %v3150_v11 = vmul.f32 %v3048_v55, %v3048_v55  ;;  %v3152_v12 = vmul.f32 %v3050_v37, %v3050_v37 }
 0x1f8   : > { %3386 = vst.msk [vmem:[%s5220_s28 + $0x28] sm:$0xf] %vm3375_vm3, %v3765_v57  ;;  %v3763_v13 = vpack.c.bf16 %v3048_v55, %v3048_v55  ;;  %v3089_v28 = vadd.f32 %v3088_v10, %v3087_v9  ;;  %v3188_v29 = vadd.f32 %v3187_v62, %v3186_v6  ;;  %v3766_v8 = vpack.c.bf16 %v3051_v56, %v3051_v56 }
 0x1f9   : > { %v4228_v27 = vpop.f32.mrb[12].mxu0  ;;  %v3189_v44 = vsel %vm3072_vm4, %v3150_v11, 0.0  ;;  %v3153_v32 = vmul.f32 %v3051_v56, %v3051_v56  ;;  %v3090_v1 = vsel %vm3072_vm4, %v3049_v58, 0.0  ;;  %v3151_v45 = vmul.f32 %v3049_v58, %v3049_v58 }
 0x1fa   : > { %v2922_v26 = vpop.f32.mrb[13].mxu0  ;;  %3384 = vst.msk [vmem:[%s5220_s28 + $0x20] sm:$0xf] %vm3375_vm3, %v3763_v13  ;;  %v3764_v46 = vpack.c.bf16 %v3049_v58, %v3049_v58  ;;  %v3190_v3 = vadd.f32 %v3189_v44, %v3188_v29  ;;  %3387 = vst.msk [vmem:[%s5220_s28 + $0x2c] sm:$0xf] %vm3375_vm3, %v3766_v8  ;;  %v3091_v40 = vadd.f32 %v3090_v1, %v3089_v28  ;;  %v3092_v63 = vsel %vm3072_vm4, %v3050_v37, 0.0 }
 0x1fb   : > { %v4229_v24 = vpop.f32.mrb[14].mxu0  ;;  %v4260_v42 = vadd.f32 %v4228_v27, %v5202_v2  ;;  %v4261_v49 = vadd.f32 %v2922_v26, %v5204_v5  ;;  %v3191_v0 = vsel %vm3072_vm4, %v3151_v45, 0.0  ;;  %v3193_v2 = vsel %vm3072_vm4, %v3152_v12, 0.0 }
 0x1fc   : > { %v2925_v50 = vpop.f32.mrb[15].mxu0  ;;  %3385 = vst.msk [vmem:[%s5220_s28 + $0x24] sm:$0xf] %vm3375_vm3, %v3764_v46  ;;  %v4262_v7 = vadd.f32 %v4229_v24, %v5206_v16  ;;  %v3093_v20 = vadd.f32 %v3092_v63, %v3091_v40  ;;  %v3192_v21 = vadd.f32 %v3191_v0, %v3190_v3  ;;  %v3094_v35 = vsel %vm3072_vm4, %v3051_v56, 0.0 }
 0x1fd   : > { %v4263_v19 = vadd.f32 %v2925_v50, %v5208_v17  ;;  %v3054_v22 = vadd.f32 %v4260_v42, %v5213_v25  ;;  %v3052_v33 = vadd.f32 %v4261_v49, %v5213_v25  ;;  %v3195_v36 = vsel %vm3072_vm4, %v3153_v32, 0.0 }
 0x1fe   : > { %v3055_v5 = vadd.f32 %v4262_v7, %v5213_v25  ;;  %v3194_v16 = vadd.f32 %v3193_v2, %v3192_v21  ;;  %v3095_v23 = vadd.f32 %v3094_v35, %v3093_v20 }
 0x1ff   : > { %v3053_v34 = vadd.f32 %v4263_v19, %v5213_v25  ;;  %v3769_v17 = vpack.c.bf16 %v3054_v22, %v3054_v22  ;;  %v3096_v38 = vsel %vm3072_vm4, %v3052_v33, 0.0  ;;  %v3154_v39 = vmul.f32 %v3052_v33, %v3052_v33 }
 0x200   : > { %v4096_v48 = vpop.f32.mrb[16].mxu1  ;;  %v3767_v41 = vpack.c.bf16 %v3052_v33, %v3052_v33  ;;  %v3156_v60 = vmul.f32 %v3054_v22, %v3054_v22  ;;  %v3196_v61 = vadd.f32 %v3195_v36, %v3194_v16  ;;  %v3097_v15 = vadd.f32 %v3096_v38, %v3095_v23 }
 0x201   : > { %v1761_v43 = vpop.f32.mrb[17].mxu1  ;;  %v4232_v59 = vpop.f32.mrb[16].mxu0  ;;  %3390 = vst.msk [vmem:[%s5220_s28 + $0x38] sm:$0xf] %vm3375_vm3, %v3769_v17  ;;  %v3197_v18 = vsel %vm3072_vm4, %v3154_v39, 0.0  ;;  %v3770_v30 = vpack.c.bf16 %v3055_v5, %v3055_v5  ;;  %v3098_v31 = vsel %vm3072_vm4, %v3053_v34, 0.0  ;;  %v3157_v54 = vmul.f32 %v3055_v5, %v3055_v5 }
 0x202   : > { %v4097_v4 = vpop.f32.mrb[18].mxu1  ;;  %v2938_v14 = vpop.f32.mrb[17].mxu0  ;;  %3388 = vst.msk [vmem:[%s5220_s28 + $0x30] sm:$0xf] %vm3375_vm3, %v3767_v41  ;;  %v3198_v47 = vadd.f32 %v3197_v18, %v3196_v61  ;;  %v3155_v55 = vmul.f32 %v3053_v34, %v3053_v34  ;;  %v3768_v56 = vpack.c.bf16 %v3053_v34, %v3053_v34  ;;  %v3099_v53 = vadd.f32 %v3098_v31, %v3097_v15 }
 0x203   : > { %v1764_v37 = vpop.f32.mrb[19].mxu1  ;;  %v4233_v51 = vpop.f32.mrb[18].mxu0  ;;  %3391 = vst.msk [vmem:[%s5220_s28 + $0x3c] sm:$0xf] %vm3375_vm3, %v3770_v30  ;;  %v4264_v57 = vadd.f32 %v4232_v59, %v4096_v48  ;;  %v4265_v58 = vadd.f32 %v2938_v14, %v1761_v43  ;;  %v3100_v9 = vsel %vm3072_vm4, %v3054_v22, 0.0  ;;  %v3201_v28 = vsel %vm3072_vm4, %v3156_v60, 0.0 }
 0x204   : > { %v2941_v52 = vpop.f32.mrb[19].mxu0  ;;  %v4266_v6 = vadd.f32 %v4233_v51, %v4097_v4  ;;  %v3199_v10 = vsel %vm3072_vm4, %v3155_v55, 0.0  ;;  %3389 = vst.msk [vmem:[%s5220_s28 + $0x34] sm:$0xf] %vm3375_vm3, %v3768_v56  ;;  %v3101_v62 = vadd.f32 %v3100_v9, %v3099_v53  ;;  %v3102_v26 = vsel %vm3072_vm4, %v3055_v5, 0.0 }
 0x205   : > { %v4267_v11 = vadd.f32 %v2941_v52, %v1764_v37  ;;  %v3200_v12 = vadd.f32 %v3199_v10, %v3198_v47  ;;  %v3058_v13 = vadd.f32 %v4264_v57, %v5213_v25  ;;  %v3056_v27 = vadd.f32 %v4265_v58, %v5213_v25 }
 0x206   : > { %v3059_v29 = vadd.f32 %v4266_v6, %v5213_v25  ;;  %v3203_v32 = vsel %vm3072_vm4, %v3157_v54, 0.0  ;;  %v3103_v3 = vadd.f32 %v3102_v26, %v3101_v62 }
 0x207   : > { %v3057_v44 = vadd.f32 %v4267_v11, %v5213_v25  ;;  %v3202_v1 = vadd.f32 %v3201_v28, %v3200_v12  ;;  %v3773_v45 = vpack.c.bf16 %v3058_v13, %v3058_v13  ;;  %v3104_v40 = vsel %vm3072_vm4, %v3056_v27, 0.0 }
 0x208   : > { %v4100_v8 = vpop.f32.mrb[20].mxu1  ;;  %v3158_v42 = vmul.f32 %v3056_v27, %v3056_v27  ;;  %v3771_v49 = vpack.c.bf16 %v3056_v27, %v3056_v27  ;;  %v3160_v0 = vmul.f32 %v3058_v13, %v3058_v13  ;;  %v3105_v21 = vadd.f32 %v3104_v40, %v3103_v3 }
 0x209   : > { %v1777_v46 = vpop.f32.mrb[21].mxu1  ;;  %v4236_v24 = vpop.f32.mrb[20].mxu0  ;;  %3394 = vst.msk [vmem:[%s5220_s28 + $0x48] sm:$0xf] %vm3375_vm3, %v3773_v45  ;;  %v3204_v7 = vadd.f32 %v3203_v32, %v3202_v1  ;;  %v3774_v33 = vpack.c.bf16 %v3059_v29, %v3059_v29  ;;  %v3106_v2 = vsel %vm3072_vm4, %v3057_v44, 0.0  ;;  %v3161_v35 = vmul.f32 %v3059_v29, %v3059_v29 }
 0x20a   : > { %v4101_v50 = vpop.f32.mrb[22].mxu1  ;;  %v2954_v63 = vpop.f32.mrb[21].mxu0  ;;  %v3205_v22 = vsel %vm3072_vm4, %v3158_v42, 0.0  ;;  %3392 = vst.msk [vmem:[%s5220_s28 + $0x40] sm:$0xf] %vm3375_vm3, %v3771_v49  ;;  %v3159_v36 = vmul.f32 %v3057_v44, %v3057_v44  ;;  %v3772_v16 = vpack.c.bf16 %v3057_v44, %v3057_v44  ;;  %v3107_v17 = vadd.f32 %v3106_v2, %v3105_v21 }
 0x20b   : > { %v1780_v19 = vpop.f32.mrb[23].mxu1  ;;  %v4237_v20 = vpop.f32.mrb[22].mxu0  ;;  %v3206_v34 = vadd.f32 %v3205_v22, %v3204_v7  ;;  %3395 = vst.msk [vmem:[%s5220_s28 + $0x4c] sm:$0xf] %vm3375_vm3, %v3774_v33  ;;  %v4268_v48 = vadd.f32 %v4236_v24, %v4100_v8  ;;  %v4269_v23 = vadd.f32 %v2954_v63, %v1777_v46  ;;  %v3108_v39 = vsel %vm3072_vm4, %v3058_v13, 0.0 }
 0x20c   : > { %v2957_v5 = vpop.f32.mrb[23].mxu0  ;;  %v4270_v38 = vadd.f32 %v4237_v20, %v4101_v50  ;;  %v3207_v41 = vsel %vm3072_vm4, %v3159_v36, 0.0  ;;  %3393 = vst.msk [vmem:[%s5220_s28 + $0x44] sm:$0xf] %vm3375_vm3, %v3772_v16  ;;  %v3109_v59 = vadd.f32 %v3108_v39, %v3107_v17  ;;  %v3209_v15 = vsel %vm3072_vm4, %v3160_v0, 0.0 }
 0x20d   : > { %v4271_v43 = vadd.f32 %v2957_v5, %v1780_v19  ;;  %v3208_v60 = vadd.f32 %v3207_v41, %v3206_v34  ;;  %v3062_v61 = vadd.f32 %v4268_v48, %v5213_v25  ;;  %v3060_v4 = vadd.f32 %v4269_v23, %v5213_v25 }
 0x20e   : > { %v3063_v18 = vadd.f32 %v4270_v38, %v5213_v25  ;;  %v3110_v51 = vsel %vm3072_vm4, %v3059_v29, 0.0  ;;  %v3211_v47 = vsel %vm3072_vm4, %v3161_v35, 0.0 }
 0x20f   : > { %v3061_v30 = vadd.f32 %v4271_v43, %v5213_v25  ;;  %v3210_v54 = vadd.f32 %v3209_v15, %v3208_v60  ;;  %v3777_v55 = vpack.c.bf16 %v3062_v61, %v3062_v61  ;;  %v3111_v53 = vadd.f32 %v3110_v51, %v3109_v59 }
 0x210   : > { %v4104_v14 = vpop.f32.mrb[24].mxu1  ;;  %v3112_v57 = vsel %vm3072_vm4, %v3060_v4, 0.0  ;;  %v3162_v58 = vmul.f32 %v3060_v4, %v3060_v4  ;;  %v3775_v6 = vpack.c.bf16 %v3060_v4, %v3060_v4  ;;  %v3164_v11 = vmul.f32 %v3062_v61, %v3062_v61 }
 0x211   : > { %v1793_v31 = vpop.f32.mrb[25].mxu1  ;;  %v4240_v37 = vpop.f32.mrb[24].mxu0  ;;  %3398 = vst.msk [vmem:[%s5220_s28 + $0x58] sm:$0xf] %vm3375_vm3, %v3777_v55  ;;  %v3212_v62 = vadd.f32 %v3211_v47, %v3210_v54  ;;  %v3113_v13 = vadd.f32 %v3112_v57, %v3111_v53  ;;  %v3778_v28 = vpack.c.bf16 %v3063_v18, %v3063_v18  ;;  %v3114_v29 = vsel %vm3072_vm4, %v3061_v30, 0.0 }
 0x212   : > { %v4105_v56 = vpop.f32.mrb[26].mxu1  ;;  %v2970_v52 = vpop.f32.mrb[25].mxu0  ;;  %v3213_v27 = vsel %vm3072_vm4, %v3162_v58, 0.0  ;;  %3396 = vst.msk [vmem:[%s5220_s28 + $0x50] sm:$0xf] %vm3375_vm3, %v3775_v6  ;;  %v3165_v8 = vmul.f32 %v3063_v18, %v3063_v18  ;;  %v3163_v26 = vmul.f32 %v3061_v30, %v3061_v30  ;;  %v3776_v32 = vpack.c.bf16 %v3061_v30, %v3061_v30 }
 0x213   : > { %v1796_v9 = vpop.f32.mrb[27].mxu1  ;;  %v4241_v10 = vpop.f32.mrb[26].mxu0  ;;  %v3214_v44 = vadd.f32 %v3213_v27, %v3212_v62  ;;  %3399 = vst.msk [vmem:[%s5220_s28 + $0x5c] sm:$0xf] %vm3375_vm3, %v3778_v28  ;;  %v3115_v1 = vadd.f32 %v3114_v29, %v3113_v13  ;;  %v4272_v45 = vadd.f32 %v4240_v37, %v4104_v14  ;;  %v4273_v46 = vadd.f32 %v2970_v52, %v1793_v31 }
 0x214   : > { %v2973_v12 = vpop.f32.mrb[27].mxu0  ;;  %v4274_v24 = vadd.f32 %v4241_v10, %v4105_v56  ;;  %v3116_v3 = vsel %vm3072_vm4, %v3062_v61, 0.0  ;;  %v3215_v40 = vsel %vm3072_vm4, %v3163_v26, 0.0  ;;  %3397 = vst.msk [vmem:[%s5220_s28 + $0x54] sm:$0xf] %vm3375_vm3, %v3776_v32  ;;  %v3217_v21 = vsel %vm3072_vm4, %v3164_v11, 0.0 }
 0x215   : > { %v4275_v42 = vadd.f32 %v2973_v12, %v1796_v9  ;;  %v3117_v50 = vadd.f32 %v3116_v3, %v3115_v1  ;;  %v3216_v63 = vadd.f32 %v3215_v40, %v3214_v44  ;;  %v3066_v0 = vadd.f32 %v4272_v45, %v5213_v25 }
 0x216   : > { %v3064_v7 = vadd.f32 %v4273_v46, %v5213_v25  ;;  %v3067_v22 = vadd.f32 %v4274_v24, %v5213_v25  ;;  %v3118_v35 = vsel %vm3072_vm4, %v3063_v18, 0.0  ;;  %v3219_v36 = vsel %vm3072_vm4, %v3165_v8, 0.0 }
 0x217   : > { %v3065_v33 = vadd.f32 %v4275_v42, %v5213_v25  ;;  %v3218_v16 = vadd.f32 %v3217_v21, %v3216_v63  ;;  %v3781_v17 = vpack.c.bf16 %v3066_v0, %v3066_v0  ;;  %v3119_v38 = vadd.f32 %v3118_v35, %v3117_v50 }
 0x218   : > { %v4108_v49 = vpop.f32.mrb[28].mxu1  ;;  %v3120_v39 = vsel %vm3072_vm4, %v3064_v7, 0.0  ;;  %v3166_v41 = vmul.f32 %v3064_v7, %v3064_v7  ;;  %v3779_v43 = vpack.c.bf16 %v3064_v7, %v3064_v7  ;;  %v3168_v60 = vmul.f32 %v3066_v0, %v3066_v0 }
 0x219   : > { %v1809_v19 = vpop.f32.mrb[29].mxu1  ;;  %v4244_v20 = vpop.f32.mrb[28].mxu0  ;;  %3402 = vst.msk [vmem:[%s5220_s28 + $0x68] sm:$0xf] %vm3375_vm3, %v3781_v17  ;;  %v3220_v61 = vadd.f32 %v3219_v36, %v3218_v16  ;;  %v3121_v4 = vadd.f32 %v3120_v39, %v3119_v38  ;;  %v3782_v15 = vpack.c.bf16 %v3067_v22, %v3067_v22  ;;  %v3122_v18 = vsel %vm3072_vm4, %v3065_v33, 0.0 }
 0x21a   : > { %v4276_v2 = vadd.f32 %v4244_v20, %v4108_v49  ;;  %v4109_v5 = vpop.f32.mrb[30].mxu1  ;;  %v2986_v34 = vpop.f32.mrb[29].mxu0  ;;  %v3221_v14 = vsel %vm3072_vm4, %v3166_v41, 0.0  ;;  %3400 = vst.msk [vmem:[%s5220_s28 + $0x60] sm:$0xf] %vm3375_vm3, %v3779_v43  ;;  %v3167_v31 = vmul.f32 %v3065_v33, %v3065_v33  ;;  %v3780_v37 = vpack.c.bf16 %v3065_v33, %v3065_v33 }
 0x21b   : > { %v1812_v48 = vpop.f32.mrb[31].mxu1  ;;  %v4245_v23 = vpop.f32.mrb[30].mxu0  ;;  %v3222_v30 = vadd.f32 %v3221_v14, %v3220_v61  ;;  %3403 = vst.msk [vmem:[%s5220_s28 + $0x6c] sm:$0xf] %vm3375_vm3, %v3782_v15  ;;  %v3123_v51 = vadd.f32 %v3122_v18, %v3121_v4  ;;  %v4277_v54 = vadd.f32 %v2986_v34, %v1809_v19  ;;  %v3124_v56 = vsel %vm3072_vm4, %v3066_v0, 0.0 }
 0x21c   : > { %v2989_v59 = vpop.f32.mrb[31].mxu0  ;;  %v3070_v47 = vadd.f32 %v4276_v2, %v5213_v25  ;;  %v4278_v55 = vadd.f32 %v4245_v23, %v4109_v5  ;;  %v3169_v52 = vmul.f32 %v3067_v22, %v3067_v22  ;;  %v3223_v53 = vsel %vm3072_vm4, %v3167_v31, 0.0  ;;  %3401 = vst.msk [vmem:[%s5220_s28 + $0x64] sm:$0xf] %vm3375_vm3, %v3780_v37 }
 0x21d   : > { %v4279_v57 = vadd.f32 %v2989_v59, %v1812_v48  ;;  %v3225_v58 = vsel %vm3072_vm4, %v3168_v60, 0.0  ;;  %v3126_v6 = vsel %vm3072_vm4, %v3067_v22, 0.0  ;;  %v3125_v9 = vadd.f32 %v3124_v56, %v3123_v51 }
 0x21e   : > { %v3224_v10 = vadd.f32 %v3223_v53, %v3222_v30  ;;  %v3785_v11 = vpack.c.bf16 %v3070_v47, %v3070_v47  ;;  %v3068_v62 = vadd.f32 %v4277_v54, %v5213_v25  ;;  %v3071_v12 = vadd.f32 %v4278_v55, %v5213_v25 }
 0x21f   : > { %v3069_v13 = vadd.f32 %v4279_v57, %v5213_v25  ;;  %v3127_v28 = vadd.f32 %v3126_v6, %v3125_v9  ;;  %v3227_v29 = vsel %vm3072_vm4, %v3169_v52, 0.0  ;;  %v3172_v32 = vmul.f32 %v3070_v47, %v3070_v47 }
 0x220   : > { %v3226_v27 = vadd.f32 %v3225_v58, %v3224_v10  ;;  %3406 = vst.msk [vmem:[%s5220_s28 + $0x78] sm:$0xf] %vm3375_vm3, %v3785_v11  ;;  %v3128_v44 = vsel %vm3072_vm4, %v3068_v62, 0.0  ;;  %v3170_v8 = vmul.f32 %v3068_v62, %v3068_v62  ;;  %v3783_v26 = vpack.c.bf16 %v3068_v62, %v3068_v62 }
 0x221   : > { %v3129_v1 = vadd.f32 %v3128_v44, %v3127_v28  ;;  %v3786_v46 = vpack.c.bf16 %v3071_v12, %v3071_v12  ;;  %v3130_v25 = vsel %vm3072_vm4, %v3069_v13, 0.0  ;;  %v3171_v3 = vmul.f32 %v3069_v13, %v3069_v13 }
 0x222   : > { %v3228_v45 = vadd.f32 %v3227_v29, %v3226_v27  ;;  %v3229_v24 = vsel %vm3072_vm4, %v3170_v8, 0.0  ;;  %3404 = vst.msk [vmem:[%s5220_s28 + $0x70] sm:$0xf] %vm3375_vm3, %v3783_v26  ;;  %v3784_v40 = vpack.c.bf16 %v3069_v13, %v3069_v13  ;;  %v3132_v50 = vsel %vm3072_vm4, %v3070_v47, 0.0 }
 0x223   : > { %3407 = vst.msk [vmem:[%s5220_s28 + $0x7c] sm:$0xf] %vm3375_vm3, %v3786_v46  ;;  %v3131_v49 = vadd.f32 %v3130_v25, %v3129_v1  ;;  %v3173_v63 = vmul.f32 %v3071_v12, %v3071_v12  ;;  %v3231_v0 = vsel %vm3072_vm4, %v3171_v3, 0.0  ;;  %v3233_v20 = vsel %vm3072_vm4, %v3172_v32, 0.0 }
 0x224   : > { %v3230_v42 = vadd.f32 %v3229_v24, %v3228_v45  ;;  %3405 = vst.msk [vmem:[%s5220_s28 + $0x74] sm:$0xf] %vm3375_vm3, %v3784_v40  ;;  %v3134_v21 = vsel %vm3072_vm4, %v3071_v12, 0.0 }
 0x225   : > { %v3133_v7 = vadd.f32 %v3132_v50, %v3131_v49  ;;  %v3235_v2 = vsel %vm3072_vm4, %v3173_v63, 0.0 }
 0x226   : > { %v3232_v19 = vadd.f32 %v3231_v0, %v3230_v42 }
 0x227   : > { %v3135_v22 = vadd.f32 %v3134_v21, %v3133_v7 }
 0x228   : > { %v3234_v33 = vadd.f32 %v3233_v20, %v3232_v19 }
 0x229   : > { %v3136_v5 = vrot.slane %v3135_v22, 4 }
 0x22a   : > { %v3236_v34 = vadd.f32 %v3235_v2, %v3234_v33 }
 0x22b   : > { %v3137_v35 = vadd.f32 %v3136_v5, %v3135_v22 }
 0x22c   : > { %v3237_v36 = vrot.slane %v3236_v34, 4 }
 0x22d   : > { %v3138_v16 = vrot.slane %v3137_v35, 2 }
 0x22e   : > { %v3238_v17 = vadd.f32 %v3237_v36, %v3236_v34 }
 0x22f   : > { %v3139_v48 = vadd.f32 %v3138_v16, %v3137_v35 }
 0x230   : > { %v3239_v23 = vrot.slane %v3238_v17, 2 }
 0x231   : > { %v3140_v38 = vrot.slane %v3139_v48, 1 }
 0x232   : > { %v3240_v39 = vadd.f32 %v3239_v23, %v3238_v17 }
 0x233   : > { %v3141_v43 = vadd.f32 %v3140_v38, %v3139_v48 }
 0x234   : > { %v3241_v41 = vrot.slane %v3240_v39, 1 }
 0x236   : > { %v3242_v59 = vadd.f32 %v3241_v41, %v3240_v39 }
 0x238   : > { %v3244_v60 = vsel %vm3243_vm5, %v3141_v43, %v3242_v59 }
 0x239   : > { %3246 = vst.msk [vmem:[%s321_s8] sm:$0x3] %vm3245_vm6, %v3244_v60 }
 0x23a PF: > { %s17_s23 = sadd.s32 1, %s4561_s23   ;;  %s5409_s21 = smov %s4557_s22 }
 0x23b   : > { %p14_p5 = scmp.ge.s32.totalorder %s17_s23, 4   ;;  %s5410_s22 = smov %s5412_s3 }
 0x23d   :  { %16 = sbr.rel (!%p14_p5) target bundleno = 2 (0x2), region = 103 }

// kernel: double_conv.4
= control target key start
LH: loop header
LB: loop body
LE: loop exit
PB: predicated region body
PF: predicated region fallthrough
CT: control target
= control target key end

     0   :  { %s4821_s21 = smov 0   ;;  %s4823_s22 = smov 0   ;;  %s5685_s0 = inlined_call_operand.vmem [shape: bf16[2,16,16,8], index: 0, kind: input, shape index: {}]   ;;  %s5686_s1 = inlined_call_operand.vmem [shape: bf16[9,8,8], index: 1, kind: input, shape index: {}]   ;;  %s5687_s2 = inlined_call_operand.vmem [shape: f32[1,8], index: 2, kind: input, shape index: {}]   ;;  %s5688_s3 = inlined_call_operand.vmem [shape: f32[1,8], index: 3, kind: input, shape index: {}]   ;;  %s5689_s4 = inlined_call_operand.vmem [shape: f32[1,8], index: 4, kind: input, shape index: {}]   ;;  %s5690_s5 = inlined_call_operand.vmem [shape: bf16[2,16,16,8], index: 5, kind: output, shape index: {0}]   ;;  %s5691_s6 = inlined_call_operand.vmem [shape: f32[2,2,8], index: 6, kind: output, shape index: {1}]  }
   0x1   :  { %s4825_s23 = smov 0  }
   0x2 LB: > { %s29_s24 = sadd.s32 1, %s4779_s22  ;;  %p3701_p0 = scmp.ge.s32.totalorder %s4783_s23, 1  ;;  %s4783_s23 = sphi %s4825_s23, %s17_s23   ;;  %s4779_s22 = sphi %s4823_s22, %s5693_s22   ;;  %s4775_s21 = sphi %s4821_s21, %s5692_s21  }
   0x3   : > { %p31_p1 = scmp.ge.s32.totalorder %s29_s24, 2  ;;  %p248_p2 = scmp.lt.s32.totalorder %s4783_s23, 3 }
   0x5   : > { %s5695_s24 = smov (%p31_p1, %s29_s24), 0  ;;  %p249_p3 = pnand %p3701_p0, %p248_p2 }
   0x6   : > { %v3709_v0 = vld [vmem:[%s5686_s1 + $0x4] sm:$0xf] (!%p249_p3)  ;;  %vm738_vm0 = vcmask (!%p249_p3), 1043456   ;;  %v4847_v1 = vld [vmem:[%s5686_s1 + $0x10] sm:$0xf] (!%p249_p3)  ;;  %vm501_vm1 = vcmask (!%p249_p3), 64512  }
   0x7   : > { %252 = sbr.rel (%p249_p3) target bundleno = 570 (0x23a), region = 40  ;;  %4726 = vmatprep.subr.msk.bf16.mxu1 (!%p249_p3), %vm738_vm0, %v3709_v0  ;;  %4730 = vmatprep.subr.msk.bf16.mxu0 (!%p249_p3), %vm738_vm0, %v4847_v1  ;;  %v740_v2 = vsel (!%p249_p3), %vm738_vm0, %v3709_v0, 0  ;;  %v4855_v3 = vsel (!%p249_p3), %vm738_vm0, %v4847_v1, 0  ;;  %vm504_vm2 = vcmask (!%p249_p3), 58368   ;;  %p295_p4 = scmp.lt.s32.totalorder (!%p249_p3), %s4775_s21, 1  ;;  %v4785_v4 = vmov (!%p249_p3), 0.0  }
   0x8   : > { %4163 = vmatpush3.bf16.msra.mxu1 (!%p249_p3), %v740_v2  ;;  %4299 = vmatpush3.bf16.msra.mxu0 (!%p249_p3), %v4855_v3  ;;  %502 = vst.msk [vmem:[#allocation2] sm:$0xff] (!%p249_p3), %vm501_vm1, %v4785_v4  ;;  %503 = vst.msk [vmem:[#allocation2 + $0x8] sm:$0xff] (!%p249_p3), %vm501_vm1, %v4785_v4  ;;  %v638_v5 = vld [vmem:[%s5686_s1] sm:$0xf] (!%p249_p3)  ;;  %v3793_v6 = vld [vmem:[%s5686_s1 + $0x14] sm:$0xf] (!%p249_p3) }
   0x9   : > { %505 = vst.msk [vmem:[#allocation2 + $0x10] sm:$0x3] (!%p249_p3), %vm504_vm2, %v4785_v4  ;;  %508 = vst.msk [vmem:[#allocation2 + $0x28] sm:$0x3] (!%p249_p3), %vm504_vm2, %v4785_v4  ;;  %4727 = vmatprep.subr.msk.bf16.mxu1 (!%p249_p3), %vm738_vm0, %v638_v5  ;;  %4732 = vmatprep.subr.msk.bf16.mxu0 (!%p249_p3), %vm738_vm0, %v3793_v6  ;;  %v4937_v7 = vld [vmem:[%s5688_s3] ss:$0 sm:$0xff] (!%p249_p3) }
   0xa   : > { %506 = vst.msk [vmem:[#allocation2 + $0x18] sm:$0xff] (!%p249_p3), %vm501_vm1, %v4785_v4  ;;  %507 = vst.msk [vmem:[#allocation2 + $0x20] sm:$0xff] (!%p249_p3), %vm501_vm1, %v4785_v4  ;;  %v4941_v9 = vsel (!%p249_p3), %vm738_vm0, %v638_v5, 0  ;;  %v4945_v11 = vsel (!%p249_p3), %vm738_vm0, %v3793_v6, 0  ;;  %v4952_v20 = vld [vmem:[%s5689_s4] ss:$0 sm:$0xff] (!%p249_p3) }
   0xb   : > { %509 = vst.msk [vmem:[#allocation2 + $0x30] sm:$0xff] (!%p249_p3), %vm501_vm1, %v4785_v4  ;;  %510 = vst.msk [vmem:[#allocation2 + $0x38] sm:$0xff] (!%p249_p3), %vm501_vm1, %v4785_v4  ;;  %vm3516_vm3 = vcmask (!%p249_p3), 60416   ;;  %vm3384_vm4 = vcmask (!%p249_p3), 1040384  }
   0xc   : > { %511 = vst.msk [vmem:[#allocation2 + $0x40] sm:$0x3] (!%p249_p3), %vm504_vm2, %v4785_v4  ;;  %514 = vst.msk [vmem:[#allocation2 + $0x58] sm:$0x3] (!%p249_p3), %vm504_vm2, %v4785_v4 }
   0xd   : > { %512 = vst.msk [vmem:[#allocation2 + $0x48] sm:$0xff] (!%p249_p3), %vm501_vm1, %v4785_v4  ;;  %513 = vst.msk [vmem:[#allocation2 + $0x50] sm:$0xff] (!%p249_p3), %vm501_vm1, %v4785_v4 }
   0xe   : > { %515 = vst.msk [vmem:[#allocation2 + $0x60] sm:$0xff] %vm501_vm1, %v4785_v4  ;;  %516 = vst.msk [vmem:[#allocation2 + $0x68] sm:$0xff] %vm501_vm1, %v4785_v4  ;;  %s5697_s21 = smov (!%p295_p4, %s4775_s21), 1 }
   0xf   : > { %517 = vst.msk [vmem:[#allocation2 + $0x70] sm:$0x3] %vm504_vm2, %v4785_v4  ;;  %520 = vst.msk [vmem:[#allocation2 + $0x88] sm:$0x3] %vm504_vm2, %v4785_v4  ;;  %s3896_s9 = sshll.u32 %s5697_s21, 7  ;;  %v639_v18 = vld [vmem:[#allocation2 + $0x1] sm:$0xff] }
  0x10   : > { %518 = vst.msk [vmem:[#allocation2 + $0x78] sm:$0xff] %vm501_vm1, %v4785_v4  ;;  %519 = vst.msk [vmem:[#allocation2 + $0x80] sm:$0xff] %vm501_vm1, %v4785_v4  ;;  %s4932_s12 = scalar_lea.vmem %s5685_s0, %s3896_s9  ;;  %v640_v19 = vld [vmem:[#allocation2 + $0x9] sm:$0xff] }
  0x11   : > { %521 = vst.msk [vmem:[#allocation2 + $0x90] sm:$0xff] %vm501_vm1, %v4785_v4  ;;  %522 = vst.msk [vmem:[#allocation2 + $0x98] sm:$0xff] %vm501_vm1, %v4785_v4  ;;  %v3931_v8 = vld [vmem:[%s4932_s12] sm:$0xff]   ;;  %v3994_v10 = vld [vmem:[%s4932_s12 + $0x8] sm:$0xff]   ;;  %v671_v25 = vpack.c.bf16 %v640_v19, %v639_v18 }
  0x12   : > { %523 = vst.msk [vmem:[#allocation2 + $0xa0] sm:$0x3] %vm504_vm2, %v4785_v4  ;;  %526 = vst.msk [vmem:[#allocation2 + $0xb8] sm:$0x3] %vm504_vm2, %v4785_v4  ;;  %v3995_v12 = vld [vmem:[%s4932_s12 + $0x10] sm:$0xff]   ;;  %v3932_v13 = vunpack.c.l.bf16 %v3931_v8  ;;  %v3933_v14 = vunpack.c.h.bf16 %v3931_v8  ;;  %v3936_v15 = vunpack.c.l.bf16 %v3994_v10  ;;  %v3937_v16 = vunpack.c.h.bf16 %v3994_v10  ;;  %v3996_v17 = vld [vmem:[%s4932_s12 + $0x18] sm:$0xff]  }
  0x13   : > { %524 = vst.msk [vmem:[#allocation2 + $0xa8] sm:$0xff] %vm501_vm1, %v4785_v4  ;;  %525 = vst.msk [vmem:[#allocation2 + $0xb0] sm:$0xff] %vm501_vm1, %v4785_v4  ;;  %v3940_v21 = vunpack.c.l.bf16 %v3995_v12  ;;  %v3941_v22 = vunpack.c.h.bf16 %v3995_v12  ;;  %v3944_v23 = vunpack.c.l.bf16 %v3996_v17  ;;  %v3945_v24 = vunpack.c.h.bf16 %v3996_v17  ;;  %4164 = vmatprep.mubr.msk.bf16.mxu1 %vm501_vm1, %v671_v25  ;;  %v3997_v41 = vld [vmem:[%s4932_s12 + $0x20] sm:$0xff]   ;;  %v3998_v42 = vld [vmem:[%s4932_s12 + $0x28] sm:$0xff]  }
  0x14   : > { %527 = vst.msk [vmem:[#allocation2 + $0xc0] sm:$0xff] %vm501_vm1, %v4785_v4  ;;  %528 = vst.msk [vmem:[#allocation2 + $0xc8] sm:$0xff] %vm501_vm1, %v4785_v4  ;;  %v398_v26 = vmul.f32 %v3932_v13, %v4937_v7  ;;  %v399_v27 = vmul.f32 %v3933_v14, %v4937_v7  ;;  %v400_v28 = vmul.f32 %v3936_v15, %v4937_v7  ;;  %v3999_v47 = vld [vmem:[%s4932_s12 + $0x30] sm:$0xff]   ;;  %v4000_v48 = vld [vmem:[%s4932_s12 + $0x38] sm:$0xff]   ;;  %v3948_v54 = vunpack.c.l.bf16 %v3997_v41 }
  0x15   : > { %529 = vst.msk [vmem:[#allocation2 + $0xd0] sm:$0x3] %vm504_vm2, %v4785_v4  ;;  %532 = vst.msk [vmem:[#allocation2 + $0xe8] sm:$0x3] %vm504_vm2, %v4785_v4  ;;  %v401_v29 = vmul.f32 %v3937_v16, %v4937_v7  ;;  %v402_v30 = vmul.f32 %v3940_v21, %v4937_v7  ;;  %v403_v31 = vmul.f32 %v3941_v22, %v4937_v7  ;;  %v3949_v55 = vunpack.c.h.bf16 %v3997_v41  ;;  %v4001_v14 = vld [vmem:[%s4932_s12 + $0x40] sm:$0xff]   ;;  %v4003_v25 = vld [vmem:[%s4932_s12 + $0x50] sm:$0xff]  }
  0x16   : > { %530 = vst.msk [vmem:[#allocation2 + $0xd8] sm:$0xff] %vm501_vm1, %v4785_v4  ;;  %531 = vst.msk [vmem:[#allocation2 + $0xe0] sm:$0xff] %vm501_vm1, %v4785_v4  ;;  %v404_v32 = vmul.f32 %v3944_v23, %v4937_v7  ;;  %v437_v33 = vadd.f32 %v4952_v20, %v398_v26  ;;  %v438_v34 = vadd.f32 %v4952_v20, %v399_v27  ;;  %v3952_v56 = vunpack.c.l.bf16 %v3998_v42 }
  0x17   : > { %533 = vst.msk [vmem:[#allocation2 + $0xf0] sm:$0xff] %vm501_vm1, %v4785_v4  ;;  %534 = vst.msk [vmem:[#allocation2 + $0xf8] sm:$0xff] %vm501_vm1, %v4785_v4  ;;  %v439_v35 = vadd.f32 %v4952_v20, %v400_v28  ;;  %v405_v36 = vmul.f32 %v3945_v24, %v4937_v7  ;;  %v440_v37 = vadd.f32 %v4952_v20, %v401_v29  ;;  %v3953_v57 = vunpack.c.h.bf16 %v3998_v42  ;;  %v4002_v24 = vld [vmem:[%s4932_s12 + $0x48] sm:$0xff]  }
  0x18   : > { %535 = vst.msk [vmem:[#allocation2 + $0x100] sm:$0x3] %vm504_vm2, %v4785_v4  ;;  %538 = vst.msk [vmem:[#allocation2 + $0x118] sm:$0x3] %vm504_vm2, %v4785_v4  ;;  %v441_v38 = vadd.f32 %v4952_v20, %v402_v30  ;;  %v442_v39 = vadd.f32 %v4952_v20, %v403_v31  ;;  %v443_v40 = vadd.f32 %v4952_v20, %v404_v32  ;;  %v469_v43 = vmax.f32 %v437_v33, 0.0 }
  0x19   : > { %536 = vst.msk [vmem:[#allocation2 + $0x108] sm:$0xff] %vm501_vm1, %v4785_v4  ;;  %537 = vst.msk [vmem:[#allocation2 + $0x110] sm:$0xff] %vm501_vm1, %v4785_v4  ;;  %v470_v44 = vmax.f32 %v438_v34, 0.0  ;;  %v471_v45 = vmax.f32 %v439_v35, 0.0  ;;  %v444_v46 = vadd.f32 %v4952_v20, %v405_v36  ;;  %v472_v49 = vmax.f32 %v440_v37, 0.0 }
  0x1a   : > { %539 = vst.msk [vmem:[#allocation2 + $0x120] sm:$0xff] %vm501_vm1, %v4785_v4  ;;  %540 = vst.msk [vmem:[#allocation2 + $0x128] sm:$0xff] %vm501_vm1, %v4785_v4  ;;  %v473_v50 = vmax.f32 %v441_v38, 0.0  ;;  %v474_v51 = vmax.f32 %v442_v39, 0.0  ;;  %v475_v52 = vmax.f32 %v443_v40, 0.0  ;;  %v3956_v58 = vunpack.c.l.bf16 %v3999_v47 }
  0x1b   : > { %541 = vst.msk [vmem:[#allocation2 + $0x130] sm:$0x3] %vm504_vm2, %v4785_v4  ;;  %544 = vst.msk [vmem:[#allocation2 + $0x148] sm:$0x3] %vm504_vm2, %v4785_v4  ;;  %v476_v53 = vmax.f32 %v444_v46, 0.0  ;;  %v3957_v59 = vunpack.c.h.bf16 %v3999_v47  ;;  %v3960_v60 = vunpack.c.l.bf16 %v4000_v48  ;;  %v406_v61 = vmul.f32 %v3948_v54, %v4937_v7 }
  0x1c   : > { %542 = vst.msk [vmem:[#allocation2 + $0x138] sm:$0xff] %vm501_vm1, %v4785_v4  ;;  %543 = vst.msk [vmem:[#allocation2 + $0x140] sm:$0xff] %vm501_vm1, %v4785_v4  ;;  %v407_v62 = vmul.f32 %v3949_v55, %v4937_v7  ;;  %v408_v63 = vmul.f32 %v3952_v56, %v4937_v7  ;;  %v3961_v0 = vunpack.c.h.bf16 %v4000_v48  ;;  %v409_v2 = vmul.f32 %v3953_v57, %v4937_v7  ;;  %v5022_v46 = vld [vmem:[%s5686_s1 + $0x18] sm:$0xf] }
  0x1d   : > { %545 = vst.msk [vmem:[#allocation2 + $0x150] sm:$0xff] %vm501_vm1, %v4785_v4  ;;  %546 = vst.msk [vmem:[#allocation2 + $0x158] sm:$0xff] %vm501_vm1, %v4785_v4  ;;  %v411_v5 = vmul.f32 %v3957_v59, %v4937_v7  ;;  %v412_v6 = vmul.f32 %v3960_v60, %v4937_v7  ;;  %v445_v8 = vadd.f32 %v4952_v20, %v406_v61  ;;  %v3964_v32 = vunpack.c.l.bf16 %v4001_v14  ;;  %v4005_v59 = vld [vmem:[%s4932_s12 + $0x60] sm:$0xff]  }
  0x1e   : > { %547 = vst.msk [vmem:[#allocation2 + $0x160] sm:$0x3] %vm504_vm2, %v4785_v4  ;;  %550 = vst.msk [vmem:[#allocation2 + $0x178] sm:$0x3] %vm504_vm2, %v4785_v4  ;;  %v446_v10 = vadd.f32 %v4952_v20, %v407_v62  ;;  %v447_v12 = vadd.f32 %v4952_v20, %v408_v63  ;;  %v413_v13 = vmul.f32 %v3961_v0, %v4937_v7  ;;  %v3965_v39 = vunpack.c.h.bf16 %v4001_v14 }
  0x1f   : > { %548 = vst.msk [vmem:[#allocation2 + $0x168] sm:$0xff] %vm501_vm1, %v4785_v4  ;;  %549 = vst.msk [vmem:[#allocation2 + $0x170] sm:$0xff] %vm501_vm1, %v4785_v4  ;;  %v448_v15 = vadd.f32 %v4952_v20, %v409_v2  ;;  %v450_v17 = vadd.f32 %v4952_v20, %v411_v5  ;;  %v451_v18 = vadd.f32 %v4952_v20, %v412_v6  ;;  %v477_v19 = vmax.f32 %v445_v8, 0.0 }
  0x20   : > { %551 = vst.msk [vmem:[#allocation2 + $0x180] sm:$0xff] %vm501_vm1, %v4785_v4  ;;  %552 = vst.msk [vmem:[#allocation2 + $0x188] sm:$0xff] %vm501_vm1, %v4785_v4  ;;  %v478_v21 = vmax.f32 %v446_v10, 0.0  ;;  %v479_v22 = vmax.f32 %v447_v12, 0.0  ;;  %v452_v23 = vadd.f32 %v4952_v20, %v413_v13  ;;  %v414_v42 = vmul.f32 %v3964_v32, %v4937_v7 }
  0x21   : > { %553 = vst.msk [vmem:[#allocation2 + $0x190] sm:$0x3] %vm504_vm2, %v4785_v4  ;;  %556 = vst.msk [vmem:[#allocation2 + $0x1a8] sm:$0x3] %vm504_vm2, %v4785_v4  ;;  %v480_v29 = vmax.f32 %v448_v15, 0.0  ;;  %v482_v31 = vmax.f32 %v450_v17, 0.0  ;;  %v3969_v47 = vunpack.c.h.bf16 %v4002_v24  ;;  %v3972_v48 = vunpack.c.l.bf16 %v4003_v25 }
  0x22   : > { %554 = vst.msk [vmem:[#allocation2 + $0x198] sm:$0xff] %vm501_vm1, %v4785_v4  ;;  %555 = vst.msk [vmem:[#allocation2 + $0x1a0] sm:$0xff] %vm501_vm1, %v4785_v4  ;;  %v410_v4 = vmul.f32 %v3956_v58, %v4937_v7  ;;  %v483_v37 = vmax.f32 %v451_v18, 0.0  ;;  %v484_v38 = vmax.f32 %v452_v23, 0.0  ;;  %v3980_v14 = vunpack.c.l.bf16 %v4005_v59  ;;  %v4006_v15 = vld [vmem:[%s4932_s12 + $0x68] sm:$0xff]  }
  0x23   : > { %558 = vst.msk [vmem:[#allocation2 + $0x19] sm:$0xff] %vm501_vm1, %v469_v43  ;;  %559 = vst.msk [vmem:[#allocation2 + $0x21] sm:$0xff] %vm501_vm1, %v470_v44  ;;  %v3968_v43 = vunpack.c.l.bf16 %v4002_v24  ;;  %v4004_v44 = vld [vmem:[%s4932_s12 + $0x58] sm:$0xff]   ;;  %v417_v55 = vmul.f32 %v3969_v47, %v4937_v7  ;;  %v418_v58 = vmul.f32 %v3972_v48, %v4937_v7 }
  0x24   : > { %560 = vst.msk [vmem:[#allocation2 + $0x31] sm:$0xff] %vm501_vm1, %v471_v45  ;;  %561 = vst.msk [vmem:[#allocation2 + $0x39] sm:$0xff] %vm501_vm1, %v472_v49  ;;  %v449_v16 = vadd.f32 %v4952_v20, %v410_v4  ;;  %v415_v45 = vmul.f32 %v3965_v39, %v4937_v7  ;;  %v3976_v56 = vunpack.c.l.bf16 %v4004_v44  ;;  %v3977_v6 = vunpack.c.h.bf16 %v4004_v44 }
  0x25   : > { %562 = vst.msk [vmem:[#allocation2 + $0x49] sm:$0xff] %vm501_vm1, %v473_v50  ;;  %563 = vst.msk [vmem:[#allocation2 + $0x51] sm:$0xff] %vm501_vm1, %v474_v51  ;;  %v453_v51 = vadd.f32 %v4952_v20, %v414_v42  ;;  %v416_v54 = vmul.f32 %v3968_v43, %v4937_v7  ;;  %v456_v63 = vadd.f32 %v4952_v20, %v417_v55  ;;  %v4008_v55 = vld [vmem:[%s4932_s12 + $0x78] sm:$0xff]  }
  0x26   : > { %564 = vst.msk [vmem:[#allocation2 + $0x61] sm:$0xff] %vm501_vm1, %v475_v52  ;;  %565 = vst.msk [vmem:[#allocation2 + $0x69] sm:$0xff] %vm501_vm1, %v476_v53  ;;  %v481_v30 = vmax.f32 %v449_v16, 0.0  ;;  %v3973_v52 = vunpack.c.h.bf16 %v4003_v25  ;;  %v5031_v53 = vld [vmem:[%s5686_s1 + $0x8] sm:$0xf]  ;;  %v457_v4 = vadd.f32 %v4952_v20, %v418_v58  ;;  %v420_v8 = vmul.f32 %v3976_v56, %v4937_v7 }
  0x27   : > { %566 = vst.msk [vmem:[#allocation2 + $0x79] sm:$0xff] %vm501_vm1, %v477_v19  ;;  %567 = vst.msk [vmem:[#allocation2 + $0x81] sm:$0xff] %vm501_vm1, %v478_v21  ;;  %v485_v57 = vmax.f32 %v453_v51, 0.0  ;;  %v455_v62 = vadd.f32 %v4952_v20, %v416_v54  ;;  %v488_v13 = vmax.f32 %v456_v63, 0.0  ;;  %v421_v18 = vmul.f32 %v3977_v6, %v4937_v7 }
  0x28   : > { %568 = vst.msk [vmem:[#allocation2 + $0x91] sm:$0xff] %vm501_vm1, %v479_v22  ;;  %569 = vst.msk [vmem:[#allocation2 + $0x99] sm:$0xff] %vm501_vm1, %v480_v29  ;;  %v489_v16 = vmax.f32 %v457_v4, 0.0  ;;  %v459_v19 = vadd.f32 %v4952_v20, %v420_v8  ;;  %v3981_v21 = vunpack.c.h.bf16 %v4005_v59  ;;  %v4007_v22 = vld [vmem:[%s4932_s12 + $0x70] sm:$0xff]   ;;  %v422_v25 = vmul.f32 %v3980_v14, %v4937_v7  ;;  %s5502_s12 = scalar_lea.vmem %s5690_s5, %s3896_s9  ;;  %s3706_s9 = sshll.u32 %s5697_s21, 1 }
  0x29   : > { %570 = vst.msk [vmem:[#allocation2 + $0xa9] sm:$0xff] %vm501_vm1, %v481_v30  ;;  %571 = vst.msk [vmem:[#allocation2 + $0xb1] sm:$0xff] %vm501_vm1, %v482_v31  ;;  %v487_v12 = vmax.f32 %v455_v62, 0.0  ;;  %v3985_v30 = vunpack.c.h.bf16 %v4006_v15  ;;  %v3992_v62 = vunpack.c.l.bf16 %v4008_v55  ;;  %v3993_v63 = vunpack.c.h.bf16 %v4008_v55  ;;  %s321_s15 = scalar_lea.vmem %s5691_s6, %s3706_s9 }
  0x2a   : > { %v641_v26 = vld [vmem:[#allocation2 + $0x19] sm:$0xff]  ;;  %v642_v27 = vld [vmem:[#allocation2 + $0x21] sm:$0xff]  ;;  %572 = vst.msk [vmem:[#allocation2 + $0xc1] sm:$0xff] %vm501_vm1, %v483_v37  ;;  %573 = vst.msk [vmem:[#allocation2 + $0xc9] sm:$0xff] %vm501_vm1, %v484_v38  ;;  %v423_v29 = vmul.f32 %v3981_v21, %v4937_v7 }
  0x2b   : > { %v1706_v28 = vld [vmem:[#allocation2 + $0x31] sm:$0xff]  ;;  %v672_v33 = vpack.c.bf16 %v642_v27, %v641_v26  ;;  %v1707_v34 = vld [vmem:[#allocation2 + $0x39] sm:$0xff]  ;;  %574 = vst.msk [vmem:[#allocation2 + $0xd9] sm:$0xff] %vm501_vm1, %v485_v57  ;;  %576 = vst.msk [vmem:[#allocation2 + $0xf1] sm:$0xff] %vm501_vm1, %v487_v12  ;;  %v3984_v26 = vunpack.c.l.bf16 %v4006_v15  ;;  %v460_v27 = vadd.f32 %v4952_v20, %v421_v18  ;;  %v425_v42 = vmul.f32 %v3985_v30, %v4937_v7 }
  0x2c   : > { %v645_v35 = vld [vmem:[#allocation2 + $0x49] sm:$0xff]  ;;  %v646_v36 = vld [vmem:[#allocation2 + $0x51] sm:$0xff]  ;;  %v5005_v40 = vpack.c.bf16 %v1707_v34, %v1706_v28  ;;  %577 = vst.msk [vmem:[#allocation2 + $0xf9] sm:$0xff] %vm501_vm1, %v488_v13  ;;  %578 = vst.msk [vmem:[#allocation2 + $0x109] sm:$0xff] %vm501_vm1, %v489_v16  ;;  %v491_v28 = vmax.f32 %v459_v19, 0.0  ;;  %v462_v39 = vadd.f32 %v4952_v20, %v423_v29 }
  0x2d   : > { %v5007_v41 = vpack.c.bf16 %v646_v36, %v645_v35  ;;  %4165 = vmatmul.mubr.msk.bf16.vlgmr.msra.gmra.mrb[0].mxu1 %vm501_vm1, %v672_v33  ;;  %4300 = vmatprep.mubr.msk.bf16.mxu0 %vm501_vm1, %v672_v33  ;;  %v1710_v49 = vld [vmem:[#allocation2 + $0x61] sm:$0xff]  ;;  %v1711_v50 = vld [vmem:[#allocation2 + $0x69] sm:$0xff]  ;;  %v461_v33 = vadd.f32 %v4952_v20, %v422_v25  ;;  %v424_v34 = vmul.f32 %v3984_v26, %v4937_v7  ;;  %v3988_v35 = vunpack.c.l.bf16 %v4007_v22  ;;  %v2000_v14 = vld [vmem:[#allocation2 + $0x32] sm:$0xff] }
  0x2e   : > { %4197 = vmatpush3.bf16.msra.mxu1 %v4941_v9  ;;  %4301 = vmatmul.mubr.msk.bf16.vlgmr.msra.gmra.mrb[0].mxu0 %vm501_vm1, %v5005_v40  ;;  %v454_v9 = vadd.f32 %v4952_v20, %v415_v45  ;;  %v5046_v60 = vpack.c.bf16 %v1711_v50, %v1710_v49  ;;  %v649_v0 = vld [vmem:[#allocation2 + $0x79] sm:$0xff]  ;;  %v650_v2 = vld [vmem:[#allocation2 + $0x81] sm:$0xff]  ;;  %v3989_v36 = vunpack.c.h.bf16 %v4007_v22  ;;  %v492_v38 = vmax.f32 %v460_v27, 0.0  ;;  %580 = vst.msk [vmem:[#allocation2 + $0x121] sm:$0xff] %vm501_vm1, %v491_v28  ;;  %v2002_v19 = vld [vmem:[#allocation2 + $0x4a] sm:$0xff] }
  0x2f   : > { %4333 = vmatpush3.bf16.msra.mxu0 %v4945_v11  ;;  %4168 = vmatprep.mubr.msk.bf16.mxu1 %vm501_vm1, %v5005_v40  ;;  %v419_v11 = vmul.f32 %v3973_v52, %v4937_v7  ;;  %v5056_v10 = vpack.c.bf16 %v650_v2, %v649_v0  ;;  %v1714_v23 = vld [vmem:[#allocation2 + $0x91] sm:$0xff]  ;;  %v1715_v24 = vld [vmem:[#allocation2 + $0x99] sm:$0xff]  ;;  %v493_v43 = vmax.f32 %v461_v33, 0.0  ;;  %v463_v44 = vadd.f32 %v4952_v20, %v424_v34  ;;  %v2004_v29 = vld [vmem:[#allocation2 + $0x62] sm:$0xff] }
  0x30   : > { %4304 = vmatprep.mubr.msk.bf16.mxu0 %vm501_vm1, %v5007_v41  ;;  %4733 = vmatprep.subr.msk.bf16.mxu0 %vm738_vm0, %v5022_v46  ;;  %v486_v61 = vmax.f32 %v454_v9, 0.0  ;;  %v653_v31 = vld [vmem:[#allocation2 + $0xa9] sm:$0xff]  ;;  %v654_v32 = vld [vmem:[#allocation2 + $0xb1] sm:$0xff]  ;;  %v5080_v37 = vpack.c.bf16 %v1715_v24, %v1714_v23  ;;  %v426_v45 = vmul.f32 %v3988_v35, %v4937_v7  ;;  %v427_v47 = vmul.f32 %v3989_v36, %v4937_v7  ;;  %v1998_v59 = vld [vmem:[#allocation2 + $0x1a] sm:$0xff] }
  0x31   : > { %4728 = vmatprep.subr.msk.bf16.mxu1 %vm738_vm0, %v5031_v53  ;;  %v458_v5 = vadd.f32 %v4952_v20, %v419_v11  ;;  %v5088_v48 = vpack.c.bf16 %v654_v32, %v653_v31  ;;  %581 = vst.msk [vmem:[#allocation2 + $0x129] sm:$0xff] %vm501_vm1, %v492_v38  ;;  %v494_v49 = vmax.f32 %v462_v39, 0.0  ;;  %v464_v50 = vadd.f32 %v4952_v20, %v425_v42  ;;  %v1718_v58 = vld [vmem:[#allocation2 + $0xc1] sm:$0xff]  ;;  %v1719_v11 = vld [vmem:[#allocation2 + $0xc9] sm:$0xff]  ;;  %v2003_v21 = vld [vmem:[#allocation2 + $0x52] sm:$0xff] }
  0x32   : > { %575 = vst.msk [vmem:[#allocation2 + $0xe1] sm:$0xff] %vm501_vm1, %v486_v61  ;;  %582 = vst.msk [vmem:[#allocation2 + $0x139] sm:$0xff] %vm501_vm1, %v493_v43  ;;  %v495_v51 = vmax.f32 %v463_v44, 0.0  ;;  %v465_v52 = vadd.f32 %v4952_v20, %v426_v45  ;;  %v466_v9 = vadd.f32 %v4952_v20, %v427_v47  ;;  %v1999_v61 = vld [vmem:[#allocation2 + $0x22] sm:$0xff]  ;;  %v5109_v0 = vpack.c.bf16 %v1719_v11, %v1718_v58  ;;  %v657_v12 = vld [vmem:[#allocation2 + $0xd9] sm:$0xff] }
  0x33   : > { %v490_v17 = vmax.f32 %v458_v5, 0.0  ;;  %583 = vst.msk [vmem:[#allocation2 + $0x141] sm:$0xff] %vm501_vm1, %v494_v49  ;;  %v496_v54 = vmax.f32 %v464_v50, 0.0  ;;  %v428_v2 = vmul.f32 %v3992_v62, %v4937_v7  ;;  %v5112_v4 = vpack.c.bf16 %v1999_v61, %v1998_v59  ;;  %v659_v16 = vld [vmem:[#allocation2 + $0xf1] sm:$0xff]  ;;  %v5142_v26 = vld [vmem:[%s5686_s1 + $0x1c] sm:$0xf] }
  0x34   : > { %584 = vst.msk [vmem:[#allocation2 + $0x151] sm:$0xff] %vm501_vm1, %v495_v51  ;;  %v497_v56 = vmax.f32 %v465_v52, 0.0  ;;  %v498_v57 = vmax.f32 %v466_v9, 0.0  ;;  %v429_v5 = vmul.f32 %v3993_v63, %v4937_v7  ;;  %v2001_v7 = vld [vmem:[#allocation2 + $0x3a] sm:$0xff]  ;;  %v5133_v24 = vpack.c.bf16 %v2003_v21, %v2002_v19  ;;  %v661_v27 = vld [vmem:[#allocation2 + $0x109] sm:$0xff]  ;;  %v2008_v43 = vld [vmem:[#allocation2 + $0x92] sm:$0xff] }
  0x35   : > { %4169 = vmatmul.mubr.msk.bf16.gmra.mrb[4].mxu1 %vm501_vm1, %v5007_v41  ;;  %579 = vst.msk [vmem:[#allocation2 + $0x111] sm:$0xff] %vm501_vm1, %v490_v17  ;;  %585 = vst.msk [vmem:[#allocation2 + $0x159] sm:$0xff] %vm501_vm1, %v496_v54  ;;  %v467_v6 = vadd.f32 %v4952_v20, %v428_v2  ;;  %v660_v17 = vld [vmem:[#allocation2 + $0xf9] sm:$0xff]  ;;  %v5129_v22 = vpack.c.bf16 %v2001_v7, %v2000_v14  ;;  %v2392_v25 = vsel %vm738_vm0, %v5022_v46, 0  ;;  %v2005_v46 = vld [vmem:[#allocation2 + $0x6a] sm:$0xff]  ;;  %v1214_v21 = vsel %vm738_vm0, %v5031_v53, 0 }
  0x36   : > { %4305 = vmatmul.mubr.msk.bf16.gmra.mrb[4].mxu0 %vm501_vm1, %v5046_v60  ;;  %4172 = vmatprep.mubr.msk.bf16.mxu1 %vm501_vm1, %v5046_v60  ;;  %586 = vst.msk [vmem:[#allocation2 + $0x169] sm:$0xff] %vm501_vm1, %v497_v56  ;;  %587 = vst.msk [vmem:[#allocation2 + $0x171] sm:$0xff] %vm501_vm1, %v498_v57  ;;  %v468_v8 = vadd.f32 %v4952_v20, %v429_v5  ;;  %v5131_v23 = vpack.c.bf16 %v660_v17, %v659_v16  ;;  %v663_v30 = vld [vmem:[#allocation2 + $0x121] sm:$0xff]  ;;  %v2010_v49 = vld [vmem:[#allocation2 + $0xaa] sm:$0xff] }
  0x37   : > { %4308 = vmatprep.mubr.msk.bf16.mxu0 %vm501_vm1, %v5056_v10  ;;  %v499_v15 = vmax.f32 %v467_v6, 0.0  ;;  %v2006_v32 = vld [vmem:[#allocation2 + $0x7a] sm:$0xff]  ;;  %v2007_v33 = vld [vmem:[#allocation2 + $0x82] sm:$0xff]  ;;  %v5154_v35 = vpack.c.bf16 %v2005_v46, %v2004_v29  ;;  %v2011_v50 = vld [vmem:[#allocation2 + $0xb2] sm:$0xff] }
  0x38   : > { %v500_v18 = vmax.f32 %v468_v8, 0.0  ;;  %v664_v31 = vld [vmem:[#allocation2 + $0x129] sm:$0xff]  ;;  %v5158_v38 = vpack.c.bf16 %v2007_v33, %v2006_v32  ;;  %v2009_v44 = vld [vmem:[#allocation2 + $0x9a] sm:$0xff]  ;;  %v5174_v54 = vpack.c.bf16 %v2011_v50, %v2010_v49 }
  0x39   : > { %v658_v13 = vld [vmem:[#allocation2 + $0xe1] sm:$0xff]  ;;  %588 = vst.msk [vmem:[#allocation2 + $0x181] sm:$0xff] %vm501_vm1, %v499_v15  ;;  %v5156_v36 = vpack.c.bf16 %v664_v31, %v663_v30  ;;  %v665_v39 = vld [vmem:[#allocation2 + $0x139] sm:$0xff]  ;;  %v5170_v52 = vpack.c.bf16 %v2009_v44, %v2008_v43  ;;  %v2013_v11 = vld [vmem:[#allocation2 + $0xca] sm:$0xff] }
  0x3a   : > { %v5126_v20 = vpack.c.bf16 %v658_v13, %v657_v12  ;;  %589 = vst.msk [vmem:[#allocation2 + $0x189] sm:$0xff] %vm501_vm1, %v500_v18  ;;  %v666_v42 = vld [vmem:[#allocation2 + $0x141] sm:$0xff]  ;;  %v592_v8 = vld [vmem:[#allocation2 + $0x18] sm:$0xff]  ;;  %v594_v15 = vld [vmem:[#allocation2 + $0x30] sm:$0xff] }
  0x3b   : > { %v667_v45 = vld [vmem:[#allocation2 + $0x151] sm:$0xff]  ;;  %v5168_v51 = vpack.c.bf16 %v666_v42, %v665_v39  ;;  %v590_v57 = vld [vmem:[#allocation2] sm:$0xff]  ;;  %v591_v59 = vld [vmem:[#allocation2 + $0x8] sm:$0xff] }
  0x3c   : > { %v662_v28 = vld [vmem:[#allocation2 + $0x111] sm:$0xff]  ;;  %v668_v47 = vld [vmem:[#allocation2 + $0x159] sm:$0xff]  ;;  %v2012_v58 = vld [vmem:[#allocation2 + $0xc2] sm:$0xff]  ;;  %v622_v5 = vpack.c.bf16 %v591_v59, %v590_v57 }
  0x3d   : > { %4173 = vmatmul.mubr.msk.bf16.gmra.mrb[8].mxu1 %vm501_vm1, %v5056_v10  ;;  %v5152_v34 = vpack.c.bf16 %v662_v28, %v661_v27  ;;  %v5172_v9 = vpack.c.bf16 %v668_v47, %v667_v45  ;;  %v669_v55 = vld [vmem:[#allocation2 + $0x169] sm:$0xff]  ;;  %v670_v56 = vld [vmem:[#allocation2 + $0x171] sm:$0xff]  ;;  %v2014_v61 = vld [vmem:[#allocation2 + $0xda] sm:$0xff]  ;;  %v5186_v2 = vpack.c.bf16 %v2013_v11, %v2012_v58 }
  0x3e   : > { %4309 = vmatmul.mubr.msk.bf16.gmra.mrb[8].mxu0 %vm501_vm1, %v5080_v37  ;;  %4176 = vmatprep.mubr.msk.bf16.mxu1 %vm501_vm1, %v5080_v37  ;;  %v2015_v62 = vld [vmem:[#allocation2 + $0xe2] sm:$0xff]  ;;  %v5184_v63 = vpack.c.bf16 %v670_v56, %v669_v55  ;;  %v2016_v13 = vld [vmem:[#allocation2 + $0xf2] sm:$0xff]  ;;  %v2017_v14 = vld [vmem:[#allocation2 + $0xfa] sm:$0xff] }
  0x3f   : > { %4312 = vmatprep.mubr.msk.bf16.mxu0 %vm501_vm1, %v5088_v48  ;;  %v5188_v6 = vpack.c.bf16 %v2015_v62, %v2014_v61  ;;  %v593_v12 = vld [vmem:[#allocation2 + $0x20] sm:$0xff]  ;;  %v595_v7 = vld [vmem:[#allocation2 + $0x38] sm:$0xff]  ;;  %v2018_v16 = vld [vmem:[#allocation2 + $0x10a] sm:$0xff]  ;;  %v5199_v19 = vpack.c.bf16 %v2017_v14, %v2016_v13 }
  0x40   : > { %v2019_v17 = vld [vmem:[#allocation2 + $0x112] sm:$0xff]  ;;  %v5197_v18 = vpack.c.bf16 %v593_v12, %v592_v8  ;;  %v5212_v28 = vld [vmem:[%s5686_s1 + $0xc] sm:$0xf]  ;;  %v598_v30 = vld [vmem:[#allocation2 + $0x60] sm:$0xff] }
  0x41   : > { %v5205_v27 = vpack.c.bf16 %v2019_v17, %v2018_v16  ;;  %v596_v29 = vld [vmem:[#allocation2 + $0x48] sm:$0xff]  ;;  %v597_v46 = vld [vmem:[#allocation2 + $0x50] sm:$0xff]  ;;  %v2022_v33 = vld [vmem:[#allocation2 + $0x13a] sm:$0xff] }
  0x42   : > { %v2020_v53 = vld [vmem:[#allocation2 + $0x122] sm:$0xff]  ;;  %v2021_v31 = vld [vmem:[#allocation2 + $0x12a] sm:$0xff]  ;;  %v5222_v42 = vpack.c.bf16 %v597_v46, %v596_v29  ;;  %v600_v47 = vld [vmem:[#allocation2 + $0x78] sm:$0xff] }
  0x43   : > { %v599_v32 = vld [vmem:[#allocation2 + $0x68] sm:$0xff]  ;;  %v5224_v43 = vpack.c.bf16 %v2021_v31, %v2020_v53  ;;  %v601_v49 = vld [vmem:[#allocation2 + $0x80] sm:$0xff]  ;;  %v602_v50 = vld [vmem:[#allocation2 + $0x90] sm:$0xff] }
  0x44   : > { %v2023_v39 = vld [vmem:[#allocation2 + $0x142] sm:$0xff]  ;;  %v5226_v44 = vpack.c.bf16 %v599_v32, %v598_v30  ;;  %v2024_v55 = vld [vmem:[#allocation2 + $0x152] sm:$0xff]  ;;  %v2025_v56 = vld [vmem:[#allocation2 + $0x15a] sm:$0xff]  ;;  %v5238_v59 = vpack.c.bf16 %v601_v49, %v600_v47 }
  0x45   : > { %4177 = vmatmul.mubr.msk.bf16.gmra.mrb[12].mxu1 %vm501_vm1, %v5088_v48  ;;  %v5228_v45 = vpack.c.bf16 %v2023_v39, %v2022_v33  ;;  %v603_v57 = vld [vmem:[#allocation2 + $0x98] sm:$0xff]  ;;  %v2026_v58 = vld [vmem:[#allocation2 + $0x16a] sm:$0xff]  ;;  %v5240_v61 = vpack.c.bf16 %v2025_v56, %v2024_v55  ;;  %v606_v13 = vld [vmem:[#allocation2 + $0xc0] sm:$0xff]  ;;  %v2686_v33 = vsel %vm738_vm0, %v5142_v26, 0 }
  0x46   : > { %4313 = vmatmul.mubr.msk.bf16.gmra.mrb[12].mxu0 %vm501_vm1, %v5109_v0  ;;  %4180 = vmatprep.mubr.msk.bf16.mxu1 %vm501_vm1, %v5109_v0  ;;  %v2027_v11 = vld [vmem:[#allocation2 + $0x172] sm:$0xff]  ;;  %v5242_v62 = vpack.c.bf16 %v603_v57, %v602_v50  ;;  %v604_v8 = vld [vmem:[#allocation2 + $0xa8] sm:$0xff]  ;;  %v609_v46 = vld [vmem:[#allocation2 + $0xe0] sm:$0xff] }
  0x47   : > { %4334 = vmatprep.mubr.msk.bf16.mxu0 %vm501_vm1, %v5112_v4  ;;  %v605_v12 = vld [vmem:[#allocation2 + $0xb0] sm:$0xff]  ;;  %v2028_v14 = vld [vmem:[#allocation2 + $0x182] sm:$0xff]  ;;  %v608_v29 = vld [vmem:[#allocation2 + $0xd8] sm:$0xff] }
  0x48   : > { %v5254_v16 = vpack.c.bf16 %v605_v12, %v604_v8  ;;  %v610_v30 = vld [vmem:[#allocation2 + $0xf0] sm:$0xff]  ;;  %v611_v53 = vld [vmem:[#allocation2 + $0xf8] sm:$0xff]  ;;  %v5268_v31 = vpack.c.bf16 %v609_v46, %v608_v29  ;;  %v3844_v39 = vld [vmem:[%s5686_s1 + $0x20] sm:$0xf] }
  0x49   : > { %v5270_v32 = vpack.c.bf16 %v611_v53, %v610_v30  ;;  %v612_v47 = vld [vmem:[#allocation2 + $0x108] sm:$0xff]  ;;  %v613_v49 = vld [vmem:[#allocation2 + $0x110] sm:$0xff]  ;;  %v616_v57 = vld [vmem:[#allocation2 + $0x138] sm:$0xff]  ;;  %v1509_v53 = vsel %vm738_vm0, %v5212_v28, 0 }
  0x4a   : > { %v615_v50 = vld [vmem:[#allocation2 + $0x128] sm:$0xff]  ;;  %v5286_v55 = vpack.c.bf16 %v613_v49, %v612_v47  ;;  %v619_v8 = vld [vmem:[#allocation2 + $0x158] sm:$0xff]  ;;  %v2324_v47 = vld [vmem:[#allocation2 + $0x1a0] sm:$0xff] }
  0x4b   : > { %v1116_v29 = vld [vmem:[#allocation2 + $0xa] sm:$0xff] }
  0x4d   : > { %4181 = vmatmul.mubr.msk.bf16.gmra.mrb[16].mxu1 %vm501_vm1, %v5126_v20 }
  0x4e   : > { %4335 = vmatmul.mubr.msk.bf16.vlgmr.msra.gmra.mrb[0].mxu0 %vm501_vm1, %v5129_v22  ;;  %4184 = vmatprep.mubr.msk.bf16.mxu1 %vm501_vm1, %v5131_v23 }
  0x4f   : > { %4367 = vmatpush3.bf16.msra.mxu0 %v2392_v25  ;;  %4338 = vmatprep.mubr.msk.bf16.mxu0 %vm501_vm1, %v5133_v24  ;;  %v5203_v25 = vpack.c.bf16 %v595_v7, %v594_v15  ;;  %v2029_v15 = vld [vmem:[#allocation2 + $0x18a] sm:$0xff] }
  0x50   : > { %4734 = vmatprep.subr.msk.bf16.mxu0 %vm738_vm0, %v5142_v26  ;;  %v607_v7 = vld [vmem:[#allocation2 + $0xc8] sm:$0xff]  ;;  %v5256_v17 = vpack.c.bf16 %v2029_v15, %v2028_v14  ;;  %v614_v26 = vld [vmem:[#allocation2 + $0x120] sm:$0xff]  ;;  %v621_v15 = vld [vmem:[#allocation2 + $0x170] sm:$0xff] }
  0x51   : > { %v5288_v56 = vpack.c.bf16 %v615_v50, %v614_v26  ;;  %v620_v14 = vld [vmem:[#allocation2 + $0x168] sm:$0xff]  ;;  %v2980_v26 = vsel %vm738_vm0, %v3844_v39, 0 }
  0x52   : > { %v5310_v46 = vpack.c.bf16 %v621_v15, %v620_v14 }
  0x55   : > { %4185 = vmatmul.mubr.msk.bf16.gmra.mrb[20].mxu1 %vm501_vm1, %v5152_v34 }
  0x56   : > { %4339 = vmatmul.mubr.msk.bf16.gmra.mrb[4].mxu0 %vm501_vm1, %v5154_v35  ;;  %4188 = vmatprep.mubr.msk.bf16.mxu1 %vm501_vm1, %v5156_v36 }
  0x57   : > { %4342 = vmatprep.mubr.msk.bf16.mxu0 %vm501_vm1, %v5158_v38 }
  0x5d   : > { %4189 = vmatmul.mubr.msk.bf16.gmra.mrb[24].mxu1 %vm501_vm1, %v5168_v51 }
  0x5e   : > { %4343 = vmatmul.mubr.msk.bf16.gmra.mrb[8].mxu0 %vm501_vm1, %v5170_v52  ;;  %4192 = vmatprep.mubr.msk.bf16.mxu1 %vm501_vm1, %v5172_v9 }
  0x5f   : > { %4346 = vmatprep.mubr.msk.bf16.mxu0 %vm501_vm1, %v5174_v54 }
  0x65   : > { %4193 = vmatmul.mubr.msk.bf16.gmra.mrb[28].mxu1 %vm501_vm1, %v5184_v63 }
  0x66   : > { %4347 = vmatmul.mubr.msk.bf16.gmra.mrb[12].mxu0 %vm501_vm1, %v5186_v2  ;;  %4198 = vmatprep.mubr.msk.bf16.mxu1 %vm501_vm1, %v622_v5  ;;  %v5244_v5 = vpack.c.bf16 %v2027_v11, %v2026_v58  ;;  %v617_v58 = vld [vmem:[#allocation2 + $0x140] sm:$0xff]  ;;  %v618_v11 = vld [vmem:[#allocation2 + $0x150] sm:$0xff] }
  0x67   : > { %4350 = vmatprep.mubr.msk.bf16.mxu0 %vm501_vm1, %v5188_v6  ;;  %v5298_v12 = vpack.c.bf16 %v617_v58, %v616_v57 }
  0x6d   : > { %4199 = vmatmul.mubr.msk.bf16.vlgmr.msra.gmra.mrb[0].mxu1 %vm501_vm1, %v5197_v18 }
  0x6e   : > { %4231 = vmatpush3.bf16.msra.mxu1 %v1214_v21  ;;  %4351 = vmatmul.mubr.msk.bf16.gmra.mrb[16].mxu0 %vm501_vm1, %v5199_v19  ;;  %v5258_v21 = vpack.c.bf16 %v607_v7, %v606_v13  ;;  %v5300_v13 = vpack.c.bf16 %v619_v8, %v618_v11  ;;  %v1115_v7 = vld [vmem:[#allocation2 + $0x2] sm:$0xff] }
  0x6f   : > { %4202 = vmatprep.mubr.msk.bf16.mxu1 %vm501_vm1, %v5203_v25  ;;  %4354 = vmatprep.mubr.msk.bf16.mxu0 %vm501_vm1, %v5205_v27  ;;  %v1147_v30 = vpack.c.bf16 %v1116_v29, %v1115_v7 }
  0x70   : > { %4729 = vmatprep.subr.msk.bf16.mxu1 %vm738_vm0, %v5212_v28  ;;  %v2322_v28 = vld [vmem:[#allocation2 + $0x188] sm:$0xff] }
  0x75   : > { %4203 = vmatmul.mubr.msk.bf16.gmra.mrb[4].mxu1 %vm501_vm1, %v5222_v42 }
  0x76   : > { %4355 = vmatmul.mubr.msk.bf16.gmra.mrb[20].mxu0 %vm501_vm1, %v5224_v43  ;;  %4206 = vmatprep.mubr.msk.bf16.mxu1 %vm501_vm1, %v5226_v44 }
  0x77   : > { %4358 = vmatprep.mubr.msk.bf16.mxu0 %vm501_vm1, %v5228_v45 }
  0x7d   : > { %4207 = vmatmul.mubr.msk.bf16.gmra.mrb[8].mxu1 %vm501_vm1, %v5238_v59 }
  0x7e   : > { %4359 = vmatmul.mubr.msk.bf16.gmra.mrb[24].mxu0 %vm501_vm1, %v5240_v61  ;;  %4210 = vmatprep.mubr.msk.bf16.mxu1 %vm501_vm1, %v5242_v62 }
  0x7f   : > { %4362 = vmatprep.mubr.msk.bf16.mxu0 %vm501_vm1, %v5244_v5 }
  0x85   : > { %4211 = vmatmul.mubr.msk.bf16.gmra.mrb[12].mxu1 %vm501_vm1, %v5254_v16 }
  0x86   : > { %4363 = vmatmul.mubr.msk.bf16.gmra.mrb[28].mxu0 %vm501_vm1, %v5256_v17  ;;  %4214 = vmatprep.mubr.msk.bf16.mxu1 %vm501_vm1, %v5258_v21 }
  0x87   : > { %4368 = vmatprep.mubr.msk.bf16.mxu0 %vm501_vm1, %v5203_v25 }
  0x8d   : > { %4215 = vmatmul.mubr.msk.bf16.gmra.mrb[16].mxu1 %vm501_vm1, %v5268_v31 }
  0x8e   : > { %4369 = vmatmul.mubr.msk.bf16.vlgmr.msra.gmra.mrb[0].mxu0 %vm501_vm1, %v5222_v42  ;;  %4218 = vmatprep.mubr.msk.bf16.mxu1 %vm501_vm1, %v5270_v32 }
  0x8f   : > { %4401 = vmatpush3.bf16.msra.mxu0 %v2686_v33  ;;  %4372 = vmatprep.mubr.msk.bf16.mxu0 %vm501_vm1, %v5226_v44 }
  0x90   : > { %4735 = vmatprep.subr.msk.bf16.mxu0 %vm738_vm0, %v3844_v39 }
  0x95   : > { %4219 = vmatmul.mubr.msk.bf16.gmra.mrb[20].mxu1 %vm501_vm1, %v5286_v55 }
  0x96   : > { %4373 = vmatmul.mubr.msk.bf16.gmra.mrb[4].mxu0 %vm501_vm1, %v5238_v59  ;;  %4222 = vmatprep.mubr.msk.bf16.mxu1 %vm501_vm1, %v5288_v56 }
  0x97   : > { %4376 = vmatprep.mubr.msk.bf16.mxu0 %vm501_vm1, %v5242_v62 }
  0x9d   : > { %4223 = vmatmul.mubr.msk.bf16.gmra.mrb[24].mxu1 %vm501_vm1, %v5298_v12 }
  0x9e   : > { %4377 = vmatmul.mubr.msk.bf16.gmra.mrb[8].mxu0 %vm501_vm1, %v5254_v16  ;;  %4226 = vmatprep.mubr.msk.bf16.mxu1 %vm501_vm1, %v5300_v13 }
  0x9f   : > { %4380 = vmatprep.mubr.msk.bf16.mxu0 %vm501_vm1, %v5258_v21 }
  0xa5   : > { %4227 = vmatmul.mubr.msk.bf16.gmra.mrb[28].mxu1 %vm501_vm1, %v5310_v46 }
  0xa6   : > { %4381 = vmatmul.mubr.msk.bf16.gmra.mrb[12].mxu0 %vm501_vm1, %v5268_v31  ;;  %4232 = vmatprep.mubr.msk.bf16.mxu1 %vm501_vm1, %v1147_v30 }
  0xa7   : > { %4384 = vmatprep.mubr.msk.bf16.mxu0 %vm501_vm1, %v5270_v32 }
  0xad   : > { %4233 = vmatmul.mubr.msk.bf16.vlgmr.msra.gmra.mrb[0].mxu1 %vm501_vm1, %v5112_v4  ;;  %v2321_v4 = vld [vmem:[#allocation2 + $0x180] sm:$0xff] }
  0xae   : > { %4265 = vmatpush3.bf16.msra.mxu1 %v1509_v53  ;;  %4385 = vmatmul.mubr.msk.bf16.gmra.mrb[16].mxu0 %vm501_vm1, %v5286_v55  ;;  %v5339_v33 = vpack.c.bf16 %v2322_v28, %v2321_v4 }
  0xaf   : > { %4236 = vmatprep.mubr.msk.bf16.mxu1 %vm501_vm1, %v5129_v22  ;;  %4388 = vmatprep.mubr.msk.bf16.mxu0 %vm501_vm1, %v5288_v56 }
  0xb0   : > { %4731 = vmatprep.subr.msk.bf16.mxu1 %vm738_vm0, %v4847_v1  ;;  %v2323_v1 = vld [vmem:[#allocation2 + $0x198] sm:$0xff] }
  0xb1   : > { %v2340_v49 = vpack.c.bf16 %v2324_v47, %v2323_v1 }
  0xb5   : > { %4237 = vmatmul.mubr.msk.bf16.gmra.mrb[4].mxu1 %vm501_vm1, %v5133_v24 }
  0xb6   : > { %4389 = vmatmul.mubr.msk.bf16.gmra.mrb[20].mxu0 %vm501_vm1, %v5298_v12  ;;  %4240 = vmatprep.mubr.msk.bf16.mxu1 %vm501_vm1, %v5154_v35 }
  0xb7   : > { %4392 = vmatprep.mubr.msk.bf16.mxu0 %vm501_vm1, %v5300_v13 }
  0xbd   : > { %4241 = vmatmul.mubr.msk.bf16.gmra.mrb[8].mxu1 %vm501_vm1, %v5158_v38 }
  0xbe   : > { %4393 = vmatmul.mubr.msk.bf16.gmra.mrb[24].mxu0 %vm501_vm1, %v5310_v46  ;;  %4244 = vmatprep.mubr.msk.bf16.mxu1 %vm501_vm1, %v5170_v52 }
  0xbf   : > { %4396 = vmatprep.mubr.msk.bf16.mxu0 %vm501_vm1, %v5339_v33 }
  0xc5   : > { %4245 = vmatmul.mubr.msk.bf16.gmra.mrb[12].mxu1 %vm501_vm1, %v5174_v54 }
  0xc6   : > { %4397 = vmatmul.mubr.msk.bf16.gmra.mrb[28].mxu0 %vm501_vm1, %v2340_v49  ;;  %4248 = vmatprep.mubr.msk.bf16.mxu1 %vm501_vm1, %v5186_v2 }
  0xc7   : > { %4402 = vmatprep.mubr.msk.bf16.mxu0 %vm501_vm1, %v5005_v40  ;;  %v2616_v40 = vld [vmem:[#allocation2 + $0x189] sm:$0xff] }
  0xcd   : > { %4249 = vmatmul.mubr.msk.bf16.gmra.mrb[16].mxu1 %vm501_vm1, %v5188_v6 }
  0xce   : > { %4403 = vmatmul.mubr.msk.bf16.vlgmr.msra.gmra.mrb[0].mxu0 %vm501_vm1, %v5007_v41  ;;  %4252 = vmatprep.mubr.msk.bf16.mxu1 %vm501_vm1, %v5199_v19 }
  0xcf   : > { %4435 = vmatpush3.bf16.msra.mxu0 %v2980_v26  ;;  %4406 = vmatprep.mubr.msk.bf16.mxu0 %vm501_vm1, %v5046_v60  ;;  %v2617_v60 = vld [vmem:[#allocation2 + $0x199] sm:$0xff] }
  0xd5   : > { %4253 = vmatmul.mubr.msk.bf16.gmra.mrb[20].mxu1 %vm501_vm1, %v5205_v27 }
  0xd6   : > { %4407 = vmatmul.mubr.msk.bf16.gmra.mrb[4].mxu0 %vm501_vm1, %v5056_v10  ;;  %4256 = vmatprep.mubr.msk.bf16.mxu1 %vm501_vm1, %v5224_v43  ;;  %v2618_v10 = vld [vmem:[#allocation2 + $0x1a1] sm:$0xff] }
  0xd7   : > { %4410 = vmatprep.mubr.msk.bf16.mxu0 %vm501_vm1, %v5080_v37  ;;  %v2634_v37 = vpack.c.bf16 %v2618_v10, %v2617_v60 }
  0xdd   : > { %4257 = vmatmul.mubr.msk.bf16.gmra.mrb[24].mxu1 %vm501_vm1, %v5228_v45 }
  0xde   : > { %4411 = vmatmul.mubr.msk.bf16.gmra.mrb[8].mxu0 %vm501_vm1, %v5088_v48  ;;  %4260 = vmatprep.mubr.msk.bf16.mxu1 %vm501_vm1, %v5240_v61  ;;  %v1720_v48 = vld [vmem:[#allocation2 + $0xd9] sm:$0xff] }
  0xdf   : > { %4414 = vmatprep.mubr.msk.bf16.mxu0 %vm501_vm1, %v5109_v0  ;;  %v1721_v0 = vld [vmem:[#allocation2 + $0xe1] sm:$0xff] }
  0xe5   : > { %4261 = vmatmul.mubr.msk.bf16.gmra.mrb[28].mxu1 %vm501_vm1, %v5244_v5 }
  0xe6   : > { %4415 = vmatmul.mubr.msk.bf16.gmra.mrb[12].mxu0 %vm501_vm1, %v5126_v20  ;;  %4266 = vmatprep.mubr.msk.bf16.mxu1 %vm501_vm1, %v5197_v18  ;;  %v1744_v20 = vpack.c.bf16 %v1721_v0, %v1720_v48 }
  0xe7   : > { %4418 = vmatprep.mubr.msk.bf16.mxu0 %vm501_vm1, %v5131_v23  ;;  %v1723_v23 = vld [vmem:[#allocation2 + $0xf9] sm:$0xff] }
  0xed   : > { %4267 = vmatmul.mubr.msk.bf16.vlgmr.msra.gmra.mrb[0].mxu1 %vm501_vm1, %v5203_v25 }
  0xee   : > { %4469 = vmatpush3.bf16.msra.mxu1 %v4855_v3  ;;  %4419 = vmatmul.mubr.msk.bf16.gmra.mrb[16].mxu0 %vm501_vm1, %v5152_v34  ;;  %v2615_v3 = vld [vmem:[#allocation2 + $0x181] sm:$0xff]  ;;  %v1725_v34 = vld [vmem:[#allocation2 + $0x111] sm:$0xff] }
  0xef   : > { %4270 = vmatprep.mubr.msk.bf16.mxu1 %vm501_vm1, %v5222_v42  ;;  %4422 = vmatprep.mubr.msk.bf16.mxu0 %vm501_vm1, %v5156_v36  ;;  %v2633_v41 = vpack.c.bf16 %v2616_v40, %v2615_v3 }
  0xf5   : > { %4271 = vmatmul.mubr.msk.bf16.gmra.mrb[4].mxu1 %vm501_vm1, %v5226_v44 }
  0xf6   : > { %4423 = vmatmul.mubr.msk.bf16.gmra.mrb[20].mxu0 %vm501_vm1, %v5168_v51  ;;  %4274 = vmatprep.mubr.msk.bf16.mxu1 %vm501_vm1, %v5238_v59 }
  0xf7   : > { %4426 = vmatprep.mubr.msk.bf16.mxu0 %vm501_vm1, %v5172_v9 }
  0xfd   : > { %4275 = vmatmul.mubr.msk.bf16.gmra.mrb[8].mxu1 %vm501_vm1, %v5242_v62 }
  0xfe   : > { %4427 = vmatmul.mubr.msk.bf16.gmra.mrb[24].mxu0 %vm501_vm1, %v5184_v63  ;;  %4278 = vmatprep.mubr.msk.bf16.mxu1 %vm501_vm1, %v5254_v16  ;;  %v5494_v16 = vld [vmem:[%s5687_s2] ss:$0 sm:$0xff] }
  0xff   : > { %4430 = vmatprep.mubr.msk.bf16.mxu0 %vm501_vm1, %v2633_v41 }
 0x105   : > { %4279 = vmatmul.mubr.msk.bf16.gmra.mrb[12].mxu1 %vm501_vm1, %v5258_v21 }
 0x106   : > { %4431 = vmatmul.mubr.msk.bf16.gmra.mrb[28].mxu0 %vm501_vm1, %v2634_v37  ;;  %4282 = vmatprep.mubr.msk.bf16.mxu1 %vm501_vm1, %v5268_v31 }
 0x107   : > { %4436 = vmatprep.mubr.msk.bf16.mxu0 %vm501_vm1, %v5129_v22  ;;  %v1722_v22 = vld [vmem:[#allocation2 + $0xf1] sm:$0xff] }
 0x10d   : > { %4283 = vmatmul.mubr.msk.bf16.gmra.mrb[16].mxu1 %vm501_vm1, %v5270_v32 }
 0x10e   : > { %4437 = vmatmul.mubr.msk.bf16.vlgmr.msra.gmra.mrb[0].mxu0 %vm501_vm1, %v5133_v24  ;;  %4286 = vmatprep.mubr.msk.bf16.mxu1 %vm501_vm1, %v5286_v55  ;;  %v1724_v24 = vld [vmem:[#allocation2 + $0x109] sm:$0xff] }
 0x10f   : > { %4440 = vmatprep.mubr.msk.bf16.mxu0 %vm501_vm1, %v5154_v35  ;;  %v1745_v35 = vpack.c.bf16 %v1723_v23, %v1722_v22 }
 0x115   : > { %4287 = vmatmul.mubr.msk.bf16.gmra.mrb[20].mxu1 %vm501_vm1, %v5288_v56 }
 0x116   : > { %4441 = vmatmul.mubr.msk.bf16.gmra.mrb[4].mxu0 %vm501_vm1, %v5158_v38  ;;  %4290 = vmatprep.mubr.msk.bf16.mxu1 %vm501_vm1, %v5298_v12  ;;  %v1746_v38 = vpack.c.bf16 %v1725_v34, %v1724_v24 }
 0x117   : > { %4444 = vmatprep.mubr.msk.bf16.mxu0 %vm501_vm1, %v5170_v52  ;;  %v2912_v52 = vld [vmem:[#allocation2 + $0x1a2] sm:$0xff] }
 0x11d   : > { %4291 = vmatmul.mubr.msk.bf16.gmra.mrb[24].mxu1 %vm501_vm1, %v5300_v13 }
 0x11e   : > { %4445 = vmatmul.mubr.msk.bf16.gmra.mrb[8].mxu0 %vm501_vm1, %v5174_v54  ;;  %4294 = vmatprep.mubr.msk.bf16.mxu1 %vm501_vm1, %v5310_v46 }
 0x11f   : > { %4448 = vmatprep.mubr.msk.bf16.mxu0 %vm501_vm1, %v5186_v2 }
 0x125   : > { %4295 = vmatmul.mubr.msk.bf16.gmra.mrb[28].mxu1 %vm501_vm1, %v5339_v33 }
 0x126   : > { %4449 = vmatmul.mubr.msk.bf16.gmra.mrb[12].mxu0 %vm501_vm1, %v5188_v6  ;;  %4316 = vmatprep.mubr.msk.bf16.mxu1 %vm501_vm1, %v1744_v20 }
 0x127   : > { %4452 = vmatprep.mubr.msk.bf16.mxu0 %vm501_vm1, %v5199_v19 }
 0x12d   : > { %4317 = vmatmul.mubr.msk.bf16.vlgmr.msra.gmra.mrb[16].mxu1 %vm501_vm1, %v1745_v35 }
 0x12e   : > { %4453 = vmatmul.mubr.msk.bf16.gmra.mrb[16].mxu0 %vm501_vm1, %v5205_v27  ;;  %4320 = vmatprep.mubr.msk.bf16.mxu1 %vm501_vm1, %v1746_v38 }
 0x12f   : > { %4456 = vmatprep.mubr.msk.bf16.mxu0 %vm501_vm1, %v5224_v43 }
 0x135   : > { %4321 = vmatmul.mubr.msk.bf16.gmra.mrb[20].mxu1 %vm501_vm1, %v5156_v36  ;;  %v2911_v36 = vld [vmem:[#allocation2 + $0x19a] sm:$0xff] }
 0x136   : > { %4457 = vmatmul.mubr.msk.bf16.gmra.mrb[20].mxu0 %vm501_vm1, %v5228_v45  ;;  %4324 = vmatprep.mubr.msk.bf16.mxu1 %vm501_vm1, %v5168_v51  ;;  %v2928_v54 = vpack.c.bf16 %v2912_v52, %v2911_v36 }
 0x137   : > { %4460 = vmatprep.mubr.msk.bf16.mxu0 %vm501_vm1, %v5240_v61 }
 0x13d   : > { %4325 = vmatmul.mubr.msk.bf16.gmra.mrb[24].mxu1 %vm501_vm1, %v5172_v9 }
 0x13e   : > { %4461 = vmatmul.mubr.msk.bf16.gmra.mrb[24].mxu0 %vm501_vm1, %v5244_v5  ;;  %4328 = vmatprep.mubr.msk.bf16.mxu1 %vm501_vm1, %v5184_v63 }
 0x13f   : > { %4464 = vmatprep.mubr.msk.bf16.mxu0 %vm501_vm1, %v5256_v17 }
 0x145   : > { %4329 = vmatmul.mubr.msk.bf16.gmra.mrb[28].mxu1 %vm501_vm1, %v2633_v41 }
 0x146   : > { %4465 = vmatmul.mubr.msk.bf16.gmra.mrb[28].mxu0 %vm501_vm1, %v2928_v54 }
 0x1c0   : > { %v4268_v51 = vpop.f32.mrb[0].mxu1 }
 0x1c1   : > { %v1545_v2 = vpop.f32.mrb[1].mxu1 }
 0x1c2   : > { %v4269_v6 = vpop.f32.mrb[2].mxu1 }
 0x1c3   : > { %v1548_v9 = vpop.f32.mrb[3].mxu1 }
 0x1c8   : > { %v4272_v18 = vpop.f32.mrb[4].mxu1 }
 0x1c9   : > { %v1561_v19 = vpop.f32.mrb[5].mxu1 }
 0x1ca   : > { %v4273_v25 = vpop.f32.mrb[6].mxu1 }
 0x1cb   : > { %v1564_v27 = vpop.f32.mrb[7].mxu1 }
 0x1d0   : > { %v5475_v42 = vpop.f32.mrb[8].mxu1 }
 0x1d1   : > { %v5477_v63 = vpop.f32.mrb[9].mxu1 }
 0x1d2   : > { %v5479_v43 = vpop.f32.mrb[10].mxu1 }
 0x1d3   : > { %v5481_v44 = vpop.f32.mrb[11].mxu1 }
 0x1d8   : > { %v5483_v45 = vpop.f32.mrb[12].mxu1 }
 0x1d9   : > { %v5485_v59 = vpop.f32.mrb[13].mxu1 }
 0x1da   : > { %v5487_v61 = vpop.f32.mrb[14].mxu1 }
 0x1db   : > { %v5489_v62 = vpop.f32.mrb[15].mxu1 }
 0x1e1   : > { %v4438_v5 = vpop.f32.mrb[0].mxu0 }
 0x1e2   : > { %v4470_v17 = vadd.f32 %v4438_v5, %v4268_v51  ;;  %v3016_v21 = vpop.f32.mrb[1].mxu0 }
 0x1e3   : > { %v4471_v31 = vadd.f32 %v3016_v21, %v1545_v2  ;;  %v4439_v32 = vpop.f32.mrb[2].mxu0 }
 0x1e4   : > { %v3184_v39 = vadd.f32 %v4470_v17, %v5494_v16  ;;  %v4472_v50 = vadd.f32 %v4439_v32, %v4269_v6  ;;  %v3019_v55 = vpop.f32.mrb[3].mxu0 }
 0x1e5   : > { %v3182_v56 = vadd.f32 %v4471_v31, %v5494_v16  ;;  %v4473_v57 = vadd.f32 %v3019_v55, %v1548_v9 }
 0x1e6   : > { %v3900_v58 = vpack.c.bf16 %v3184_v39, %v3184_v39  ;;  %v3185_v11 = vadd.f32 %v4472_v50, %v5494_v16  ;;  %v3285_v14 = vmul.f32 %v3184_v39, %v3184_v39  ;;  %v3217_v47 = vsel %vm501_vm1, %v3184_v39, 0.0 }
 0x1e7   : > { %v3283_v8 = vmul.f32 %v3182_v56, %v3182_v56  ;;  %v3898_v12 = vpack.c.bf16 %v3182_v56, %v3182_v56  ;;  %v3183_v13 = vadd.f32 %v4473_v57, %v5494_v16  ;;  %v3214_v7 = vsel %vm501_vm1, %v3182_v56, 0.0 }
 0x1e8   : > { %3519 = vst.msk [vmem:[%s5502_s12 + $0x8] sm:$0xf] %vm3516_vm3, %v3900_v58  ;;  %v3901_v15 = vpack.c.bf16 %v3185_v11, %v3185_v11  ;;  %v3286_v4 = vmul.f32 %v3185_v11, %v3185_v11  ;;  %v3318_v0 = vsel %vm501_vm1, %v3285_v14, 0.0  ;;  %v3219_v23 = vsel %vm501_vm1, %v3185_v11, 0.0 }
 0x1e9   : > { %3517 = vst.msk [vmem:[%s5502_s12] sm:$0xf] %vm3516_vm3, %v3898_v12  ;;  %v3215_v29 = vsel %vm501_vm1, %v3183_v13, 0.0  ;;  %v3284_v46 = vmul.f32 %v3183_v13, %v3183_v13  ;;  %v3899_v30 = vpack.c.bf16 %v3183_v13, %v3183_v13  ;;  %v4442_v53 = vpop.f32.mrb[4].mxu0  ;;  %v3315_v49 = vsel %vm501_vm1, %v3283_v8, 0.0 }
 0x1ea   : > { %3520 = vst.msk [vmem:[%s5502_s12 + $0xc] sm:$0xf] %vm3516_vm3, %v3901_v15  ;;  %v3216_v28 = vadd.f32 %v3215_v29, %v3214_v7  ;;  %v4474_v33 = vadd.f32 %v4442_v53, %v4272_v18  ;;  %v3032_v1 = vpop.f32.mrb[5].mxu0  ;;  %v3320_v24 = vsel %vm501_vm1, %v3286_v4, 0.0 }
 0x1eb   : > { %v3316_v26 = vsel %vm501_vm1, %v3284_v46, 0.0  ;;  %3518 = vst.msk [vmem:[%s5502_s12 + $0x4] sm:$0xf] %vm3516_vm3, %v3899_v30  ;;  %v4475_v3 = vadd.f32 %v3032_v1, %v1561_v19  ;;  %v4443_v40 = vpop.f32.mrb[6].mxu0 }
 0x1ec   : > { %v3218_v41 = vadd.f32 %v3217_v47, %v3216_v28  ;;  %v3317_v60 = vadd.f32 %v3316_v26, %v3315_v49  ;;  %v3188_v10 = vadd.f32 %v4474_v33, %v5494_v16  ;;  %v4476_v37 = vadd.f32 %v4443_v40, %v4273_v25  ;;  %v3035_v48 = vpop.f32.mrb[7].mxu0 }
 0x1ed   : > { %v3186_v20 = vadd.f32 %v4475_v3, %v5494_v16  ;;  %v4477_v22 = vadd.f32 %v3035_v48, %v1564_v27 }
 0x1ee   : > { %v3319_v34 = vadd.f32 %v3318_v0, %v3317_v60  ;;  %v3904_v35 = vpack.c.bf16 %v3188_v10, %v3188_v10  ;;  %v3220_v38 = vadd.f32 %v3219_v23, %v3218_v41  ;;  %v3189_v2 = vadd.f32 %v4476_v37, %v5494_v16 }
 0x1ef   : > { %v3221_v36 = vsel %vm501_vm1, %v3186_v20, 0.0  ;;  %v3287_v52 = vmul.f32 %v3186_v20, %v3186_v20  ;;  %v3902_v54 = vpack.c.bf16 %v3186_v20, %v3186_v20  ;;  %v3187_v6 = vadd.f32 %v4477_v22, %v5494_v16 }
 0x1f0   : > { %3523 = vst.msk [vmem:[%s5502_s12 + $0x18] sm:$0xf] %vm3516_vm3, %v3904_v35  ;;  %v3321_v51 = vadd.f32 %v3320_v24, %v3319_v34  ;;  %v3222_v9 = vadd.f32 %v3221_v36, %v3220_v38  ;;  %v3289_v25 = vmul.f32 %v3188_v10, %v3188_v10  ;;  %v3905_v5 = vpack.c.bf16 %v3189_v2, %v3189_v2 }
 0x1f1   : > { %v3322_v18 = vsel %vm501_vm1, %v3287_v52, 0.0  ;;  %3521 = vst.msk [vmem:[%s5502_s12 + $0x10] sm:$0xf] %vm3516_vm3, %v3902_v54  ;;  %v4446_v19 = vpop.f32.mrb[8].mxu0  ;;  %v3223_v21 = vsel %vm501_vm1, %v3187_v6, 0.0  ;;  %v3288_v31 = vmul.f32 %v3187_v6, %v3187_v6  ;;  %v3903_v32 = vpack.c.bf16 %v3187_v6, %v3187_v6 }
 0x1f2   : > { %v3323_v27 = vadd.f32 %v3322_v18, %v3321_v51  ;;  %v3048_v17 = vpop.f32.mrb[9].mxu0  ;;  %v4478_v39 = vadd.f32 %v4446_v19, %v5475_v42  ;;  %v3225_v55 = vsel %vm501_vm1, %v3188_v10, 0.0  ;;  %3524 = vst.msk [vmem:[%s5502_s12 + $0x1c] sm:$0xf] %vm3516_vm3, %v3905_v5  ;;  %v3224_v56 = vadd.f32 %v3223_v21, %v3222_v9 }
 0x1f3   : > { %v4447_v50 = vpop.f32.mrb[10].mxu0  ;;  %v4479_v57 = vadd.f32 %v3048_v17, %v5477_v63  ;;  %v3290_v8 = vmul.f32 %v3189_v2, %v3189_v2  ;;  %v3324_v12 = vsel %vm501_vm1, %v3288_v31, 0.0  ;;  %3522 = vst.msk [vmem:[%s5502_s12 + $0x14] sm:$0xf] %vm3516_vm3, %v3903_v32  ;;  %v3326_v63 = vsel %vm501_vm1, %v3289_v25, 0.0 }
 0x1f4   : > { %v4480_v58 = vadd.f32 %v4447_v50, %v5479_v43  ;;  %v3051_v11 = vpop.f32.mrb[11].mxu0  ;;  %v3192_v13 = vadd.f32 %v4478_v39, %v5494_v16  ;;  %v3226_v14 = vadd.f32 %v3225_v55, %v3224_v56  ;;  %v3325_v15 = vadd.f32 %v3324_v12, %v3323_v27 }
 0x1f5   : > { %v4481_v42 = vadd.f32 %v3051_v11, %v5481_v44  ;;  %v3190_v7 = vadd.f32 %v4479_v57, %v5494_v16  ;;  %v3227_v43 = vsel %vm501_vm1, %v3189_v2, 0.0  ;;  %v3328_v44 = vsel %vm501_vm1, %v3290_v8, 0.0 }
 0x1f6   : > { %v3193_v29 = vadd.f32 %v4480_v58, %v5494_v16  ;;  %v3908_v46 = vpack.c.bf16 %v3192_v13, %v3192_v13  ;;  %v3327_v53 = vadd.f32 %v3326_v63, %v3325_v15  ;;  %v3228_v4 = vadd.f32 %v3227_v43, %v3226_v14 }
 0x1f7   : > { %v3191_v30 = vadd.f32 %v4481_v42, %v5494_v16  ;;  %v3229_v28 = vsel %vm501_vm1, %v3190_v7, 0.0  ;;  %v3291_v33 = vmul.f32 %v3190_v7, %v3190_v7  ;;  %v3293_v1 = vmul.f32 %v3192_v13, %v3192_v13 }
 0x1f8   : > { %3527 = vst.msk [vmem:[%s5502_s12 + $0x28] sm:$0xf] %vm3516_vm3, %v3908_v46  ;;  %v3906_v47 = vpack.c.bf16 %v3190_v7, %v3190_v7  ;;  %v3230_v26 = vadd.f32 %v3229_v28, %v3228_v4  ;;  %v3329_v3 = vadd.f32 %v3328_v44, %v3327_v53  ;;  %v3909_v41 = vpack.c.bf16 %v3193_v29, %v3193_v29 }
 0x1f9   : > { %v4450_v49 = vpop.f32.mrb[12].mxu0  ;;  %v3330_v40 = vsel %vm501_vm1, %v3291_v33, 0.0  ;;  %v3294_v10 = vmul.f32 %v3193_v29, %v3193_v29  ;;  %v3231_v37 = vsel %vm501_vm1, %v3191_v30, 0.0  ;;  %v3292_v48 = vmul.f32 %v3191_v30, %v3191_v30 }
 0x1fa   : > { %v3064_v60 = vpop.f32.mrb[13].mxu0  ;;  %3525 = vst.msk [vmem:[%s5502_s12 + $0x20] sm:$0xf] %vm3516_vm3, %v3906_v47  ;;  %v3907_v0 = vpack.c.bf16 %v3191_v30, %v3191_v30  ;;  %v3331_v22 = vadd.f32 %v3330_v40, %v3329_v3  ;;  %3528 = vst.msk [vmem:[%s5502_s12 + $0x2c] sm:$0xf] %vm3516_vm3, %v3909_v41  ;;  %v3232_v23 = vadd.f32 %v3231_v37, %v3230_v26  ;;  %v3233_v38 = vsel %vm501_vm1, %v3192_v13, 0.0 }
 0x1fb   : > { %v4451_v20 = vpop.f32.mrb[14].mxu0  ;;  %v4482_v24 = vadd.f32 %v4450_v49, %v5483_v45  ;;  %v4483_v34 = vadd.f32 %v3064_v60, %v5485_v59  ;;  %v3332_v36 = vsel %vm501_vm1, %v3292_v48, 0.0  ;;  %v3334_v45 = vsel %vm501_vm1, %v3293_v1, 0.0 }
 0x1fc   : > { %v3067_v35 = vpop.f32.mrb[15].mxu0  ;;  %3526 = vst.msk [vmem:[%s5502_s12 + $0x24] sm:$0xf] %vm3516_vm3, %v3907_v0  ;;  %v4484_v52 = vadd.f32 %v4451_v20, %v5487_v61  ;;  %v3234_v51 = vadd.f32 %v3233_v38, %v3232_v23  ;;  %v3333_v2 = vadd.f32 %v3332_v36, %v3331_v22  ;;  %v3235_v19 = vsel %vm501_vm1, %v3193_v29, 0.0 }
 0x1fd   : > { %v4485_v54 = vadd.f32 %v3067_v35, %v5489_v62  ;;  %v3196_v6 = vadd.f32 %v4482_v24, %v5494_v16  ;;  %v3194_v9 = vadd.f32 %v4483_v34, %v5494_v16  ;;  %v3336_v25 = vsel %vm501_vm1, %v3294_v10, 0.0 }
 0x1fe   : > { %v3197_v59 = vadd.f32 %v4484_v52, %v5494_v16  ;;  %v3335_v61 = vadd.f32 %v3334_v45, %v3333_v2  ;;  %v3236_v5 = vadd.f32 %v3235_v19, %v3234_v51 }
 0x1ff   : > { %v3195_v18 = vadd.f32 %v4485_v54, %v5494_v16  ;;  %v3912_v62 = vpack.c.bf16 %v3196_v6, %v3196_v6  ;;  %v3237_v17 = vsel %vm501_vm1, %v3194_v9, 0.0  ;;  %v3295_v21 = vmul.f32 %v3194_v9, %v3194_v9 }
 0x200   : > { %v4318_v27 = vpop.f32.mrb[16].mxu1  ;;  %v3910_v31 = vpack.c.bf16 %v3194_v9, %v3194_v9  ;;  %v3297_v50 = vmul.f32 %v3196_v6, %v3196_v6  ;;  %v3337_v55 = vadd.f32 %v3336_v25, %v3335_v61  ;;  %v3238_v58 = vadd.f32 %v3237_v17, %v3236_v5 }
 0x201   : > { %v1903_v32 = vpop.f32.mrb[17].mxu1  ;;  %v4454_v39 = vpop.f32.mrb[16].mxu0  ;;  %3531 = vst.msk [vmem:[%s5502_s12 + $0x38] sm:$0xf] %vm3516_vm3, %v3912_v62  ;;  %v3338_v11 = vsel %vm501_vm1, %v3295_v21, 0.0  ;;  %v3913_v8 = vpack.c.bf16 %v3197_v59, %v3197_v59  ;;  %v3239_v12 = vsel %vm501_vm1, %v3195_v18, 0.0  ;;  %v3298_v15 = vmul.f32 %v3197_v59, %v3197_v59 }
 0x202   : > { %v4319_v56 = vpop.f32.mrb[18].mxu1  ;;  %v3080_v57 = vpop.f32.mrb[17].mxu0  ;;  %3529 = vst.msk [vmem:[%s5502_s12 + $0x30] sm:$0xf] %vm3516_vm3, %v3910_v31  ;;  %v3339_v14 = vadd.f32 %v3338_v11, %v3337_v55  ;;  %v3296_v7 = vmul.f32 %v3195_v18, %v3195_v18  ;;  %v3911_v29 = vpack.c.bf16 %v3195_v18, %v3195_v18  ;;  %v3240_v43 = vadd.f32 %v3239_v12, %v3238_v58 }
 0x203   : > { %v1906_v13 = vpop.f32.mrb[19].mxu1  ;;  %v4455_v42 = vpop.f32.mrb[18].mxu0  ;;  %3532 = vst.msk [vmem:[%s5502_s12 + $0x3c] sm:$0xf] %vm3516_vm3, %v3913_v8  ;;  %v4486_v46 = vadd.f32 %v4454_v39, %v4318_v27  ;;  %v4487_v30 = vadd.f32 %v3080_v57, %v1903_v32  ;;  %v3241_v4 = vsel %vm501_vm1, %v3196_v6, 0.0  ;;  %v3342_v26 = vsel %vm501_vm1, %v3297_v50, 0.0 }
 0x204   : > { %v3083_v63 = vpop.f32.mrb[19].mxu0  ;;  %v4488_v53 = vadd.f32 %v4455_v42, %v4319_v56  ;;  %v3340_v28 = vsel %vm501_vm1, %v3296_v7, 0.0  ;;  %3530 = vst.msk [vmem:[%s5502_s12 + $0x34] sm:$0xf] %vm3516_vm3, %v3911_v29  ;;  %v3242_v44 = vadd.f32 %v3241_v4, %v3240_v43  ;;  %v3243_v60 = vsel %vm501_vm1, %v3197_v59, 0.0 }
 0x205   : > { %v4489_v33 = vadd.f32 %v3083_v63, %v1906_v13  ;;  %v3341_v1 = vadd.f32 %v3340_v28, %v3339_v14  ;;  %v3200_v47 = vadd.f32 %v4486_v46, %v5494_v16  ;;  %v3198_v49 = vadd.f32 %v4487_v30, %v5494_v16 }
 0x206   : > { %v3201_v3 = vadd.f32 %v4488_v53, %v5494_v16  ;;  %v3344_v10 = vsel %vm501_vm1, %v3298_v15, 0.0  ;;  %v3244_v22 = vadd.f32 %v3243_v60, %v3242_v44 }
 0x207   : > { %v3199_v40 = vadd.f32 %v4489_v33, %v5494_v16  ;;  %v3343_v37 = vadd.f32 %v3342_v26, %v3341_v1  ;;  %v3916_v48 = vpack.c.bf16 %v3200_v47, %v3200_v47  ;;  %v3245_v23 = vsel %vm501_vm1, %v3198_v49, 0.0 }
 0x208   : > { %v4322_v41 = vpop.f32.mrb[20].mxu1  ;;  %v3299_v24 = vmul.f32 %v3198_v49, %v3198_v49  ;;  %v3914_v34 = vpack.c.bf16 %v3198_v49, %v3198_v49  ;;  %v3301_v36 = vmul.f32 %v3200_v47, %v3200_v47  ;;  %v3246_v2 = vadd.f32 %v3245_v23, %v3244_v22 }
 0x209   : > { %v1919_v0 = vpop.f32.mrb[21].mxu1  ;;  %v4458_v20 = vpop.f32.mrb[20].mxu0  ;;  %3535 = vst.msk [vmem:[%s5502_s12 + $0x48] sm:$0xf] %vm3516_vm3, %v3916_v48  ;;  %v3345_v52 = vadd.f32 %v3344_v10, %v3343_v37  ;;  %v3917_v9 = vpack.c.bf16 %v3201_v3, %v3201_v3  ;;  %v3247_v45 = vsel %vm501_vm1, %v3199_v40, 0.0  ;;  %v3302_v19 = vmul.f32 %v3201_v3, %v3201_v3 }
 0x20a   : > { %v4323_v35 = vpop.f32.mrb[22].mxu1  ;;  %v3096_v38 = vpop.f32.mrb[21].mxu0  ;;  %v3346_v6 = vsel %vm501_vm1, %v3299_v24, 0.0  ;;  %3533 = vst.msk [vmem:[%s5502_s12 + $0x40] sm:$0xf] %vm3516_vm3, %v3914_v34  ;;  %v3300_v25 = vmul.f32 %v3199_v40, %v3199_v40  ;;  %v3915_v61 = vpack.c.bf16 %v3199_v40, %v3199_v40  ;;  %v3248_v62 = vadd.f32 %v3247_v45, %v3246_v2 }
 0x20b   : > { %v1922_v54 = vpop.f32.mrb[23].mxu1  ;;  %v4459_v51 = vpop.f32.mrb[22].mxu0  ;;  %v3347_v18 = vadd.f32 %v3346_v6, %v3345_v52  ;;  %3536 = vst.msk [vmem:[%s5502_s12 + $0x4c] sm:$0xf] %vm3516_vm3, %v3917_v9  ;;  %v4490_v27 = vadd.f32 %v4458_v20, %v4322_v41  ;;  %v4491_v5 = vadd.f32 %v3096_v38, %v1919_v0  ;;  %v3249_v21 = vsel %vm501_vm1, %v3200_v47, 0.0 }
 0x20c   : > { %v3099_v59 = vpop.f32.mrb[23].mxu0  ;;  %v4492_v17 = vadd.f32 %v4459_v51, %v4323_v35  ;;  %v3348_v31 = vsel %vm501_vm1, %v3300_v25, 0.0  ;;  %3534 = vst.msk [vmem:[%s5502_s12 + $0x44] sm:$0xf] %vm3516_vm3, %v3915_v61  ;;  %v3250_v39 = vadd.f32 %v3249_v21, %v3248_v62  ;;  %v3350_v58 = vsel %vm501_vm1, %v3301_v36, 0.0 }
 0x20d   : > { %v4493_v32 = vadd.f32 %v3099_v59, %v1922_v54  ;;  %v3349_v50 = vadd.f32 %v3348_v31, %v3347_v18  ;;  %v3204_v55 = vadd.f32 %v4490_v27, %v5494_v16  ;;  %v3202_v56 = vadd.f32 %v4491_v5, %v5494_v16 }
 0x20e   : > { %v3205_v11 = vadd.f32 %v4492_v17, %v5494_v16  ;;  %v3251_v42 = vsel %vm501_vm1, %v3201_v3, 0.0  ;;  %v3352_v14 = vsel %vm501_vm1, %v3302_v19, 0.0 }
 0x20f   : > { %v3203_v8 = vadd.f32 %v4493_v32, %v5494_v16  ;;  %v3351_v15 = vadd.f32 %v3350_v58, %v3349_v50  ;;  %v3920_v7 = vpack.c.bf16 %v3204_v55, %v3204_v55  ;;  %v3252_v43 = vadd.f32 %v3251_v42, %v3250_v39 }
 0x210   : > { %v4326_v57 = vpop.f32.mrb[24].mxu1  ;;  %v3253_v46 = vsel %vm501_vm1, %v3202_v56, 0.0  ;;  %v3303_v30 = vmul.f32 %v3202_v56, %v3202_v56  ;;  %v3918_v53 = vpack.c.bf16 %v3202_v56, %v3202_v56  ;;  %v3305_v33 = vmul.f32 %v3204_v55, %v3204_v55 }
 0x211   : > { %v1935_v12 = vpop.f32.mrb[25].mxu1  ;;  %v4462_v13 = vpop.f32.mrb[24].mxu0  ;;  %3539 = vst.msk [vmem:[%s5502_s12 + $0x58] sm:$0xf] %vm3516_vm3, %v3920_v7  ;;  %v3353_v44 = vadd.f32 %v3352_v14, %v3351_v15  ;;  %v3254_v47 = vadd.f32 %v3253_v46, %v3252_v43  ;;  %v3921_v26 = vpack.c.bf16 %v3205_v11, %v3205_v11  ;;  %v3255_v3 = vsel %vm501_vm1, %v3203_v8, 0.0 }
 0x212   : > { %v4327_v29 = vpop.f32.mrb[26].mxu1  ;;  %v3112_v63 = vpop.f32.mrb[25].mxu0  ;;  %v3354_v49 = vsel %vm501_vm1, %v3303_v30, 0.0  ;;  %3537 = vst.msk [vmem:[%s5502_s12 + $0x50] sm:$0xf] %vm3516_vm3, %v3918_v53  ;;  %v3306_v41 = vmul.f32 %v3205_v11, %v3205_v11  ;;  %v3304_v60 = vmul.f32 %v3203_v8, %v3203_v8  ;;  %v3919_v10 = vpack.c.bf16 %v3203_v8, %v3203_v8 }
 0x213   : > { %v1938_v4 = vpop.f32.mrb[27].mxu1  ;;  %v4463_v28 = vpop.f32.mrb[26].mxu0  ;;  %v3355_v40 = vadd.f32 %v3354_v49, %v3353_v44  ;;  %3540 = vst.msk [vmem:[%s5502_s12 + $0x5c] sm:$0xf] %vm3516_vm3, %v3921_v26  ;;  %v3256_v37 = vadd.f32 %v3255_v3, %v3254_v47  ;;  %v4494_v48 = vadd.f32 %v4462_v13, %v4326_v57  ;;  %v4495_v0 = vadd.f32 %v3112_v63, %v1935_v12 }
 0x214   : > { %v3115_v1 = vpop.f32.mrb[27].mxu0  ;;  %v4496_v20 = vadd.f32 %v4463_v28, %v4327_v29  ;;  %v3257_v22 = vsel %vm501_vm1, %v3204_v55, 0.0  ;;  %v3356_v23 = vsel %vm501_vm1, %v3304_v60, 0.0  ;;  %3538 = vst.msk [vmem:[%s5502_s12 + $0x54] sm:$0xf] %vm3516_vm3, %v3919_v10  ;;  %v3358_v2 = vsel %vm501_vm1, %v3305_v33, 0.0 }
 0x215   : > { %v4497_v24 = vadd.f32 %v3115_v1, %v1938_v4  ;;  %v3258_v35 = vadd.f32 %v3257_v22, %v3256_v37  ;;  %v3357_v38 = vadd.f32 %v3356_v23, %v3355_v40  ;;  %v3208_v36 = vadd.f32 %v4494_v48, %v5494_v16 }
 0x216   : > { %v3206_v52 = vadd.f32 %v4495_v0, %v5494_v16  ;;  %v3209_v6 = vadd.f32 %v4496_v20, %v5494_v16  ;;  %v3259_v19 = vsel %vm501_vm1, %v3205_v11, 0.0  ;;  %v3360_v25 = vsel %vm501_vm1, %v3306_v41, 0.0 }
 0x217   : > { %v3207_v9 = vadd.f32 %v4497_v24, %v5494_v16  ;;  %v3359_v61 = vadd.f32 %v3358_v2, %v3357_v38  ;;  %v3924_v62 = vpack.c.bf16 %v3208_v36, %v3208_v36  ;;  %v3260_v17 = vadd.f32 %v3259_v19, %v3258_v35 }
 0x218   : > { %v4330_v34 = vpop.f32.mrb[28].mxu1  ;;  %v3261_v21 = vsel %vm501_vm1, %v3206_v52, 0.0  ;;  %v3307_v31 = vmul.f32 %v3206_v52, %v3206_v52  ;;  %v3922_v32 = vpack.c.bf16 %v3206_v52, %v3206_v52  ;;  %v3309_v50 = vmul.f32 %v3208_v36, %v3208_v36 }
 0x219   : > { %v1951_v54 = vpop.f32.mrb[29].mxu1  ;;  %v4466_v51 = vpop.f32.mrb[28].mxu0  ;;  %3543 = vst.msk [vmem:[%s5502_s12 + $0x68] sm:$0xf] %vm3516_vm3, %v3924_v62  ;;  %v3361_v55 = vadd.f32 %v3360_v25, %v3359_v61  ;;  %v3262_v56 = vadd.f32 %v3261_v21, %v3260_v17  ;;  %v3925_v58 = vpack.c.bf16 %v3209_v6, %v3209_v6  ;;  %v3263_v11 = vsel %vm501_vm1, %v3207_v9, 0.0 }
 0x21a   : > { %v4498_v45 = vadd.f32 %v4466_v51, %v4330_v34  ;;  %v4331_v59 = vpop.f32.mrb[30].mxu1  ;;  %v3128_v18 = vpop.f32.mrb[29].mxu0  ;;  %v3362_v57 = vsel %vm501_vm1, %v3307_v31, 0.0  ;;  %3541 = vst.msk [vmem:[%s5502_s12 + $0x60] sm:$0xf] %vm3516_vm3, %v3922_v32  ;;  %v3308_v12 = vmul.f32 %v3207_v9, %v3207_v9  ;;  %v3923_v13 = vpack.c.bf16 %v3207_v9, %v3207_v9 }
 0x21b   : > { %v1954_v27 = vpop.f32.mrb[31].mxu1  ;;  %v4467_v5 = vpop.f32.mrb[30].mxu0  ;;  %v3363_v8 = vadd.f32 %v3362_v57, %v3361_v55  ;;  %3544 = vst.msk [vmem:[%s5502_s12 + $0x6c] sm:$0xf] %vm3516_vm3, %v3925_v58  ;;  %v3264_v42 = vadd.f32 %v3263_v11, %v3262_v56  ;;  %v4499_v15 = vadd.f32 %v3128_v18, %v1951_v54  ;;  %v3265_v29 = vsel %vm501_vm1, %v3208_v36, 0.0 }
 0x21c   : > { %v3131_v39 = vpop.f32.mrb[31].mxu0  ;;  %v3212_v14 = vadd.f32 %v4498_v45, %v5494_v16  ;;  %v4500_v7 = vadd.f32 %v4467_v5, %v4331_v59  ;;  %v3310_v63 = vmul.f32 %v3209_v6, %v3209_v6  ;;  %v3364_v43 = vsel %vm501_vm1, %v3308_v12, 0.0  ;;  %3542 = vst.msk [vmem:[%s5502_s12 + $0x64] sm:$0xf] %vm3516_vm3, %v3923_v13 }
 0x21d   : > { %v4501_v46 = vadd.f32 %v3131_v39, %v1954_v27  ;;  %v3366_v30 = vsel %vm501_vm1, %v3309_v50, 0.0  ;;  %v3267_v53 = vsel %vm501_vm1, %v3209_v6, 0.0  ;;  %v3266_v4 = vadd.f32 %v3265_v29, %v3264_v42 }
 0x21e   : > { %v3365_v28 = vadd.f32 %v3364_v43, %v3363_v8  ;;  %v3928_v33 = vpack.c.bf16 %v3212_v14, %v3212_v14  ;;  %v3210_v44 = vadd.f32 %v4499_v15, %v5494_v16  ;;  %v3213_v1 = vadd.f32 %v4500_v7, %v5494_v16 }
 0x21f   : > { %v3211_v47 = vadd.f32 %v4501_v46, %v5494_v16  ;;  %v3268_v26 = vadd.f32 %v3267_v53, %v3266_v4  ;;  %v3368_v3 = vsel %vm501_vm1, %v3310_v63, 0.0  ;;  %v3313_v10 = vmul.f32 %v3212_v14, %v3212_v14 }
 0x220   : > { %v3367_v49 = vadd.f32 %v3366_v30, %v3365_v28  ;;  %3547 = vst.msk [vmem:[%s5502_s12 + $0x78] sm:$0xf] %vm3516_vm3, %v3928_v33  ;;  %v3269_v40 = vsel %vm501_vm1, %v3210_v44, 0.0  ;;  %v3311_v41 = vmul.f32 %v3210_v44, %v3210_v44  ;;  %v3926_v60 = vpack.c.bf16 %v3210_v44, %v3210_v44 }
 0x221   : > { %v3270_v37 = vadd.f32 %v3269_v40, %v3268_v26  ;;  %v3929_v0 = vpack.c.bf16 %v3213_v1, %v3213_v1  ;;  %v3271_v16 = vsel %vm501_vm1, %v3211_v47, 0.0  ;;  %v3312_v22 = vmul.f32 %v3211_v47, %v3211_v47 }
 0x222   : > { %v3369_v48 = vadd.f32 %v3368_v3, %v3367_v49  ;;  %v3370_v20 = vsel %vm501_vm1, %v3311_v41, 0.0  ;;  %3545 = vst.msk [vmem:[%s5502_s12 + $0x70] sm:$0xf] %vm3516_vm3, %v3926_v60  ;;  %v3927_v23 = vpack.c.bf16 %v3211_v47, %v3211_v47  ;;  %v3273_v35 = vsel %vm501_vm1, %v3212_v14, 0.0 }
 0x223   : > { %3548 = vst.msk [vmem:[%s5502_s12 + $0x7c] sm:$0xf] %vm3516_vm3, %v3929_v0  ;;  %v3272_v34 = vadd.f32 %v3271_v16, %v3270_v37  ;;  %v3314_v38 = vmul.f32 %v3213_v1, %v3213_v1  ;;  %v3372_v36 = vsel %vm501_vm1, %v3312_v22, 0.0  ;;  %v3374_v51 = vsel %vm501_vm1, %v3313_v10, 0.0 }
 0x224   : > { %v3371_v24 = vadd.f32 %v3370_v20, %v3369_v48  ;;  %3546 = vst.msk [vmem:[%s5502_s12 + $0x74] sm:$0xf] %vm3516_vm3, %v3927_v23  ;;  %v3275_v2 = vsel %vm501_vm1, %v3213_v1, 0.0 }
 0x225   : > { %v3274_v52 = vadd.f32 %v3273_v35, %v3272_v34  ;;  %v3376_v45 = vsel %vm501_vm1, %v3314_v38, 0.0 }
 0x226   : > { %v3373_v54 = vadd.f32 %v3372_v36, %v3371_v24 }
 0x227   : > { %v3276_v6 = vadd.f32 %v3275_v2, %v3274_v52 }
 0x228   : > { %v3375_v9 = vadd.f32 %v3374_v51, %v3373_v54 }
 0x229   : > { %v3277_v59 = vrot.slane %v3276_v6, 4 }
 0x22a   : > { %v3377_v18 = vadd.f32 %v3376_v45, %v3375_v9 }
 0x22b   : > { %v3278_v19 = vadd.f32 %v3277_v59, %v3276_v6 }
 0x22c   : > { %v3378_v25 = vrot.slane %v3377_v18, 4 }
 0x22d   : > { %v3279_v61 = vrot.slane %v3278_v19, 2 }
 0x22e   : > { %v3379_v62 = vadd.f32 %v3378_v25, %v3377_v18 }
 0x22f   : > { %v3280_v27 = vadd.f32 %v3279_v61, %v3278_v19 }
 0x230   : > { %v3380_v5 = vrot.slane %v3379_v62, 2 }
 0x231   : > { %v3281_v17 = vrot.slane %v3280_v27, 1 }
 0x232   : > { %v3381_v21 = vadd.f32 %v3380_v5, %v3379_v62 }
 0x233   : > { %v3282_v32 = vadd.f32 %v3281_v17, %v3280_v27 }
 0x234   : > { %v3382_v31 = vrot.slane %v3381_v21, 1 }
 0x236   : > { %v3383_v39 = vadd.f32 %v3382_v31, %v3381_v21 }
 0x238   : > { %v3385_v50 = vsel %vm3384_vm4, %v3282_v32, %v3383_v39 }
 0x239   : > { %3387 = vst.msk [vmem:[%s321_s15] sm:$0x3] %vm504_vm2, %v3385_v50 }
 0x23a PF: > { %s17_s23 = sadd.s32 1, %s4783_s23   ;;  %s5692_s21 = smov %s4779_s22 }
 0x23b   : > { %p14_p5 = scmp.ge.s32.totalorder %s17_s23, 4   ;;  %s5693_s22 = smov %s5695_s24 }
 0x23d   :  { %16 = sbr.rel (!%p14_p5) target bundleno = 2 (0x2), region = 103 }

</bundles_post_ra>
